<compile_context>
chip_gen: v5e
topology: v5e:2x2
jax: 0.10.0
libtpu: 0.0.40
codegen_flags: <defaults>
</compile_context>

<pallas_src>
import functools

import numpy as np
import jax
import jax.numpy as jnp
from jax import lax
from jax.experimental import pallas as pl
from jax.experimental.pallas import tpu as pltpu


def _round_up(x, m):
    return (x + m - 1) // m * m


# ---------------------------------------------------------------------------
# Fused kernel: whole batch, all four stride-2 parity planes, one call.
# ---------------------------------------------------------------------------
def _fused_kernel(x_ref, mask_ref, w1t_ref, s1_ref, b1_ref, wdw_ref,
                  s2_ref, b2_ref, w3t_ref, s3_ref, b3_ref,
                  res_ref, br_ref, *, batch, cin, mid, cb, hp, wq, ho, wr):
    """x_ref   : (batch, 4, hp, wq, cin) -- zero-padded input split into the 4
                 (row-parity, col-parity) planes of the stride-2 grid,
                 channels-last so channels map onto the 128-wide lane axis.
       mask_ref: (4, hp, wq, 1)  -- 1 inside the image, 0 on the pad ring.
       w1t/w3t : (cin, mid) / (mid, cb) VMEM matmul weights (shuffle folded).
       s*/b*   : (1, C) folded BN scale/bias vectors.  wdw: (9, mid) dw taps.
       res_ref : (batch, ho, wr, cin) -- AvgPool2d(3,2,1) residual branch.
       br_ref  : (batch, ho, wr, cb)  -- bottleneck branch output.
    """
    x5 = x_ref[...]                                        # (B,4,hp,wq,cin)

    # ---- stage 1: grouped 1x1 conv (+ChannelShuffle folded into the weight
    #      permutation) + BN1 + ReLU.  All planes & the whole batch go through
    #      ONE MXU matmul; wq % 8 == 0 keeps the reshape an aligned regroup.
    m1 = batch * 4 * hp * wq
    x2 = x5.reshape(m1, cin)
    h2 = jnp.dot(x2, w1t_ref[...], preferred_element_type=jnp.float32)
    h2 = jnp.maximum(h2 * s1_ref[...] + b1_ref[...], 0.0)   # BN1 + ReLU
    # zero the pad ring (the matmul gives relu(bias) there, not 0)
    h5 = h2.reshape(batch, 4, hp, wq, mid) * mask_ref[...][None]

    # ---- stage 2: depthwise 3x3 stride-2 conv + AvgPool residual.  Each of
    #      the 9 taps is a static slice of a parity plane; arithmetic is
    #      vectorized over whole (batch, ho, wr, channels) slabs.
    wdw = wdw_ref[...]                                      # (9, mid)
    dw = jnp.zeros((batch, ho, wr, mid), jnp.float32)
    pool = jnp.zeros((batch, ho, wr, cin), jnp.float32)
    for kh in range(3):
        p, a = kh % 2, kh // 2
        for kw in range(3):
            q, b = kw % 2, kw // 2
            pq = 2 * p + q
            w_tap = wdw[kh * 3 + kw:kh * 3 + kw + 1, :]     # (1, mid)
            dw = dw + h5[:, pq, a:a + ho, b:b + wr, :] * w_tap[None, None]
            pool = pool + x5[:, pq, a:a + ho, b:b + wr, :]

    # residual branch: count_include_pad average pool -> /9 ; one wide store.
    res_ref[...] = pool * (1.0 / 9.0)

    # ---- stage 3: BN2 -> 1x1 conv (MXU) -> BN3 ; one wide store.
    dw2 = dw.reshape(batch * ho * wr, mid)
    dw2 = dw2 * s2_ref[...] + b2_ref[...]
    o2 = jnp.dot(dw2, w3t_ref[...], preferred_element_type=jnp.float32)
    o2 = o2 * s3_ref[...] + b3_ref[...]
    br_ref[...] = o2.reshape(batch, ho, wr, cb)


# ---------------------------------------------------------------------------
# Parameter folding + forward wrapper
# ---------------------------------------------------------------------------
def bn_scale_bias(gamma, beta, mean, var, eps=1e-5):
    scale = gamma / jnp.sqrt(var + eps)
    return scale, beta - mean * scale


def shuffle_unit_with_stride(x, params, groups):
    """x: NCHW float32.  Returns NCHW float32 with (in + branch) channels."""
    B, Cin, H, W = x.shape
    assert H % 2 == 0 and W % 2 == 0, "stride-2 unit expects even spatial dims"
    mid = params["w_dw"].shape[0]
    cb = params["w3"].shape[0]
    g = groups
    cin_g, mid_g = Cin // g, mid // g
    Ho, Wo = H // 2, W // 2
    Hp, Wp = Ho + 1, Wo + 1
    Wr = _round_up(Wo, 8)                       # 8-aligned output columns
    Wq = _round_up(max(Wp, Wr + 1), 8)          # 8-aligned plane columns

    # ---- fold parameters: dense block-diagonal grouped-conv weight with the
    #      ChannelShuffle folded as an output permutation; eval-mode BN folded
    #      to per-channel scale/bias; matmul weights pre-transposed for VMEM.
    w1 = params["w1"][:, :, 0, 0]                           # (mid, cin_g)
    w1_dense = jnp.zeros((mid, Cin), jnp.float32)
    for gi in range(g):
        w1_dense = w1_dense.at[gi * mid_g:(gi + 1) * mid_g,
                               gi * cin_g:(gi + 1) * cin_g].set(
            w1[gi * mid_g:(gi + 1) * mid_g])
    perm = np.arange(mid).reshape(g, mid_g).T.reshape(-1)   # ChannelShuffle
    s1, b1 = bn_scale_bias(*params["bn1"])
    w1t = w1_dense[perm].T                                  # (Cin, mid)
    s1, b1 = s1[perm][None, :], b1[perm][None, :]
    s2, b2 = bn_scale_bias(*params["bn2"])
    s2, b2 = s2[None, :], b2[None, :]
    s3, b3 = bn_scale_bias(*params["bn3"])
    s3, b3 = s3[None, :], b3[None, :]
    wdw = params["w_dw"][:, 0].reshape(mid, 9).T            # (9, mid)
    w3t = params["w3"][:, :, 0, 0].T                        # (mid, cb)

    # ---- layout plumbing (fused by XLA under jit): zero-pad, deinterleave
    #      into the 4 stride-2 parity planes, channels-last, lane-align width.
    xp = jnp.pad(x, ((0, 0), (0, 0), (1, 1), (1, 1)))       # (B,Cin,2Hp,2Wp)
    xp = xp.reshape(B, Cin, Hp, 2, Wp, 2)
    xp = jnp.transpose(xp, (0, 3, 5, 2, 4, 1)).reshape(B, 4, Hp, Wp, Cin)
    xp = jnp.pad(xp, ((0, 0), (0, 0), (0, 0), (0, Wq - Wp), (0, 0)))

    # per-plane mask that zeroes the pad ring (and the alignment columns)
    mask = np.zeros((4, Hp, Wq, 1), np.float32)
    for p in range(2):
        for q in range(2):
            r0, r1 = (1, Hp) if p == 0 else (0, Hp - 1)
            c0, c1 = (1, Wp) if q == 0 else (0, Wp - 1)
            mask[2 * p + q, r0:r1, c0:c1, 0] = 1.0
    mask = jnp.asarray(mask)

    kernel = functools.partial(_fused_kernel, batch=B, cin=Cin, mid=mid,
                               cb=cb, hp=Hp, wq=Wq, ho=Ho, wr=Wr)
    vmem = pl.BlockSpec(memory_space=pltpu.MemorySpace.VMEM)

    res, br = pl.pallas_call(
        kernel,
        out_shape=(jax.ShapeDtypeStruct((B, Ho, Wr, Cin), jnp.float32),
                   jax.ShapeDtypeStruct((B, Ho, Wr, cb), jnp.float32)),
        in_specs=[vmem] * 11,
        out_specs=(vmem, vmem),
        compiler_params=pltpu.CompilerParams(
            vmem_limit_bytes=32 * 1024 * 1024),
    )(xp, mask, w1t, s1, b1, wdw, s2, b2, w3t, s3, b3)

    # concat(residual, branch) along channels + back to NCHW (wrapper plumbing)
    out = jnp.concatenate([res, br], axis=-1)[:, :, :Wo, :]
    return jnp.transpose(out, (0, 3, 1, 2))


# ---------------------------------------------------------------------------
# Parameter init (deterministic, synthetic)
# ---------------------------------------------------------------------------
def init_params(key, in_channels, out_channels, groups):
    cb = out_channels - in_channels      # branch output channels
    mid = cb // 4
    cin_g = in_channels // groups
    ks = jax.random.split(key, 6)

    def bn(k, c):
        k1, k2, k3, k4 = jax.random.split(k, 4)
        gamma = jax.random.uniform(k1, (c,), jnp.float32, 0.5, 1.5)
        beta = jax.random.normal(k2, (c,), jnp.float32) * 0.1
        mean = jax.random.normal(k3, (c,), jnp.float32) * 0.1
        var = jax.random.uniform(k4, (c,), jnp.float32, 0.5, 1.5)
        return gamma, beta, mean, var

    return dict(
        w1=jax.random.normal(ks[0], (mid, cin_g, 1, 1), jnp.float32) * 0.2,
        w_dw=jax.random.normal(ks[1], (mid, 1, 3, 3), jnp.float32) * 0.2,
        w3=jax.random.normal(ks[2], (cb, mid, 1, 1), jnp.float32) * 0.2,
        bn1=bn(ks[3], mid),
        bn2=bn(ks[4], mid),
        bn3=bn(ks[5], cb),
    )


# ---------------------------------------------------------------------------
# Pure-JAX reference (mirrors the PyTorch forward, eval-mode BatchNorm)
# ---------------------------------------------------------------------------
def reference(x, params, groups, eps=1e-5):
    def bn(h, p):
        gamma, beta, mean, var = p
        inv = gamma / jnp.sqrt(var + eps)
        return ((h - mean[None, :, None, None]) * inv[None, :, None, None]
                + beta[None, :, None, None])

    g = groups
    mid = params["w_dw"].shape[0]
    dn = ("NCHW", "OIHW", "NCHW")
    h = lax.conv_general_dilated(x, params["w1"], (1, 1), "VALID",
                                 feature_group_count=g, dimension_numbers=dn)
    h = jnp.maximum(bn(h, params["bn1"]), 0.0)
    B, C, H, W = h.shape
    h = h.reshape(B, g, C // g, H, W).transpose(0, 2, 1, 3, 4).reshape(B, C, H, W)
    h = lax.conv_general_dilated(h, params["w_dw"], (2, 2), ((1, 1), (1, 1)),
                                 feature_group_count=mid, dimension_numbers=dn)
    h = bn(h, params["bn2"])
    h = lax.conv_general_dilated(h, params["w3"], (1, 1), "VALID",
                                 dimension_numbers=dn)
    h = bn(h, params["bn3"])
    res = lax.reduce_window(x, 0.0, lax.add, (1, 1, 3, 3), (1, 1, 2, 2),
                            ((0, 0), (0, 0), (1, 1), (1, 1))) / 9.0
    return jnp.concatenate([res, h], axis=1)


if __name__ == "__main__":
    B, in_channels, H, W = 2, 4, 16, 16
    # out=20, groups=2 -> branch=16, mid=4, mid/group=2: non-trivial shuffle.
    out_channels, groups = 20, 2

    key = jax.random.PRNGKey(0)
    kx, kp = jax.random.split(key)
    x = jax.random.normal(kx, (B, in_channels, H, W), jnp.float32)
    params = init_params(kp, in_channels, out_channels, groups)

    fwd = jax.jit(lambda xx, pp: shuffle_unit_with_stride(xx, pp, groups))
    out = jax.block_until_ready(fwd(x, params))
    ref = jax.block_until_ready(reference(x, params, groups))

    assert out.shape == (B, out_channels, H // 2, W // 2), out.shape
    np.testing.assert_allclose(np.asarray(out), np.asarray(ref),
                               rtol=2e-3, atol=2e-3)
    print("KERNEL_OK")
</pallas_src>

<mosaic_0001>
module attributes {stable_mosaic.version = 11 : i64} {
  func.func @_fused_kernel(%arg0: memref<2x4x9x16x4xf32, #tpu.memory_space<vmem>>, %arg1: memref<4x9x16x1xf32, #tpu.memory_space<vmem>>, %arg2: memref<4x4xf32, #tpu.memory_space<vmem>>, %arg3: memref<1x4xf32, #tpu.memory_space<vmem>>, %arg4: memref<1x4xf32, #tpu.memory_space<vmem>>, %arg5: memref<9x4xf32, #tpu.memory_space<vmem>>, %arg6: memref<1x4xf32, #tpu.memory_space<vmem>>, %arg7: memref<1x4xf32, #tpu.memory_space<vmem>>, %arg8: memref<4x16xf32, #tpu.memory_space<vmem>>, %arg9: memref<1x16xf32, #tpu.memory_space<vmem>>, %arg10: memref<1x16xf32, #tpu.memory_space<vmem>>, %arg11: memref<2x8x8x4xf32, #tpu.memory_space<vmem>>, %arg12: memref<2x8x8x16xf32, #tpu.memory_space<vmem>>) attributes {dimension_semantics = [], scalar_prefetch = 0 : i64, scratch_operands = 0 : i64, tpu.core_type = #tpu.core_type<tc>} {
    %c0 = arith.constant 0 : index
    %c0_0 = arith.constant 0 : index
    %c0_1 = arith.constant 0 : index
    %c0_2 = arith.constant 0 : index
    %c0_3 = arith.constant 0 : index
    %0 = vector.load %arg0[%c0, %c0_0, %c0_1, %c0_2, %c0_3] : memref<2x4x9x16x4xf32, #tpu.memory_space<vmem>>, vector<2x4x9x16x4xf32>
    %1 = vector.shape_cast %0 : vector<2x4x9x16x4xf32> to vector<1152x4xf32>
    %c0_4 = arith.constant 0 : index
    %c0_5 = arith.constant 0 : index
    %2 = vector.load %arg2[%c0_4, %c0_5] : memref<4x4xf32, #tpu.memory_space<vmem>>, vector<4x4xf32>
    %cst = arith.constant dense<0.000000e+00> : vector<1152x4xf32>
    %3 = tpu.matmul %1, %2, %cst {dimension_numbers = #tpu.dot_dimension_numbers<[1], [0], [0], [1], [0, 0, 1, 1], [], []>} : vector<1152x4xf32>, vector<4x4xf32>, vector<1152x4xf32> -> vector<1152x4xf32>
    %c0_6 = arith.constant 0 : index
    %c0_7 = arith.constant 0 : index
    %4 = vector.load %arg3[%c0_6, %c0_7] : memref<1x4xf32, #tpu.memory_space<vmem>>, vector<1x4xf32>
    %5 = vector.broadcast %4 : vector<1x4xf32> to vector<1152x4xf32>
    %6 = arith.mulf %3, %5 : vector<1152x4xf32>
    %c0_8 = arith.constant 0 : index
    %c0_9 = arith.constant 0 : index
    %7 = vector.load %arg4[%c0_8, %c0_9] : memref<1x4xf32, #tpu.memory_space<vmem>>, vector<1x4xf32>
    %8 = vector.broadcast %7 : vector<1x4xf32> to vector<1152x4xf32>
    %9 = arith.addf %6, %8 : vector<1152x4xf32>
    %cst_10 = arith.constant 0.000000e+00 : f32
    %10 = vector.broadcast %cst_10 : f32 to vector<1152x4xf32>
    %11 = arith.maximumf %9, %10 : vector<1152x4xf32>
    %12 = vector.shape_cast %11 : vector<1152x4xf32> to vector<2x4x9x16x4xf32>
    %c0_11 = arith.constant 0 : index
    %c0_12 = arith.constant 0 : index
    %c0_13 = arith.constant 0 : index
    %c0_14 = arith.constant 0 : index
    %13 = vector.load %arg1[%c0_11, %c0_12, %c0_13, %c0_14] : memref<4x9x16x1xf32, #tpu.memory_space<vmem>>, vector<4x9x16x1xf32>
    %14 = vector.shape_cast %13 : vector<4x9x16x1xf32> to vector<1x4x9x16x1xf32>
    %15 = vector.broadcast %14 : vector<1x4x9x16x1xf32> to vector<2x4x9x16x4xf32>
    %16 = arith.mulf %12, %15 : vector<2x4x9x16x4xf32>
    %c0_15 = arith.constant 0 : index
    %c0_16 = arith.constant 0 : index
    %17 = vector.load %arg5[%c0_15, %c0_16] : memref<9x4xf32, #tpu.memory_space<vmem>>, vector<9x4xf32>
    %cst_17 = arith.constant 0.000000e+00 : f32
    %18 = vector.broadcast %cst_17 : f32 to vector<2x8x8x4xf32>
    %cst_18 = arith.constant 0.000000e+00 : f32
    %19 = vector.broadcast %cst_18 : f32 to vector<2x8x8x4xf32>
    %20 = vector.extract_strided_slice %17 {offsets = [0, 0], sizes = [1, 4], strides = [1, 1]} : vector<9x4xf32> to vector<1x4xf32>
    %21 = vector.extract_strided_slice %16 {offsets = [0, 0, 0, 0, 0], sizes = [2, 1, 8, 8, 4], strides = [1, 1, 1, 1, 1]} : vector<2x4x9x16x4xf32> to vector<2x1x8x8x4xf32>
    %22 = vector.shape_cast %21 : vector<2x1x8x8x4xf32> to vector<2x8x8x4xf32>
    %23 = vector.shape_cast %20 : vector<1x4xf32> to vector<1x1x1x4xf32>
    %24 = vector.broadcast %23 : vector<1x1x1x4xf32> to vector<2x8x8x4xf32>
    %25 = arith.mulf %22, %24 : vector<2x8x8x4xf32>
    %26 = arith.addf %18, %25 : vector<2x8x8x4xf32>
    %27 = vector.extract_strided_slice %0 {offsets = [0, 0, 0, 0, 0], sizes = [2, 1, 8, 8, 4], strides = [1, 1, 1, 1, 1]} : vector<2x4x9x16x4xf32> to vector<2x1x8x8x4xf32>
    %28 = vector.shape_cast %27 : vector<2x1x8x8x4xf32> to vector<2x8x8x4xf32>
    %29 = arith.addf %19, %28 : vector<2x8x8x4xf32>
    %30 = vector.extract_strided_slice %17 {offsets = [1, 0], sizes = [1, 4], strides = [1, 1]} : vector<9x4xf32> to vector<1x4xf32>
    %31 = vector.extract_strided_slice %16 {offsets = [0, 1, 0, 0, 0], sizes = [2, 1, 8, 8, 4], strides = [1, 1, 1, 1, 1]} : vector<2x4x9x16x4xf32> to vector<2x1x8x8x4xf32>
    %32 = vector.shape_cast %31 : vector<2x1x8x8x4xf32> to vector<2x8x8x4xf32>
    %33 = vector.shape_cast %30 : vector<1x4xf32> to vector<1x1x1x4xf32>
    %34 = vector.broadcast %33 : vector<1x1x1x4xf32> to vector<2x8x8x4xf32>
    %35 = arith.mulf %32, %34 : vector<2x8x8x4xf32>
    %36 = arith.addf %26, %35 : vector<2x8x8x4xf32>
    %37 = vector.extract_strided_slice %0 {offsets = [0, 1, 0, 0, 0], sizes = [2, 1, 8, 8, 4], strides = [1, 1, 1, 1, 1]} : vector<2x4x9x16x4xf32> to vector<2x1x8x8x4xf32>
    %38 = vector.shape_cast %37 : vector<2x1x8x8x4xf32> to vector<2x8x8x4xf32>
    %39 = arith.addf %29, %38 : vector<2x8x8x4xf32>
    %40 = vector.extract_strided_slice %17 {offsets = [2, 0], sizes = [1, 4], strides = [1, 1]} : vector<9x4xf32> to vector<1x4xf32>
    %41 = vector.extract_strided_slice %16 {offsets = [0, 0, 0, 1, 0], sizes = [2, 1, 8, 8, 4], strides = [1, 1, 1, 1, 1]} : vector<2x4x9x16x4xf32> to vector<2x1x8x8x4xf32>
    %42 = vector.shape_cast %41 : vector<2x1x8x8x4xf32> to vector<2x8x8x4xf32>
    %43 = vector.shape_cast %40 : vector<1x4xf32> to vector<1x1x1x4xf32>
    %44 = vector.broadcast %43 : vector<1x1x1x4xf32> to vector<2x8x8x4xf32>
    %45 = arith.mulf %42, %44 : vector<2x8x8x4xf32>
    %46 = arith.addf %36, %45 : vector<2x8x8x4xf32>
    %47 = vector.extract_strided_slice %0 {offsets = [0, 0, 0, 1, 0], sizes = [2, 1, 8, 8, 4], strides = [1, 1, 1, 1, 1]} : vector<2x4x9x16x4xf32> to vector<2x1x8x8x4xf32>
    %48 = vector.shape_cast %47 : vector<2x1x8x8x4xf32> to vector<2x8x8x4xf32>
    %49 = arith.addf %39, %48 : vector<2x8x8x4xf32>
    %50 = vector.extract_strided_slice %17 {offsets = [3, 0], sizes = [1, 4], strides = [1, 1]} : vector<9x4xf32> to vector<1x4xf32>
    %51 = vector.extract_strided_slice %16 {offsets = [0, 2, 0, 0, 0], sizes = [2, 1, 8, 8, 4], strides = [1, 1, 1, 1, 1]} : vector<2x4x9x16x4xf32> to vector<2x1x8x8x4xf32>
    %52 = vector.shape_cast %51 : vector<2x1x8x8x4xf32> to vector<2x8x8x4xf32>
    %53 = vector.shape_cast %50 : vector<1x4xf32> to vector<1x1x1x4xf32>
    %54 = vector.broadcast %53 : vector<1x1x1x4xf32> to vector<2x8x8x4xf32>
    %55 = arith.mulf %52, %54 : vector<2x8x8x4xf32>
    %56 = arith.addf %46, %55 : vector<2x8x8x4xf32>
    %57 = vector.extract_strided_slice %0 {offsets = [0, 2, 0, 0, 0], sizes = [2, 1, 8, 8, 4], strides = [1, 1, 1, 1, 1]} : vector<2x4x9x16x4xf32> to vector<2x1x8x8x4xf32>
    %58 = vector.shape_cast %57 : vector<2x1x8x8x4xf32> to vector<2x8x8x4xf32>
    %59 = arith.addf %49, %58 : vector<2x8x8x4xf32>
    %60 = vector.extract_strided_slice %17 {offsets = [4, 0], sizes = [1, 4], strides = [1, 1]} : vector<9x4xf32> to vector<1x4xf32>
    %61 = vector.extract_strided_slice %16 {offsets = [0, 3, 0, 0, 0], sizes = [2, 1, 8, 8, 4], strides = [1, 1, 1, 1, 1]} : vector<2x4x9x16x4xf32> to vector<2x1x8x8x4xf32>
    %62 = vector.shape_cast %61 : vector<2x1x8x8x4xf32> to vector<2x8x8x4xf32>
    %63 = vector.shape_cast %60 : vector<1x4xf32> to vector<1x1x1x4xf32>
    %64 = vector.broadcast %63 : vector<1x1x1x4xf32> to vector<2x8x8x4xf32>
    %65 = arith.mulf %62, %64 : vector<2x8x8x4xf32>
    %66 = arith.addf %56, %65 : vector<2x8x8x4xf32>
    %67 = vector.extract_strided_slice %0 {offsets = [0, 3, 0, 0, 0], sizes = [2, 1, 8, 8, 4], strides = [1, 1, 1, 1, 1]} : vector<2x4x9x16x4xf32> to vector<2x1x8x8x4xf32>
    %68 = vector.shape_cast %67 : vector<2x1x8x8x4xf32> to vector<2x8x8x4xf32>
    %69 = arith.addf %59, %68 : vector<2x8x8x4xf32>
    %70 = vector.extract_strided_slice %17 {offsets = [5, 0], sizes = [1, 4], strides = [1, 1]} : vector<9x4xf32> to vector<1x4xf32>
    %71 = vector.extract_strided_slice %16 {offsets = [0, 2, 0, 1, 0], sizes = [2, 1, 8, 8, 4], strides = [1, 1, 1, 1, 1]} : vector<2x4x9x16x4xf32> to vector<2x1x8x8x4xf32>
    %72 = vector.shape_cast %71 : vector<2x1x8x8x4xf32> to vector<2x8x8x4xf32>
    %73 = vector.shape_cast %70 : vector<1x4xf32> to vector<1x1x1x4xf32>
    %74 = vector.broadcast %73 : vector<1x1x1x4xf32> to vector<2x8x8x4xf32>
    %75 = arith.mulf %72, %74 : vector<2x8x8x4xf32>
    %76 = arith.addf %66, %75 : vector<2x8x8x4xf32>
    %77 = vector.extract_strided_slice %0 {offsets = [0, 2, 0, 1, 0], sizes = [2, 1, 8, 8, 4], strides = [1, 1, 1, 1, 1]} : vector<2x4x9x16x4xf32> to vector<2x1x8x8x4xf32>
    %78 = vector.shape_cast %77 : vector<2x1x8x8x4xf32> to vector<2x8x8x4xf32>
    %79 = arith.addf %69, %78 : vector<2x8x8x4xf32>
    %80 = vector.extract_strided_slice %17 {offsets = [6, 0], sizes = [1, 4], strides = [1, 1]} : vector<9x4xf32> to vector<1x4xf32>
    %81 = vector.extract_strided_slice %16 {offsets = [0, 0, 1, 0, 0], sizes = [2, 1, 8, 8, 4], strides = [1, 1, 1, 1, 1]} : vector<2x4x9x16x4xf32> to vector<2x1x8x8x4xf32>
    %82 = vector.shape_cast %81 : vector<2x1x8x8x4xf32> to vector<2x8x8x4xf32>
    %83 = vector.shape_cast %80 : vector<1x4xf32> to vector<1x1x1x4xf32>
    %84 = vector.broadcast %83 : vector<1x1x1x4xf32> to vector<2x8x8x4xf32>
    %85 = arith.mulf %82, %84 : vector<2x8x8x4xf32>
    %86 = arith.addf %76, %85 : vector<2x8x8x4xf32>
    %87 = vector.extract_strided_slice %0 {offsets = [0, 0, 1, 0, 0], sizes = [2, 1, 8, 8, 4], strides = [1, 1, 1, 1, 1]} : vector<2x4x9x16x4xf32> to vector<2x1x8x8x4xf32>
    %88 = vector.shape_cast %87 : vector<2x1x8x8x4xf32> to vector<2x8x8x4xf32>
    %89 = arith.addf %79, %88 : vector<2x8x8x4xf32>
    %90 = vector.extract_strided_slice %17 {offsets = [7, 0], sizes = [1, 4], strides = [1, 1]} : vector<9x4xf32> to vector<1x4xf32>
    %91 = vector.extract_strided_slice %16 {offsets = [0, 1, 1, 0, 0], sizes = [2, 1, 8, 8, 4], strides = [1, 1, 1, 1, 1]} : vector<2x4x9x16x4xf32> to vector<2x1x8x8x4xf32>
    %92 = vector.shape_cast %91 : vector<2x1x8x8x4xf32> to vector<2x8x8x4xf32>
    %93 = vector.shape_cast %90 : vector<1x4xf32> to vector<1x1x1x4xf32>
    %94 = vector.broadcast %93 : vector<1x1x1x4xf32> to vector<2x8x8x4xf32>
    %95 = arith.mulf %92, %94 : vector<2x8x8x4xf32>
    %96 = arith.addf %86, %95 : vector<2x8x8x4xf32>
    %97 = vector.extract_strided_slice %0 {offsets = [0, 1, 1, 0, 0], sizes = [2, 1, 8, 8, 4], strides = [1, 1, 1, 1, 1]} : vector<2x4x9x16x4xf32> to vector<2x1x8x8x4xf32>
    %98 = vector.shape_cast %97 : vector<2x1x8x8x4xf32> to vector<2x8x8x4xf32>
    %99 = arith.addf %89, %98 : vector<2x8x8x4xf32>
    %100 = vector.extract_strided_slice %17 {offsets = [8, 0], sizes = [1, 4], strides = [1, 1]} : vector<9x4xf32> to vector<1x4xf32>
    %101 = vector.extract_strided_slice %16 {offsets = [0, 0, 1, 1, 0], sizes = [2, 1, 8, 8, 4], strides = [1, 1, 1, 1, 1]} : vector<2x4x9x16x4xf32> to vector<2x1x8x8x4xf32>
    %102 = vector.shape_cast %101 : vector<2x1x8x8x4xf32> to vector<2x8x8x4xf32>
    %103 = vector.shape_cast %100 : vector<1x4xf32> to vector<1x1x1x4xf32>
    %104 = vector.broadcast %103 : vector<1x1x1x4xf32> to vector<2x8x8x4xf32>
    %105 = arith.mulf %102, %104 : vector<2x8x8x4xf32>
    %106 = arith.addf %96, %105 : vector<2x8x8x4xf32>
    %107 = vector.extract_strided_slice %0 {offsets = [0, 0, 1, 1, 0], sizes = [2, 1, 8, 8, 4], strides = [1, 1, 1, 1, 1]} : vector<2x4x9x16x4xf32> to vector<2x1x8x8x4xf32>
    %108 = vector.shape_cast %107 : vector<2x1x8x8x4xf32> to vector<2x8x8x4xf32>
    %109 = arith.addf %99, %108 : vector<2x8x8x4xf32>
    %cst_19 = arith.constant 0.111111112 : f32
    %110 = vector.broadcast %cst_19 : f32 to vector<2x8x8x4xf32>
    %111 = arith.mulf %109, %110 : vector<2x8x8x4xf32>
    %c0_20 = arith.constant 0 : index
    %c0_21 = arith.constant 0 : index
    %c0_22 = arith.constant 0 : index
    %c0_23 = arith.constant 0 : index
    %112 = vector.load %arg11[%c0_20, %c0_21, %c0_22, %c0_23] : memref<2x8x8x4xf32, #tpu.memory_space<vmem>>, vector<2x8x8x4xf32>
    tpu.vector_store %arg11[%c0_20, %c0_21, %c0_22, %c0_23], %111 {strides = array<i32>} : memref<2x8x8x4xf32, #tpu.memory_space<vmem>>, vector<2x8x8x4xf32>,
    %113 = vector.shape_cast %106 : vector<2x8x8x4xf32> to vector<128x4xf32>
    %c0_24 = arith.constant 0 : index
    %c0_25 = arith.constant 0 : index
    %114 = vector.load %arg6[%c0_24, %c0_25] : memref<1x4xf32, #tpu.memory_space<vmem>>, vector<1x4xf32>
    %115 = vector.broadcast %114 : vector<1x4xf32> to vector<128x4xf32>
    %116 = arith.mulf %113, %115 : vector<128x4xf32>
    %c0_26 = arith.constant 0 : index
    %c0_27 = arith.constant 0 : index
    %117 = vector.load %arg7[%c0_26, %c0_27] : memref<1x4xf32, #tpu.memory_space<vmem>>, vector<1x4xf32>
    %118 = vector.broadcast %117 : vector<1x4xf32> to vector<128x4xf32>
    %119 = arith.addf %116, %118 : vector<128x4xf32>
    %c0_28 = arith.constant 0 : index
    %c0_29 = arith.constant 0 : index
    %120 = vector.load %arg8[%c0_28, %c0_29] : memref<4x16xf32, #tpu.memory_space<vmem>>, vector<4x16xf32>
    %cst_30 = arith.constant dense<0.000000e+00> : vector<128x16xf32>
    %121 = tpu.matmul %119, %120, %cst_30 {dimension_numbers = #tpu.dot_dimension_numbers<[1], [0], [0], [1], [0, 0, 1, 1], [], []>} : vector<128x4xf32>, vector<4x16xf32>, vector<128x16xf32> -> vector<128x16xf32>
    %c0_31 = arith.constant 0 : index
    %c0_32 = arith.constant 0 : index
    %122 = vector.load %arg9[%c0_31, %c0_32] : memref<1x16xf32, #tpu.memory_space<vmem>>, vector<1x16xf32>
    %123 = vector.broadcast %122 : vector<1x16xf32> to vector<128x16xf32>
    %124 = arith.mulf %121, %123 : vector<128x16xf32>
    %c0_33 = arith.constant 0 : index
    %c0_34 = arith.constant 0 : index
    %125 = vector.load %arg10[%c0_33, %c0_34] : memref<1x16xf32, #tpu.memory_space<vmem>>, vector<1x16xf32>
    %126 = vector.broadcast %125 : vector<1x16xf32> to vector<128x16xf32>
    %127 = arith.addf %124, %126 : vector<128x16xf32>
    %128 = vector.shape_cast %127 : vector<128x16xf32> to vector<2x8x8x16xf32>
    %c0_35 = arith.constant 0 : index
    %c0_36 = arith.constant 0 : index
    %c0_37 = arith.constant 0 : index
    %c0_38 = arith.constant 0 : index
    %129 = vector.load %arg12[%c0_35, %c0_36, %c0_37, %c0_38] : memref<2x8x8x16xf32, #tpu.memory_space<vmem>>, vector<2x8x8x16xf32>
    tpu.vector_store %arg12[%c0_35, %c0_36, %c0_37, %c0_38], %128 {strides = array<i32>} : memref<2x8x8x16xf32, #tpu.memory_space<vmem>>, vector<2x8x8x16xf32>,
    return
  }
}

</mosaic_0001>

<bundles_post_ra>
// kernel: _lambda_.1
= control target key start
LH: loop header
LB: loop body
LE: loop exit
PB: predicated region body
PF: predicated region fallthrough
CT: control target
= control target key end

     0   :  { %vm618_vm0 = vcmask 1043456   ;;  %vm185_vm1 = vcmask 31744   ;;  %v3127_v3 = vmov 0   ;;  %vm1916_vm2 = vcmask 1046528   ;;  %s6134_s2 = inlined_call_operand.vmem [shape: f32[4,4], index: 2, kind: input, shape index: {}]   ;;  %s6135_s0 = inlined_call_operand.vmem [shape: f32[2,4,9,16,4], index: 0, kind: input, shape index: {}]   ;;  %s6136_s1 = inlined_call_operand.vmem [shape: f32[4,9,16,1], index: 1, kind: input, shape index: {}]   ;;  %s6137_s3 = inlined_call_operand.vmem [shape: f32[1,4], index: 3, kind: input, shape index: {}]   ;;  %s6138_s4 = inlined_call_operand.vmem [shape: f32[1,4], index: 4, kind: input, shape index: {}]   ;;  %s6139_s5 = inlined_call_operand.vmem [shape: f32[9,4], index: 5, kind: input, shape index: {}]   ;;  %s6140_s11 = inlined_call_operand.vmem [shape: f32[2,8,8,4], index: 11, kind: output, shape index: {0}]   ;;  %s6141_s8 = inlined_call_operand.vmem [shape: f32[4,16], index: 8, kind: input, shape index: {}]   ;;  %s6142_s6 = inlined_call_operand.vmem [shape: f32[1,4], index: 6, kind: input, shape index: {}]   ;;  %s6143_s7 = inlined_call_operand.vmem [shape: f32[1,4], index: 7, kind: input, shape index: {}]   ;;  %s6144_s9 = inlined_call_operand.vmem [shape: f32[1,16], index: 9, kind: input, shape index: {}]   ;;  %s6145_s10 = inlined_call_operand.vmem [shape: f32[1,16], index: 10, kind: input, shape index: {}]   ;;  %s6146_s12 = inlined_call_operand.vmem [shape: f32[2,8,8,16], index: 12, kind: output, shape index: {1}]  }
   0x1   :  { %v184_v0 = vld [vmem:[%s6134_s2] sm:$0xf]  ;;  %3087 = vset.pattern.permute.xlu0 %v3127_v3  ;;  %3088 = vset.pattern.permute.xlu1 %v3127_v3  ;;  %v1361_v6 = vld [vmem:[%s6136_s1 + $0x90] sm:$0xff]  ;;  %v3230_v7 = vld [vmem:[%s6135_s0 + $0x8] sm:$0xff]  ;;  %vm2896_vm3 = vcmask 130048  }
   0x2   :  { %v3199_v1 = vld [vmem:[%s6135_s0] sm:$0xff]  ;;  %2921 = vmatpush.msk.msra.mxu0 %vm618_vm0, %v184_v0  ;;  %3084 = vmatpush.msk.msra.mxu2 %vm618_vm0, %v184_v0  ;;  %v105_v8 = vld [vmem:[%s6135_s0 + $0x208] sm:$0xff]  ;;  %v3263_v14 = vld [vmem:[%s6135_s0 + $0x10] sm:$0xff] }
   0x3   :  { %v3204_v2 = vld [vmem:[%s6135_s0 + $0x200] sm:$0xff]  ;;  %3085 = vmatpush.msk.msra.mxu3 %vm618_vm0, %v184_v0  ;;  %2922 = vmatmul.msk.f32.vlgmr.msra.gmra.mxu0 %vm185_vm1, %v3199_v1  ;;  %v145_v10 = vld [vmem:[%s6135_s0 + $0x348] sm:$0xff]  ;;  %v3268_v15 = vld [vmem:[%s6135_s0 + $0x210] sm:$0xff] }
   0x4   :  { %v3211_v4 = vld [vmem:[%s6135_s0 + $0x340] sm:$0xff]  ;;  %2986 = vmatmul.msk.f32.vlgmr.msra.gmra.mxu2 %vm185_vm1, %v3204_v2  ;;  %3083 = vmatpush.msk.msra.mxu1 %vm618_vm0, %v184_v0  ;;  %v1344_v11 = vld [vmem:[%s6136_s1 + $0x8] sm:$0xff]  ;;  %v146_v16 = vld [vmem:[%s6135_s0 + $0x350] sm:$0xff] }
   0x5   :  { %3026 = vmatmul.msk.f32.vlgmr.msra.gmra.mxu3 %vm185_vm1, %v3211_v4  ;;  %v1343_v5 = vld [vmem:[%s6136_s1] sm:$0xff]  ;;  %1486 = vperm.xlu1 %3088, %v1361_v6   ;;  %v3258_v13 = vld [vmem:[%s6135_s0 + $0x148] sm:$0xff]  ;;  %v1345_v17 = vld [vmem:[%s6136_s1 + $0x10] sm:$0xff] }
   0x6   :  { %1396 = vperm.xlu0 %3087, %v1343_v5   ;;  %3089 = vset.pattern.permute.xlu2 %v3127_v3  ;;  %v3238_v9 = vld [vmem:[%s6135_s0 + $0x140] sm:$0xff]  ;;  %v1346_v18 = vld [vmem:[%s6136_s1 + $0x18] sm:$0xff]  ;;  %v3289_v19 = vld [vmem:[%s6135_s0 + $0x150] sm:$0xff] }
   0x7   :  { %2962 = vmatmul.msk.f32.vlgmr.msra.gmra.mxu1 %vm185_vm1, %v3238_v9  ;;  %v1370_v12 = vld [vmem:[%s6136_s1 + $0x120] sm:$0xff]  ;;  %v3294_v20 = vld [vmem:[%s6135_s0 + $0x18] sm:$0xff]  ;;  %v1372_v23 = vld [vmem:[%s6136_s1 + $0x130] sm:$0xff] }
   0x8   :  { %v107_v21 = vld [vmem:[%s6135_s0 + $0x218] sm:$0xff]  ;;  %v1371_v25 = vld [vmem:[%s6136_s1 + $0x128] sm:$0xff]  ;;  %v3325_v27 = vld [vmem:[%s6135_s0 + $0x20] sm:$0xff] }
   0x9   :  { %v147_v22 = vld [vmem:[%s6135_s0 + $0x358] sm:$0xff]  ;;  %1536 = vperm.xlu2 %3089, %v1371_v25   ;;  %v3330_v28 = vld [vmem:[%s6135_s0 + $0x220] sm:$0xff]  ;;  %v1348_v31 = vld [vmem:[%s6136_s1 + $0x28] sm:$0xff] }
   0xa   :  { %v1373_v24 = vld [vmem:[%s6136_s1 + $0x138] sm:$0xff]  ;;  %v3335_v29 = vld [vmem:[%s6135_s0 + $0x360] sm:$0xff]  ;;  %v1386_v32 = vld [vmem:[%s6136_s1 + $0x1b0] sm:$0xff] }
   0xb   :  { %2923 = vmatmul.msk.f32.gmra.mxu0 %vm185_vm1, %v3230_v7  ;;  %v3320_v26 = vld [vmem:[%s6135_s0 + $0x158] sm:$0xff]  ;;  %v1347_v30 = vld [vmem:[%s6136_s1 + $0x20] sm:$0xff]  ;;  %v3362_v34 = vld [vmem:[%s6135_s0 + $0x28] sm:$0xff] }
   0xc   :  { %2987 = vmatmul.msk.f32.gmra.mxu2 %vm185_vm1, %v105_v8  ;;  %v3357_v33 = vld [vmem:[%s6135_s0 + $0x160] sm:$0xff]  ;;  %v109_v35 = vld [vmem:[%s6135_s0 + $0x228] sm:$0xff]  ;;  %v3396_v41 = vld [vmem:[%s6135_s0 + $0x30] sm:$0xff] }
   0xd   :  { %3027 = vmatmul.msk.f32.gmra.mxu3 %vm185_vm1, %v145_v10  ;;  %1531 = vperm.xlu1 %3088, %v1370_v12   ;;  %v3370_v36 = vld [vmem:[%s6135_s0 + $0x368] sm:$0xff]  ;;  %v1374_v37 = vld [vmem:[%s6136_s1 + $0x140] sm:$0xff]  ;;  %v110_v42 = vld [vmem:[%s6135_s0 + $0x230] sm:$0xff] }
   0xe   :  { %1401 = vperm.xlu0 %3087, %v1344_v11   ;;  %v1375_v38 = vld [vmem:[%s6136_s1 + $0x148] sm:$0xff]  ;;  %v1362_v39 = vld [vmem:[%s6136_s1 + $0xa0] sm:$0xff]  ;;  %v3404_v43 = vld [vmem:[%s6135_s0 + $0x370] sm:$0xff] }
   0xf   :  { %2963 = vmatmul.msk.f32.gmra.mxu1 %vm185_vm1, %v3258_v13  ;;  %v3391_v40 = vld [vmem:[%s6135_s0 + $0x168] sm:$0xff]  ;;  %v1349_v44 = vld [vmem:[%s6136_s1 + $0x30] sm:$0xff]  ;;  %v1350_v45 = vld [vmem:[%s6136_s1 + $0x38] sm:$0xff] }
  0x10   :  { %v1387_v46 = vld [vmem:[%s6136_s1 + $0x1c0] sm:$0xff]  ;;  %v86_v47 = vld [vmem:[%s6135_s0 + $0x170] sm:$0xff]  ;;  %v3428_v48 = vld [vmem:[%s6135_s0 + $0x38] sm:$0xff] }
  0x11   :  { %1611 = vperm.xlu2 %3089, %v1386_v32   ;;  %v3433_v49 = vld [vmem:[%s6135_s0 + $0x50] sm:$0xff]  ;;  %v111_v50 = vld [vmem:[%s6135_s0 + $0x238] sm:$0xff]  ;;  %v3456_v55 = vld [vmem:[%s6135_s0 + $0xe0] sm:$0xff]  ;;  %v2335_v60 = vrot.slane %v86_v47, 1 }
  0x12   :  { %v3441_v51 = vld [vmem:[%s6135_s0 + $0x378] sm:$0xff]  ;;  %v2012_v52 = vrot.slane %v3433_v49, 1  ;;  %v1376_v53 = vld [vmem:[%s6136_s1 + $0x150] sm:$0xff]  ;;  %v1840_v57 = vadd.f32 %v3456_v55, %v3433_v49  ;;  %v3482_v3 = vld [vmem:[%s6135_s0 + $0x40] sm:$0xff] }
  0x13   :  { %2924 = vmatmul.msk.f32.gmra.mxu0 %vm185_vm1, %v3263_v14  ;;  %v3451_v54 = vld [vmem:[%s6135_s0 + $0x58] sm:$0xff]  ;;  %v1363_v59 = vld [vmem:[%s6136_s1 + $0xb0] sm:$0xff]  ;;  %v3487_v6 = vld [vmem:[%s6135_s0 + $0x240] sm:$0xff] }
  0x14   :  { %2988 = vmatmul.msk.f32.gmra.mxu2 %vm185_vm1, %v3268_v15  ;;  %v1377_v56 = vld [vmem:[%s6136_s1 + $0x158] sm:$0xff]  ;;  %v2013_v58 = vrot.slane %v3451_v54, 1  ;;  %v3492_v8 = vld [vmem:[%s6135_s0 + $0x380] sm:$0xff]  ;;  %v3534_v25 = vld [vmem:[%s6135_s0 + $0x388] sm:$0xff] }
  0x15   :  { %3028 = vmatmul.msk.f32.gmra.mxu3 %vm185_vm1, %v146_v16  ;;  %1411 = vperm.xlu1 %3088, %v1346_v18   ;;  %v87_v62 = vld [vmem:[%s6135_s0 + $0x178] sm:$0xff]  ;;  %v1351_v11 = vld [vmem:[%s6136_s1 + $0x40] sm:$0xff]  ;;  %v1352_v16 = vld [vmem:[%s6136_s1 + $0x48] sm:$0xff] }
  0x16   :  { %1406 = vperm.xlu0 %3087, %v1345_v17   ;;  %v3473_v61 = vsel %vm1916_vm2, %v2012_v52, %v2013_v58  ;;  %v2336_v0 = vrot.slane %v87_v62, 1  ;;  %v1388_v18 = vld [vmem:[%s6136_s1 + $0x1d0] sm:$0xff]  ;;  %v3544_v32 = vld [vmem:[%s6135_s0 + $0x68] sm:$0xff] }
  0x17   :  { %2964 = vmatmul.msk.f32.gmra.mxu1 %vm185_vm1, %v3289_v19  ;;  %v2066_v63 = vadd.f32 %v3473_v61, %v1840_v57  ;;  %v89_v52 = vld [vmem:[%s6135_s0 + $0x188] sm:$0xff]  ;;  %v3570_v58 = vld [vmem:[%s6135_s0 + $0x250] sm:$0xff] }
  0x18   :  { %v2337_v10 = vsel %vm1916_vm2, %v2335_v60, %v2336_v0  ;;  %v1354_v0 = vld [vmem:[%s6136_s1 + $0x58] sm:$0xff] }
  0x19   :  { %1491 = vperm.xlu2 %3089, %v1362_v39   ;;  %v2115_v5 = vadd.f32 %v2066_v63, %v86_v47  ;;  %v2016_v39 = vrot.slane %v3544_v32, 1 }
  0x1b   :  { %2925 = vmatmul.msk.f32.gmra.mxu0 %vm185_vm1, %v3294_v20  ;;  %v2164_v12 = vadd.f32 %v2115_v5, %v3204_v2  ;;  %v3515_v2 = vld [vmem:[%s6135_s0 + $0x60] sm:$0xff] }
  0x1c   :  { %2989 = vmatmul.msk.f32.gmra.mxu2 %vm185_vm1, %v107_v21  ;;  %v88_v21 = vld [vmem:[%s6135_s0 + $0x180] sm:$0xff] }
  0x1d   :  { %3029 = vmatmul.msk.f32.gmra.mxu3 %vm185_vm1, %v147_v22  ;;  %1546 = vperm.xlu1 %3088, %v1373_v24   ;;  %v2389_v17 = vadd.f32 %v2337_v10, %v2164_v12  ;;  %v3529_v24 = vld [vmem:[%s6135_s0 + $0x248] sm:$0xff]  ;;  %v3602_v10 = vld [vmem:[%s6135_s0 + $0x70] sm:$0xff] }
  0x1e   :  { %1541 = vperm.xlu0 %3087, %v1372_v23   ;;  %v3524_v23 = vld [vmem:[%s6135_s0 + $0x48] sm:$0xff] }
  0x1f   :  { %2965 = vmatmul.msk.f32.gmra.mxu1 %vm185_vm1, %v3320_v26  ;;  %v2438_v22 = vadd.f32 %v2389_v17, %v3515_v2  ;;  %v3616_v17 = vld [vmem:[%s6135_s0 + $0x398] sm:$0xff] }
  0x21   :  { %1616 = vperm.xlu2 %3089, %v1387_v46  }
  0x23   :  { %2926 = vmatmul.msk.f32.gmra.mxu0 %vm185_vm1, %v3325_v27 }
  0x24   :  { %2990 = vmatmul.msk.f32.gmra.mxu2 %vm185_vm1, %v3330_v28 }
  0x25   :  { %3030 = vmatmul.msk.f32.gmra.mxu3 %vm185_vm1, %v3335_v29  ;;  %1421 = vperm.xlu1 %3088, %v1348_v31   ;;  %v1378_v31 = vld [vmem:[%s6136_s1 + $0x160] sm:$0xff] }
  0x26   :  { %1416 = vperm.xlu0 %3087, %v1347_v30   ;;  %v2015_v30 = vrot.slane %v3515_v2, 1 }
  0x27   :  { %2966 = vmatmul.msk.f32.gmra.mxu1 %vm185_vm1, %v3357_v33 }
  0x28   :  { %v2017_v46 = vsel %vm1916_vm2, %v2015_v30, %v2016_v39  ;;  %v72_v30 = vld [vmem:[%s6135_s0 + $0x100] sm:$0xff]  ;;  %v1365_v39 = vld [vmem:[%s6136_s1 + $0xd0] sm:$0xff] }
  0x29   :  { %1496 = vperm.xlu2 %3089, %v1363_v59   ;;  %v3575_v59 = vld [vmem:[%s6135_s0 + $0x390] sm:$0xff] }
  0x2b   :  { %2927 = vmatmul.msk.f32.gmra.mxu0 %vm185_vm1, %v3362_v34 }
  0x2c   :  { %2991 = vmatmul.msk.f32.gmra.mxu2 %vm185_vm1, %v109_v35  ;;  %v70_v35 = vld [vmem:[%s6135_s0 + $0xf0] sm:$0xff] }
  0x2d   :  { %3031 = vmatmul.msk.f32.gmra.mxu3 %vm185_vm1, %v3370_v36  ;;  %1556 = vperm.xlu1 %3088, %v1375_v38   ;;  %v1841_v38 = vadd.f32 %v70_v35, %v3515_v2 }
  0x2e   :  { %1551 = vperm.xlu0 %3087, %v1374_v37   ;;  %v1379_v37 = vld [vmem:[%s6136_s1 + $0x168] sm:$0xff] }
  0x2f   :  { %2967 = vmatmul.msk.f32.gmra.mxu1 %vm185_vm1, %v3391_v40 }
  0x31   :  { %1621 = vperm.xlu2 %3089, %v1388_v18   ;;  %v2018_v18 = vrot.slane %v3602_v10, 1 }
  0x33   :  { %2928 = vmatmul.msk.f32.gmra.mxu0 %vm185_vm1, %v3396_v41 }
  0x34   :  { %2992 = vmatmul.msk.f32.gmra.mxu2 %vm185_vm1, %v110_v42  ;;  %v2487_v42 = vadd.f32 %v2438_v22, %v70_v35  ;;  %v3626_v22 = vld [vmem:[%s6135_s0 + $0x78] sm:$0xff]  ;;  %v1842_v35 = vadd.f32 %v72_v30, %v3602_v10 }
  0x35   :  { %3032 = vmatmul.msk.f32.gmra.mxu3 %vm185_vm1, %v3404_v43  ;;  %1431 = vperm.xlu1 %3088, %v1350_v45   ;;  %v2338_v45 = vrot.slane %v88_v21, 1 }
  0x36   :  { %1426 = vperm.xlu0 %3087, %v1349_v44   ;;  %v1364_v44 = vld [vmem:[%s6136_s1 + $0xc0] sm:$0xff] }
  0x37   :  { %2968 = vmatmul.msk.f32.gmra.mxu1 %vm185_vm1, %v86_v47  ;;  %v2067_v47 = vadd.f32 %v2017_v46, %v1841_v38 }
  0x39   :  { %1501 = vperm.xlu2 %3089, %v1364_v44  }
  0x3b   :  { %2929 = vmatmul.msk.f32.gmra.mxu0 %vm185_vm1, %v3428_v48 }
  0x3c   :  { %2993 = vmatmul.msk.f32.gmra.mxu2 %vm185_vm1, %v111_v50  ;;  %v2656_v50 = vadd.f32 %v2487_v42, %v2017_v46 }
  0x3d   :  { %3033 = vmatmul.msk.f32.gmra.mxu3 %vm185_vm1, %v3441_v51  ;;  %1566 = vperm.xlu1 %3088, %v1377_v56   ;;  %v2116_v56 = vadd.f32 %v2067_v47, %v88_v21  ;;  %v3649_v47 = vld [vmem:[%s6135_s0 + $0x260] sm:$0xff] }
  0x3e   :  { %1561 = vperm.xlu0 %3087, %v1376_v53   ;;  %v2339_v53 = vrot.slane %v89_v52, 1  ;;  %v2672_v57 = vmul.f32 0.11111111, %v2656_v50  ;;  %v3654_v50 = vld [vmem:[%s6135_s0 + $0x3a0] sm:$0xff] }
  0x3f   :  { %2969 = vmatmul.msk.f32.gmra.mxu1 %vm185_vm1, %v87_v62  ;;  %v1353_v62 = vld [vmem:[%s6136_s1 + $0x50] sm:$0xff]  ;;  %v2165_v63 = vadd.f32 %v2116_v56, %v3268_v15  ;;  %v1389_v15 = vld [vmem:[%s6136_s1 + $0x1e0] sm:$0xff] }
  0x40   :  { %v2340_v60 = vsel %vm1916_vm2, %v2338_v45, %v2339_v53  ;;  %2688 = vst.msk [vmem:[%s6140_s11 + $0x28] sm:$0xff] %vm185_vm1, %v2672_v57  ;;  %v91_v53 = vld [vmem:[%s6135_s0 + $0x198] sm:$0xff]  ;;  %v1355_v56 = vld [vmem:[%s6136_s1 + $0x60] sm:$0xff] }
  0x41   :  { %v2390_v5 = vadd.f32 %v2340_v60, %v2165_v63  ;;  %1626 = vperm.xlu2 %3089, %v1389_v15   ;;  %v1356_v60 = vld [vmem:[%s6136_s1 + $0x68] sm:$0xff] }
  0x42   :  { %v3692_v15 = vld [vmem:[%s6135_s0 + $0x268] sm:$0xff] }
  0x43   :  { %2930 = vmatmul.msk.f32.gmra.mxu0 %vm185_vm1, %v3482_v3  ;;  %v2439_v12 = vadd.f32 %v2390_v5, %v3602_v10 }
  0x44   :  { %2994 = vmatmul.msk.f32.gmra.mxu2 %vm185_vm1, %v3487_v6 }
  0x45   :  { %3034 = vmatmul.msk.f32.gmra.mxu3 %vm185_vm1, %v3492_v8  ;;  %1441 = vperm.xlu1 %3088, %v1352_v16   ;;  %v3611_v16 = vld [vmem:[%s6135_s0 + $0x258] sm:$0xff]  ;;  %v2488_v38 = vadd.f32 %v2439_v12, %v72_v30  ;;  %v92_v12 = vld [vmem:[%s6135_s0 + $0x1a0] sm:$0xff]  ;;  %v1383_v30 = vld [vmem:[%s6136_s1 + $0x188] sm:$0xff] }
  0x46   :  { %1436 = vperm.xlu0 %3087, %v1351_v11   ;;  %v90_v11 = vld [vmem:[%s6135_s0 + $0x190] sm:$0xff] }
  0x47   :  { %2970 = vmatmul.msk.f32.gmra.mxu1 %vm185_vm1, %v88_v21  ;;  %v1380_v21 = vld [vmem:[%s6136_s1 + $0x170] sm:$0xff] }
  0x49   :  { %1506 = vperm.xlu2 %3089, %v1365_v39   ;;  %v1998_v39 = vrot.slane %v3230_v7, 1  ;;  %v1358_v7 = vld [vmem:[%s6136_s1 + $0x78] sm:$0xff] }
  0x4b   :  { %2931 = vmatmul.msk.f32.gmra.mxu0 %vm185_vm1, %v3524_v23 }
  0x4c   :  { %2995 = vmatmul.msk.f32.gmra.mxu2 %vm185_vm1, %v3529_v24 }
  0x4d   :  { %3035 = vmatmul.msk.f32.gmra.mxu3 %vm185_vm1, %v3534_v25  ;;  %1576 = vperm.xlu1 %3088, %v1379_v37   ;;  %v2019_v37 = vrot.slane %v3626_v22, 1 }
  0x4e   :  { %1571 = vperm.xlu0 %3087, %v1378_v31   ;;  %v1381_v31 = vld [vmem:[%s6136_s1 + $0x178] sm:$0xff] }
  0x4f   :  { %2971 = vmatmul.msk.f32.gmra.mxu1 %vm185_vm1, %v89_v52  ;;  %v2341_v52 = vrot.slane %v90_v11, 1 }
  0x53   :  { %2932 = vmatmul.msk.f32.gmra.mxu0 %vm185_vm1, %v3433_v49 }
  0x54   :  { %2996 = vmatmul.msk.f32.gmra.mxu2 %vm185_vm1, %v3570_v58 }
  0x55   :  { %3036 = vmatmul.msk.f32.gmra.mxu3 %vm185_vm1, %v3575_v59  ;;  %1451 = vperm.xlu1 %3088, %v1354_v0   ;;  %v1390_v0 = vld [vmem:[%s6136_s1 + $0x1f0] sm:$0xff] }
  0x56   :  { %1446 = vperm.xlu0 %3087, %v1353_v62   ;;  %v2342_v62 = vrot.slane %v91_v53, 1  ;;  %1631 = vperm.xlu2 %3089, %v1390_v0   ;;  %v1384_v0 = vld [vmem:[%s6136_s1 + $0x190] sm:$0xff] }
  0x57   :  { %2972 = vmatmul.msk.f32.gmra.mxu1 %vm185_vm1, %v90_v11 }
  0x5b   :  { %2933 = vmatmul.msk.f32.gmra.mxu0 %vm185_vm1, %v3451_v54  ;;  %v2020_v54 = vsel %vm1916_vm2, %v2018_v18, %v2019_v37  ;;  %v1382_v18 = vld [vmem:[%s6136_s1 + $0x180] sm:$0xff] }
  0x5c   :  { %2997 = vmatmul.msk.f32.gmra.mxu2 %vm185_vm1, %v3611_v16  ;;  %v2068_v42 = vadd.f32 %v2020_v54, %v1842_v35  ;;  %v2657_v44 = vadd.f32 %v2488_v38, %v2020_v54  ;;  %v1366_v37 = vld [vmem:[%s6136_s1 + $0xe0] sm:$0xff]  ;;  %v1997_v38 = vrot.slane %v3199_v1, 1  ;;  %v3733_v54 = vld [vmem:[%s6135_s0 + $0x270] sm:$0xff] }
  0x5d   :  { %3037 = vmatmul.msk.f32.gmra.mxu3 %vm185_vm1, %v3616_v17  ;;  %1586 = vperm.xlu1 %3088, %v1381_v31   ;;  %v3715_v31 = vld [vmem:[%s6135_s0 + $0x88] sm:$0xff] }
  0x5e   :  { %1581 = vperm.xlu0 %3087, %v1380_v21   ;;  %v2117_v45 = vadd.f32 %v2068_v42, %v90_v11  ;;  %v2673_v46 = vmul.f32 0.11111111, %v2657_v44  ;;  %v3697_v11 = vld [vmem:[%s6135_s0 + $0x3a8] sm:$0xff]  ;;  %v2644_v35 = vrot.slane %v3715_v31, 1  ;;  %1511 = vperm.xlu2 %3089, %v1366_v37   ;;  %v3738_v42 = vld [vmem:[%s6135_s0 + $0x3b0] sm:$0xff] }
  0x5f   :  { %2973 = vmatmul.msk.f32.gmra.mxu1 %vm185_vm1, %v91_v53  ;;  %v93_v44 = vld [vmem:[%s6135_s0 + $0x1a8] sm:$0xff] }
  0x60   :  { %v2166_v57 = vadd.f32 %v2117_v45, %v3330_v28  ;;  %2689 = vst.msk [vmem:[%s6140_s11 + $0x30] sm:$0xff] %vm185_vm1, %v2673_v46  ;;  %v2343_v28 = vsel %vm1916_vm2, %v2341_v52, %v2342_v62  ;;  %v1357_v45 = vld [vmem:[%s6136_s1 + $0x70] sm:$0xff] }
  0x61   :  { %v3759_v46 = vld [vmem:[%s6135_s0 + $0x90] sm:$0xff] }
  0x62   :  { %v2391_v63 = vadd.f32 %v2343_v28, %v2166_v57  ;;  %v1835_v52 = vadd.f32 %v3759_v46, %v3199_v1  ;;  %v1391_v57 = vld [vmem:[%s6136_s1 + $0x200] sm:$0xff]  ;;  %v3779_v1 = vld [vmem:[%s6135_s0 + $0x3b8] sm:$0xff]  ;;  %v3784_v28 = vld [vmem:[%s6135_s0 + $0x3d0] sm:$0xff] }
  0x63   :  { %2934 = vmatmul.msk.f32.gmra.mxu0 %vm185_vm1, %v3515_v2  ;;  %v3681_v2 = vld [vmem:[%s6135_s0 + $0x80] sm:$0xff] }
  0x64   :  { %2998 = vmatmul.msk.f32.gmra.mxu2 %vm185_vm1, %v3649_v47  ;;  %v3687_v5 = vadd.f32 %v2391_v63, %v3681_v2  ;;  %v2643_v21 = vrot.slane %v3681_v2, 1  ;;  %v94_v63 = vld [vmem:[%s6135_s0 + $0x1b0] sm:$0xff] }
  0x65   :  { %3038 = vmatmul.msk.f32.gmra.mxu3 %vm185_vm1, %v3654_v50  ;;  %1461 = vperm.xlu1 %3088, %v1356_v60   ;;  %v3772_v60 = vld [vmem:[%s6135_s0 + $0x278] sm:$0xff] }
  0x66   :  { %1456 = vperm.xlu0 %3087, %v1355_v56   ;;  %6228 = vst [vmem:[#allocation2_spill] sm:$0xff] %v3687_v5  ;;  %1636 = vperm.xlu2 %3089, %v1391_v57   ;;  %v95_v57 = vld [vmem:[%s6135_s0 + $0x1b8] sm:$0xff] }
  0x67   :  { %2974 = vmatmul.msk.f32.gmra.mxu1 %vm185_vm1, %v92_v12  ;;  %v2365_v12 = vrot.slane %v3784_v28, 1 }
  0x6b   :  { %2935 = vmatmul.msk.f32.gmra.mxu0 %vm185_vm1, %v3544_v32  ;;  %v3723_v32 = vsel %vm1916_vm2, %v2643_v21, %v2644_v35  ;;  %v3802_v21 = vld [vmem:[%s6135_s0 + $0x3d8] sm:$0xff] }
  0x6c   :  { %2999 = vmatmul.msk.f32.gmra.mxu2 %vm185_vm1, %v3692_v15  ;;  %6229 = vst [vmem:[#allocation3_spill] sm:$0xff] %v3723_v32  ;;  %v2366_v35 = vrot.slane %v3802_v21, 1 }
  0x6d   :  { %3039 = vmatmul.msk.f32.gmra.mxu3 %vm185_vm1, %v3697_v11  ;;  %1596 = vperm.xlu1 %3088, %v1383_v30   ;;  %v3808_v30 = vpop.permute.xlu2 %1536 }
  0x6e   :  { %1591 = vperm.xlu0 %3087, %v1382_v18   ;;  %v1385_v18 = vld [vmem:[%s6136_s1 + $0x198] sm:$0xff]  ;;  %6232 = vst [vmem:[#allocation6_spill] sm:$0xff] %v3808_v30 }
  0x6f   :  { %2975 = vmatmul.msk.f32.gmra.mxu1 %vm185_vm1, %v93_v44 }
  0x73   :  { %2936 = vmatmul.msk.f32.gmra.mxu0 %vm185_vm1, %v3602_v10  ;;  %v1999_v10 = vsel %vm1916_vm2, %v1997_v38, %v1998_v39  ;;  %v3818_v38 = vsel %vm1916_vm2, %v2365_v12, %v2366_v35 }
  0x74   :  { %3000 = vmatmul.msk.f32.gmra.mxu2 %vm185_vm1, %v3733_v54  ;;  %v2061_v56 = vadd.f32 %v1999_v10, %v1835_v52  ;;  %6234 = vst [vmem:[#allocation8_spill] sm:$0xff] %v3818_v38  ;;  %v3834_v10 = vld [vmem:[%s6135_s0 + $0x280] sm:$0xff] }
  0x75   :  { %3040 = vmatmul.msk.f32.gmra.mxu3 %vm185_vm1, %v3738_v42  ;;  %1471 = vperm.xlu1 %3088, %v1358_v7   ;;  %v3857_v12 = vpop.permute.xlu2 %1611 }
  0x76   :  { %1466 = vperm.xlu0 %3087, %v1357_v45   ;;  %v1367_v45 = vld [vmem:[%s6136_s1 + $0xf0] sm:$0xff]  ;;  %6239 = vst [vmem:[#allocation13_spill] sm:$0xff] %v3857_v12 }
  0x77   :  { %v3774_v62 = vpop.permute.xlu1 %1486  ;;  %2976 = vmatmul.msk.f32.gmra.mxu1 %vm185_vm1, %v94_v63  ;;  %1516 = vperm.xlu2 %3089, %v1367_v45   ;;  %v2001_v45 = vrot.slane %v3294_v20, 1  ;;  %v96_v20 = vld [vmem:[%s6135_s0 + $0x1c0] sm:$0xff] }
  0x78   :  { %v3764_v53 = vpop.permute.xlu0 %1396  ;;  %6231 = vst [vmem:[#allocation5_spill] sm:$0xff] %v3774_v62 }
  0x79   :  { %6230 = vst [vmem:[#allocation4_spill] sm:$0xff] %v3764_v53  ;;  %v3917_v53 = vld [vmem:[%s6135_s0 + $0x290] sm:$0xff] }
  0x7a   :  { %6249 = vst [vmem:[#allocation23_spill] sm:$0xff] %v3917_v53 }
  0x7b   :  { %2937 = vmatmul.msk.f32.gmra.mxu0 %vm185_vm1, %v3626_v22  ;;  %v3813_v22 = vld [vmem:[%s6135_s0 + $0x120] sm:$0xff] }
  0x7c   :  { %3001 = vmatmul.msk.f32.gmra.mxu2 %vm185_vm1, %v3772_v60  ;;  %6233 = vst [vmem:[#allocation7_spill] sm:$0xff] %v3813_v22  ;;  %v2110_v37 = vadd.f32 %v2061_v56, %v3813_v22  ;;  %v3839_v56 = vld [vmem:[%s6135_s0 + $0x3c0] sm:$0xff] }
  0x7d   :  { %3041 = vmatmul.msk.f32.gmra.mxu3 %vm185_vm1, %v3779_v1  ;;  %1606 = vperm.xlu1 %3088, %v1385_v18   ;;  %6238 = vst [vmem:[#allocation12_spill] sm:$0xff] %v3839_v56 }
  0x7e   :  { %1601 = vperm.xlu0 %3087, %v1384_v0   ;;  %v3822_v44 = vadd.f32 %v2110_v37, %v94_v63  ;;  %v1359_v63 = vld [vmem:[%s6136_s1 + $0x80] sm:$0xff]  ;;  %v1360_v0 = vld [vmem:[%s6136_s1 + $0x88] sm:$0xff]  ;;  %v2000_v37 = vrot.slane %v3263_v14, 1 }
  0x7f   :  { %v3829_v52 = vpop.permute.xlu1 %1531  ;;  %2977 = vmatmul.msk.f32.gmra.mxu1 %vm185_vm1, %v95_v57 }
  0x80   :  { %v3820_v39 = vpop.permute.xlu0 %1401  ;;  %6236 = vst [vmem:[#allocation10_spill] sm:$0xff] %v3822_v44  ;;  %v3827_v7 = vpop.f32.mrf.mxu0 }
  0x81   :  { %6235 = vst [vmem:[#allocation9_spill] sm:$0xff] %v3820_v39 }
  0x82   :  { %6237 = vst [vmem:[#allocation11_spill] sm:$0xff] %v3829_v52 }
  0x83   :  { %2938 = vmatmul.msk.f32.gmra.mxu0 %vm185_vm1, %v3681_v2  ;;  %v1392_v2 = vld [vmem:[%s6136_s1 + $0x210] sm:$0xff] }
  0x84   :  { %3002 = vmatmul.msk.f32.gmra.mxu2 %vm185_vm1, %v3834_v10  ;;  %1641 = vperm.xlu2 %3089, %v1392_v2   ;;  %v3884_v44 = vpop.f32.mrf.mxu1  ;;  %v3892_v2 = vld [vmem:[%s6135_s0 + $0xa0] sm:$0xff] }
  0x85   :  { %3042 = vmatmul.msk.f32.gmra.mxu3 %vm185_vm1, %v3839_v56  ;;  %1481 = vperm.xlu1 %3088, %v1360_v0   ;;  %v3880_v0 = vld [vmem:[%s6135_s0 + $0x3c8] sm:$0xff]  ;;  %v1836_v38 = vadd.f32 %v3892_v2, %v3263_v14 }
  0x86   :  { %1476 = vperm.xlu0 %3087, %v1359_v63   ;;  %v3875_v63 = vld [vmem:[%s6135_s0 + $0x288] sm:$0xff]  ;;  %6244 = vst [vmem:[#allocation18_spill] sm:$0xff] %v3880_v0 }
  0x87   :  { %v3859_v18 = vpop.f32.mrf.mxu2  ;;  %v3882_v12 = vpop.permute.xlu1 %1411  ;;  %2978 = vmatmul.msk.f32.gmra.mxu1 %vm185_vm1, %v96_v20 }
  0x88   :  { %6240 = vst [vmem:[#allocation14_spill] sm:$0xff] %v3859_v18  ;;  %v3861_v35 = vpop.f32.mrf.mxu3  ;;  %v3868_v57 = vpop.f32.mrf.mxu0 }
  0x89   :  { %6241 = vst [vmem:[#allocation15_spill] sm:$0xff] %v3861_v35  ;;  %v3870_v62 = vpop.permute.xlu0 %1406 }
  0x8a   :  { %6242 = vst [vmem:[#allocation16_spill] sm:$0xff] %v3868_v57  ;;  %v2022_v57 = vrot.slane %v3529_v24, 1  ;;  %v98_v24 = vld [vmem:[%s6135_s0 + $0x1d0] sm:$0xff] }
  0x8b   :  { %6243 = vst [vmem:[#allocation17_spill] sm:$0xff] %v3870_v62  ;;  %2939 = vmatmul.msk.f32.gmra.mxu0 %vm185_vm1, %v3715_v31  ;;  %v1368_v31 = vld [vmem:[%s6136_s1 + $0x100] sm:$0xff] }
  0x8c   :  { %6245 = vst [vmem:[#allocation19_spill] sm:$0xff] %v3882_v12  ;;  %3003 = vmatmul.msk.f32.gmra.mxu2 %vm185_vm1, %v3875_v63  ;;  %v3904_v12 = vsel %vm1916_vm2, %v2000_v37, %v2001_v45  ;;  %1521 = vperm.xlu2 %3089, %v1368_v31   ;;  %v3931_v45 = vld [vmem:[%s6135_s0 + $0x130] sm:$0xff] }
  0x8d   :  { %3043 = vmatmul.msk.f32.gmra.mxu3 %vm185_vm1, %v3880_v0  ;;  %6246 = vst [vmem:[#allocation20_spill] sm:$0xff] %v3904_v12  ;;  %v2062_v32 = vadd.f32 %v3904_v12, %v1836_v38  ;;  %v97_v38 = vld [vmem:[%s6135_s0 + $0x1c8] sm:$0xff] }
  0x8e   :  { %6252 = vst [vmem:[#allocation26_spill] sm:$0xff] %v3931_v45 }
  0x8f   :  { %v818_v62 = vpop.f32.mrf.mxu2  ;;  %v3919_v37 = vpop.permute.xlu1 %1546  ;;  %2979 = vmatmul.msk.f32.gmra.mxu1 %vm185_vm1, %v97_v38  ;;  %v2111_v31 = vadd.f32 %v2062_v32, %v3931_v45  ;;  %v1393_v38 = vld [vmem:[%s6136_s1 + $0x220] sm:$0xff]  ;;  %v2004_v32 = vrot.slane %v3362_v34, 1  ;;  %v2021_v45 = vrot.slane %v3487_v6, 1 }
  0x90   :  { %v926_v39 = vpop.f32.mrf.mxu3  ;;  %v3910_v5 = vpop.f32.mrf.mxu0  ;;  %6250 = vst [vmem:[#allocation24_spill] sm:$0xff] %v3919_v37 }
  0x91   :  { %6247 = vst [vmem:[#allocation21_spill] sm:$0xff] %v3910_v5  ;;  %v3912_v14 = vpop.permute.xlu0 %1541  ;;  %v3921_v62 = vpop.f32.mrf.mxu1  ;;  %v3941_v5 = vadd.f32 %v2111_v31, %v96_v20  ;;  %v59_v20 = vld [vmem:[%s6135_s0 + $0x98] sm:$0xff] }
  0x92   :  { %6248 = vst [vmem:[#allocation22_spill] sm:$0xff] %v3912_v14  ;;  %v3926_v39 = vpop.permute.xlu2 %1491 }
  0x93   :  { %6251 = vst [vmem:[#allocation25_spill] sm:$0xff] %v3926_v39  ;;  %2940 = vmatmul.msk.f32.gmra.mxu0 %vm185_vm1, %v3759_v46  ;;  %v2003_v46 = vrot.slane %v3325_v27, 1 }
  0x94   :  { %3004 = vmatmul.msk.f32.gmra.mxu2 %vm185_vm1, %v3917_v53  ;;  %6253 = vst [vmem:[#allocation27_spill] sm:$0xff] %v3941_v5  ;;  %1646 = vperm.xlu2 %3089, %v1393_v38   ;;  %v3964_v5 = vld [vmem:[%s6135_s0 + $0x298] sm:$0xff]  ;;  %v3978_v38 = vld [vmem:[%s6135_s0 + $0xb0] sm:$0xff] }
  0x95   :  { %3044 = vmatmul.msk.f32.gmra.mxu3 %vm185_vm1, %v3784_v28  ;;  %6258 = vst [vmem:[#allocation32_spill] sm:$0xff] %v3964_v5 }
  0x97   :  { %v3943_v39 = vpop.f32.mrf.mxu2  ;;  %2980 = vmatmul.msk.f32.gmra.mxu1 %vm185_vm1, %v98_v24 }
  0x98   :  { %6254 = vst [vmem:[#allocation28_spill] sm:$0xff] %v3943_v39  ;;  %v3945_v12 = vpop.f32.mrf.mxu3  ;;  %v3954_v35 = vpop.f32.mrf.mxu0  ;;  %v3995_v39 = vld [vmem:[%s6135_s0 + $0x2d0] sm:$0xff] }
  0x99   :  { %6255 = vst [vmem:[#allocation29_spill] sm:$0xff] %v3945_v12  ;;  %v3959_v31 = vpop.permute.xlu0 %1416  ;;  %v3966_v12 = vpop.permute.xlu1 %1421 }
  0x9a   :  { %6256 = vst [vmem:[#allocation30_spill] sm:$0xff] %v3954_v35  ;;  %v3968_v34 = vpop.f32.mrf.mxu1  ;;  %v2023_v35 = vsel %vm1916_vm2, %v2021_v45, %v2022_v57  ;;  %v1843_v57 = vadd.f32 %v3995_v39, %v3487_v6  ;;  %v2344_v45 = vrot.slane %v3335_v29, 1  ;;  %v4011_v6 = vld [vmem:[%s6135_s0 + $0x2a0] sm:$0xff] }
  0x9b   :  { %6257 = vst [vmem:[#allocation31_spill] sm:$0xff] %v3959_v31  ;;  %2941 = vmatmul.msk.f32.gmra.mxu0 %vm185_vm1, %v59_v20  ;;  %v1837_v31 = vadd.f32 %v3978_v38, %v3325_v27  ;;  %v3990_v20 = vsel %vm1916_vm2, %v2003_v46, %v2004_v32  ;;  %v2326_v32 = vrot.slane %v3238_v9, 1 }
  0x9c   :  { %6259 = vst [vmem:[#allocation33_spill] sm:$0xff] %v3966_v12  ;;  %3005 = vmatmul.msk.f32.gmra.mxu2 %vm185_vm1, %v3964_v5  ;;  %v3985_v12 = vpop.permute.xlu2 %1616  ;;  %v2069_v27 = vadd.f32 %v2023_v35, %v1843_v57  ;;  %v2327_v5 = vrot.slane %v3258_v13, 1  ;;  %v4027_v13 = vld [vmem:[%s6135_s0 + $0x3f0] sm:$0xff] }
  0x9d   :  { %6260 = vst [vmem:[#allocation34_spill] sm:$0xff] %v3968_v34  ;;  %3045 = vmatmul.msk.f32.gmra.mxu3 %vm185_vm1, %v3802_v21  ;;  %v2345_v21 = vrot.slane %v3370_v36, 1  ;;  %v164_v36 = vld [vmem:[%s6135_s0 + $0x3e0] sm:$0xff] }
  0x9e   :  { %6261 = vst [vmem:[#allocation35_spill] sm:$0xff] %v3985_v12  ;;  %v2063_v12 = vadd.f32 %v3990_v20, %v1837_v31 }
  0x9f   :  { %6262 = vst [vmem:[#allocation36_spill] sm:$0xff] %v3990_v20  ;;  %v823_v34 = vpop.f32.mrf.mxu2  ;;  %v2346_v57 = vsel %vm1916_vm2, %v2344_v45, %v2345_v21 }
  0xa0   :  { %v931_v18 = vpop.f32.mrf.mxu3  ;;  %v4002_v22 = vpop.f32.mrf.mxu0  ;;  %6264 = vst [vmem:[#allocation38_spill] sm:$0xff] %v4011_v6  ;;  %v99_v34 = vld [vmem:[%s6135_s0 + $0x1d8] sm:$0xff]  ;;  %v2112_v20 = vadd.f32 %v2063_v12, %v3238_v9  ;;  %v2328_v9 = vsel %vm1916_vm2, %v2326_v32, %v2327_v5  ;;  %v1369_v12 = vld [vmem:[%s6136_s1 + $0x110] sm:$0xff] }
  0xa1   :  { %6263 = vst [vmem:[#allocation37_spill] sm:$0xff] %v4002_v22  ;;  %v4004_v46 = vpop.permute.xlu0 %1551  ;;  %v2118_v18 = vadd.f32 %v2069_v27, %v3335_v29  ;;  %v4017_v35 = vpop.permute.xlu1 %1556  ;;  %2981 = vmatmul.msk.f32.gmra.mxu1 %vm185_vm1, %v99_v34  ;;  %1526 = vperm.xlu2 %3089, %v1369_v12  }
  0xa2   :  { %v4019_v31 = vpop.f32.mrf.mxu1  ;;  %v2161_v27 = vadd.f32 %v2112_v20, %v98_v24  ;;  %v4057_v20 = vld [vmem:[%s6135_s0 + $0x2b8] sm:$0xff] }
  0xa3   :  { %6265 = vst [vmem:[#allocation39_spill] sm:$0xff] %v4019_v31  ;;  %2942 = vmatmul.msk.f32.gmra.mxu0 %vm185_vm1, %v3892_v2  ;;  %v2167_v29 = vadd.f32 %v2118_v18, %v4027_v13  ;;  %v126_v31 = vld [vmem:[%s6135_s0 + $0x2b0] sm:$0xff]  ;;  %v4050_v2 = vld [vmem:[%s6137_s3] ss:$0 sm:$0xff]  ;;  %v2043_v34 = vrot.slane %v4057_v20, 1 }
  0xa4   :  { %3006 = vmatmul.msk.f32.gmra.mxu2 %vm185_vm1, %v4011_v6  ;;  %v2042_v21 = vrot.slane %v126_v31, 1  ;;  %v2386_v24 = vadd.f32 %v2328_v9, %v2161_v27  ;;  %v1850_v18 = vadd.f32 %v3211_v4, %v126_v31  ;;  %v61_v9 = vld [vmem:[%s6135_s0 + $0xa8] sm:$0xff]  ;;  %v2006_v4 = vrot.slane %v3396_v41, 1 }
  0xa5   :  { %3046 = vmatmul.msk.f32.gmra.mxu3 %vm185_vm1, %v164_v36  ;;  %v4041_v45 = vadd.f32 %v2346_v57, %v2167_v29  ;;  %v4052_v36 = vpop.permute.xlu2 %1496  ;;  %v4066_v57 = vld [vmem:[%s6138_s4] ss:$0 sm:$0xff]  ;;  %v4082_v6 = vld [vmem:[%s6135_s0 + $0x2a8] sm:$0xff] }
  0xa6   :  { %6266 = vst [vmem:[#allocation40_spill] sm:$0xff] %v4052_v36  ;;  %v2435_v36 = vadd.f32 %v2386_v24, %v3396_v41  ;;  %v4094_v22 = vsel %vm1916_vm2, %v2042_v21, %v2043_v34 }
  0xa7   :  { %v4059_v5 = vpop.f32.mrf.mxu2  ;;  %6270 = vst [vmem:[#allocation44_spill] sm:$0xff] %v4082_v6  ;;  %v2076_v53 = vadd.f32 %v4094_v22, %v1850_v18 }
  0xa8   :  { %6267 = vst [vmem:[#allocation41_spill] sm:$0xff] %v4059_v5  ;;  %v933_v32 = vpop.f32.mrf.mxu3  ;;  %v4069_v27 = vpop.f32.mrf.mxu0  ;;  %v2007_v5 = vrot.slane %v3428_v48, 1 }
  0xa9   :  { %v1111_v29 = vmul.f32 %v4050_v2, %v933_v32  ;;  %6268 = vst [vmem:[#allocation42_spill] sm:$0xff] %v4069_v27  ;;  %v4074_v12 = vpop.permute.xlu0 %1426  ;;  %v165_v32 = vld [vmem:[%s6135_s0 + $0x3e8] sm:$0xff]  ;;  %v4096_v48 = vpop.permute.xlu1 %1431 }
  0xaa   :  { %6269 = vst [vmem:[#allocation43_spill] sm:$0xff] %v4074_v12  ;;  %v4087_v27 = vpop.f32.mrf.mxu1  ;;  %v100_v12 = vld [vmem:[%s6135_s0 + $0x1e0] sm:$0xff]  ;;  %v2008_v34 = vsel %vm1916_vm2, %v2006_v4, %v2007_v5 }
  0xab   :  { %6271 = vst [vmem:[#allocation45_spill] sm:$0xff] %v4087_v27  ;;  %v1217_v24 = vadd.f32 %v4066_v57, %v1111_v29  ;;  %2982 = vmatmul.msk.f32.gmra.mxu1 %vm185_vm1, %v100_v12  ;;  %2943 = vmatmul.msk.f32.gmra.mxu0 %vm185_vm1, %v61_v9  ;;  %v4104_v27 = vld [vmem:[%s6135_s0 + $0xc0] sm:$0xff]  ;;  %v4112_v29 = vadd.f32 %v2076_v53, %v3784_v28 }
  0xac   :  { %6272 = vst [vmem:[#allocation46_spill] sm:$0xff] %v4094_v22  ;;  %3007 = vmatmul.msk.f32.gmra.mxu2 %vm185_vm1, %v4082_v6  ;;  %v2484_v21 = vadd.f32 %v2435_v36, %v4104_v27  ;;  %v4125_v36 = vld [vmem:[%s6139_s5] sm:$0xff]  ;;  %v1838_v53 = vadd.f32 %v4104_v27, %v3396_v41 }
  0xad   :  { %6273 = vst [vmem:[#allocation47_spill] sm:$0xff] %v4096_v48  ;;  %v1319_v0 = vmax.f32 %v1217_v24, 0.0  ;;  %3047 = vmatmul.msk.f32.gmra.mxu3 %vm185_vm1, %v165_v32  ;;  %v4120_v6 = vpop.permute.xlu2 %1621  ;;  %v101_v32 = vld [vmem:[%s6135_s0 + $0x1e8] sm:$0xff] }
  0xae   :  { %6274 = vst [vmem:[#allocation48_spill] sm:$0xff] %v4112_v29  ;;  %v2653_v9 = vadd.f32 %v2484_v21, %v2008_v34 }
  0xaf   :  { %v828_v18 = vpop.f32.mrf.mxu2  ;;  %v4115_v48 = vmul.f32 %v3829_v52, %v1319_v0  ;;  %6276 = vst [vmem:[#allocation50_spill] sm:$0xff] %v4120_v6  ;;  %v4132_v0 = vperm.slane %v4125_v36, 5 }
  0xb0   :  { %v936_v22 = vpop.f32.mrf.mxu3  ;;  %v4118_v56 = vpop.f32.mrf.mxu0  ;;  %v2669_v28 = vmul.f32 0.11111111, %v2653_v9  ;;  %v2064_v18 = vadd.f32 %v2008_v34, %v1838_v53  ;;  %v63_v34 = vld [vmem:[%s6135_s0 + $0xb8] sm:$0xff] }
  0xb1   :  { %6275 = vst [vmem:[#allocation49_spill] sm:$0xff] %v4115_v48  ;;  %v1112_v24 = vmul.f32 %v4050_v2, %v936_v22  ;;  %v4135_v4 = vpop.permute.xlu0 %1561  ;;  %v2192_v41 = vmul.f32 %v4132_v0, %v4115_v48  ;;  %v4151_v9 = vpop.permute.xlu1 %1566 }
  0xb2   :  { %v4129_v5 = vpop.f32.mrf.mxu1  ;;  %2685 = vst.msk [vmem:[%s6140_s11 + $0x10] sm:$0xff] %vm185_vm1, %v2669_v28 }
  0xb3   :  { %v1218_v22 = vadd.f32 %v4066_v57, %v1112_v24  ;;  %2944 = vmatmul.msk.f32.gmra.mxu0 %vm185_vm1, %v3978_v38  ;;  %2983 = vmatmul.msk.f32.gmra.mxu1 %vm185_vm1, %v101_v32  ;;  %v2329_v38 = vrot.slane %v3289_v19, 1  ;;  %v2330_v24 = vrot.slane %v3320_v26, 1  ;;  %v2264_v29 = vrot.slane %v2192_v41, 1  ;;  %v167_v26 = vld [vmem:[%s6135_s0 + $0x3f8] sm:$0xff] }
  0xb4   :  { %3008 = vmatmul.msk.f32.gmra.mxu2 %vm185_vm1, %v126_v31 }
  0xb5   :  { %v1320_v21 = vmax.f32 %v1218_v22, 0.0  ;;  %3048 = vmatmul.msk.f32.gmra.mxu3 %vm185_vm1, %v4027_v13  ;;  %v2113_v22 = vadd.f32 %v2064_v18, %v3289_v19  ;;  %v4171_v32 = vpop.permute.xlu2 %1501  ;;  %v2331_v41 = vsel %vm1916_vm2, %v2329_v38, %v2330_v24  ;;  %v2009_v38 = vrot.slane %v3482_v3, 1 }
  0xb6   :  { %6277 = vst [vmem:[#allocation51_spill] sm:$0xff] %v4171_v32  ;;  %v2010_v24 = vrot.slane %v3524_v23, 1  ;;  %v4206_v23 = vld [vmem:[%s6135_s0 + $0x2c0] sm:$0xff] }
  0xb7   :  { %v1728_v28 = vmul.f32 %v3808_v30, %v1320_v21  ;;  %v830_v52 = vpop.f32.mrf.mxu2  ;;  %v2162_v21 = vadd.f32 %v2113_v22, %v100_v12 }
  0xb8   :  { %v939_v6 = vpop.f32.mrf.mxu3  ;;  %v4160_v48 = vpop.f32.mrf.mxu0 }
  0xb9   :  { %v2193_v31 = vmul.f32 %v4132_v0, %v1728_v28  ;;  %v1113_v13 = vmul.f32 %v4050_v2, %v939_v6  ;;  %v102_v6 = vld [vmem:[%s6135_s0 + $0x1f0] sm:$0xff] }
  0xba   :  { %v4168_v53 = vpop.f32.mrf.mxu1 }
  0xbb   :  { %v2265_v52 = vrot.slane %v2193_v31, 1  ;;  %v1219_v19 = vadd.f32 %v4066_v57, %v1113_v13  ;;  %2945 = vmatmul.msk.f32.gmra.mxu0 %vm185_vm1, %v63_v34  ;;  %v4184_v31 = vpop.permute.xlu0 %1436  ;;  %v2387_v13 = vadd.f32 %v2331_v41, %v2162_v21  ;;  %2984 = vmatmul.msk.f32.gmra.mxu1 %vm185_vm1, %v102_v6  ;;  %v4189_v34 = vpop.permute.xlu1 %1441  ;;  %v4211_v41 = vld [vmem:[%s6135_s0 + $0x400] sm:$0xff] }
  0xbc   :  { %3009 = vmatmul.msk.f32.gmra.mxu2 %vm185_vm1, %v4057_v20  ;;  %6279 = vst [vmem:[#allocation53_spill] sm:$0xff] %v4184_v31 }
  0xbd   :  { %v4179_v18 = vsel %vm1916_vm2, %v2264_v29, %v2265_v52  ;;  %v1321_v28 = vmax.f32 %v1219_v19, 0.0  ;;  %3049 = vmatmul.msk.f32.gmra.mxu3 %vm185_vm1, %v167_v26  ;;  %6280 = vst [vmem:[#allocation54_spill] sm:$0xff] %v4189_v34  ;;  %v2436_v22 = vadd.f32 %v2387_v13, %v3482_v3  ;;  %v4201_v19 = vld [vmem:[%s6135_s0 + $0xd0] sm:$0xff] }
  0xbe   :  { %6278 = vst [vmem:[#allocation52_spill] sm:$0xff] %v4179_v18  ;;  %v1839_v21 = vadd.f32 %v4201_v19, %v3482_v3  ;;  %v4228_v3 = vpop.permute.xlu2 %1626 }
  0xbf   :  { %v832_v12 = vpop.f32.mrf.mxu2  ;;  %v4193_v52 = vmul.f32 %v3912_v14, %v1321_v28  ;;  %v2485_v28 = vadd.f32 %v2436_v22, %v4201_v19  ;;  %6283 = vst [vmem:[#allocation57_spill] sm:$0xff] %v4228_v3 }
  0xc0   :  { %v942_v29 = vpop.f32.mrf.mxu3  ;;  %v4196_v26 = vpop.f32.mrf.mxu0  ;;  %v2011_v12 = vsel %vm1916_vm2, %v2009_v38, %v2010_v24  ;;  %v2332_v24 = vrot.slane %v3357_v33, 1 }
  0xc1   :  { %6281 = vst [vmem:[#allocation55_spill] sm:$0xff] %v4193_v52  ;;  %v1114_v20 = vmul.f32 %v4050_v2, %v942_v29  ;;  %v2654_v14 = vadd.f32 %v2485_v28, %v2011_v12  ;;  %v2194_v30 = vmul.f32 %v4132_v0, %v4193_v52  ;;  %v2065_v38 = vadd.f32 %v2011_v12, %v1839_v21 }
  0xc2   :  { %v4216_v13 = vpop.f32.mrf.mxu1 }
  0xc3   :  { %6282 = vst [vmem:[#allocation56_spill] sm:$0xff] %v4216_v13  ;;  %v1220_v29 = vadd.f32 %v4066_v57, %v1114_v20  ;;  %2946 = vmatmul.msk.f32.gmra.mxu0 %vm185_vm1, %v4104_v27  ;;  %v2670_v22 = vmul.f32 0.11111111, %v2654_v14  ;;  %v2333_v20 = vrot.slane %v3391_v40, 1  ;;  %v4233_v28 = vpop.permute.xlu0 %1571  ;;  %v2114_v3 = vadd.f32 %v2065_v38, %v3357_v33  ;;  %v4257_v33 = vld [vmem:[%s6135_s0 + $0x2c8] sm:$0xff] }
  0xc4   :  { %3010 = vmatmul.msk.f32.gmra.mxu2 %vm185_vm1, %v4206_v23  ;;  %v2267_v14 = vrot.slane %v2194_v30, 1  ;;  %v2024_v13 = vrot.slane %v3570_v58, 1  ;;  %v169_v30 = vld [vmem:[%s6135_s0 + $0x408] sm:$0xff] }
  0xc5   :  { %v1322_v18 = vmax.f32 %v1220_v29, 0.0  ;;  %3050 = vmatmul.msk.f32.gmra.mxu3 %vm185_vm1, %v4211_v41  ;;  %2686 = vst.msk [vmem:[%s6140_s11 + $0x18] sm:$0xff] %vm185_vm1, %v2670_v22  ;;  %v2441_v22 = vadd.f32 %v4041_v45, %v3570_v58  ;;  %v2334_v52 = vsel %vm1916_vm2, %v2332_v24, %v2333_v20  ;;  %v2163_v45 = vadd.f32 %v2114_v3, %v102_v6 }
  0xc7   :  { %v1730_v27 = vmul.f32 %v3919_v37, %v1322_v18  ;;  %v4235_v32 = vpop.f32.mrf.mxu2  ;;  %v65_v18 = vld [vmem:[%s6135_s0 + $0xc8] sm:$0xff]  ;;  %v4249_v37 = vpop.permute.xlu1 %1576 }
  0xc8   :  { %v945_v29 = vpop.f32.mrf.mxu3  ;;  %v4244_v40 = vpop.f32.mrf.mxu0 }
  0xc9   :  { %v2195_v21 = vmul.f32 %v4132_v0, %v1730_v27  ;;  %v1115_v12 = vmul.f32 %v4050_v2, %v945_v29  ;;  %6284 = vst [vmem:[#allocation58_spill] sm:$0xff] %v4244_v40  ;;  %v2025_v27 = vrot.slane %v3611_v16, 1  ;;  %v4277_v16 = vld [vmem:[%s6135_s0 + $0x2e0] sm:$0xff] }
  0xca   :  { %v4262_v38 = vpop.f32.mrf.mxu1  ;;  %v2490_v24 = vadd.f32 %v2441_v22, %v4277_v16 }
  0xcb   :  { %v2268_v29 = vrot.slane %v2195_v21, 1  ;;  %v1221_v34 = vadd.f32 %v4066_v57, %v1115_v12  ;;  %2947 = vmatmul.msk.f32.gmra.mxu0 %vm185_vm1, %v65_v18  ;;  %v2388_v21 = vadd.f32 %v2334_v52, %v2163_v45  ;;  %v4281_v20 = vsel %vm1916_vm2, %v2024_v13, %v2025_v27  ;;  %v4294_v52 = vpop.permute.xlu0 %1446  ;;  %v4300_v13 = vld [vmem:[%s6135_s0 + $0x410] sm:$0xff] }
  0xcc   :  { %3011 = vmatmul.msk.f32.gmra.mxu2 %vm185_vm1, %v4257_v33  ;;  %v2659_v18 = vadd.f32 %v2490_v24, %v4281_v20  ;;  %6287 = vst [vmem:[#allocation61_spill] sm:$0xff] %v4294_v52 }
  0xcd   :  { %v4269_v31 = vsel %vm1916_vm2, %v2267_v14, %v2268_v29  ;;  %v1323_v40 = vmax.f32 %v1221_v34, 0.0  ;;  %3051 = vmatmul.msk.f32.gmra.mxu3 %vm185_vm1, %v169_v30  ;;  %v4286_v34 = vpop.permute.xlu2 %1506  ;;  %v2437_v12 = vadd.f32 %v2388_v21, %v3433_v49 }
  0xce   :  { %6285 = vst [vmem:[#allocation59_spill] sm:$0xff] %v4269_v31  ;;  %v2675_v21 = vmul.f32 0.11111111, %v2659_v18 }
  0xcf   :  { %v4284_v6 = vmul.f32 %v4004_v46, %v1323_v40  ;;  %6286 = vst [vmem:[#allocation60_spill] sm:$0xff] %v4286_v34  ;;  %v4288_v3 = vpop.f32.mrf.mxu2  ;;  %v2486_v27 = vadd.f32 %v2437_v12, %v3456_v55  ;;  %v4305_v29 = vpop.permute.xlu1 %1451 }
  0xd0   :  { %v948_v14 = vpop.f32.mrf.mxu3  ;;  %v4292_v30 = vpop.f32.mrf.mxu0  ;;  %6289 = vst [vmem:[#allocation63_spill] sm:$0xff] %v4305_v29 }
  0xd1   :  { %v1116_v22 = vmul.f32 %v4050_v2, %v948_v14  ;;  %v2655_v45 = vadd.f32 %v2486_v27, %v3473_v61  ;;  %v2196_v24 = vmul.f32 %v4132_v0, %v4284_v6  ;;  %2691 = vst.msk [vmem:[%s6140_s11 + $0x40] sm:$0xff] %vm185_vm1, %v2675_v21  ;;  %v67_v61 = vld [vmem:[%s6135_s0 + $0xd8] sm:$0xff] }
  0xd2   :  { %v4302_v40 = vpop.f32.mrf.mxu1 }
  0xd3   :  { %6288 = vst [vmem:[#allocation62_spill] sm:$0xff] %v4302_v40  ;;  %v1222_v49 = vadd.f32 %v4066_v57, %v1116_v22  ;;  %2948 = vmatmul.msk.f32.gmra.mxu0 %vm185_vm1, %v4201_v19  ;;  %v2671_v14 = vmul.f32 0.11111111, %v2655_v45  ;;  %v2270_v18 = vrot.slane %v2196_v24, 1  ;;  %v171_v45 = vld [vmem:[%s6135_s0 + $0x418] sm:$0xff]  ;;  %v4346_v34 = vpop.permute.xlu0 %1581  ;;  %v2353_v40 = vrot.slane %v3575_v59, 1 }
  0xd4   :  { %3012 = vmatmul.msk.f32.gmra.mxu2 %vm185_vm1, %v3995_v39  ;;  %v1064_v59 = vmul.f32 %v4050_v2, %v3884_v44  ;;  %v2359_v44 = vrot.slane %v3738_v42, 1 }
  0xd5   :  { %3052 = vmatmul.msk.f32.gmra.mxu3 %vm185_vm1, %v4300_v13  ;;  %v1324_v55 = vmax.f32 %v1222_v49, 0.0  ;;  %2687 = vst.msk [vmem:[%s6140_s11 + $0x20] sm:$0xff] %vm185_vm1, %v2671_v14  ;;  %v131_v49 = vld [vmem:[%s6135_s0 + $0x2d8] sm:$0xff]  ;;  %v2348_v14 = vrot.slane %v3441_v51, 1  ;;  %v4348_v24 = vpop.permute.xlu2 %1631  ;;  %v2356_v51 = vrot.slane %v3654_v50, 1  ;;  %v2357_v50 = vrot.slane %v3697_v11, 1 }
  0xd6   :  { %6291 = vst [vmem:[#allocation65_spill] sm:$0xff] %v4348_v24 }
  0xd7   :  { %v1732_v19 = vmul.f32 %v4017_v35, %v1324_v55  ;;  %v4322_v12 = vpop.f32.mrf.mxu2  ;;  %v2347_v55 = vrot.slane %v3404_v43, 1  ;;  %v2027_v43 = vrot.slane %v3649_v47, 1 }
  0xd8   :  { %v951_v39 = vpop.f32.mrf.mxu3  ;;  %v4325_v31 = vpop.f32.mrf.mxu0 }
  0xd9   :  { %v1117_v22 = vmul.f32 %v4050_v2, %v951_v39  ;;  %v2197_v27 = vmul.f32 %v4132_v0, %v1732_v19  ;;  %v2350_v39 = vrot.slane %v3492_v8, 1  ;;  %v2351_v19 = vrot.slane %v3534_v25, 1  ;;  %v4360_v25 = vpop.permute.xlu1 %1586 }
  0xda   :  { %v4341_v21 = vpop.f32.mrf.mxu1  ;;  %v2028_v8 = vrot.slane %v3692_v15, 1  ;;  %v2030_v15 = vrot.slane %v3733_v54, 1 }
  0xdb   :  { %6290 = vst [vmem:[#allocation64_spill] sm:$0xff] %v4341_v21  ;;  %v2271_v29 = vrot.slane %v2197_v27, 1  ;;  %v1223_v52 = vadd.f32 %v4066_v57, %v1117_v22  ;;  %2949 = vmatmul.msk.f32.gmra.mxu0 %vm185_vm1, %v67_v61  ;;  %v2354_v21 = vrot.slane %v3616_v17, 1  ;;  %v1065_v22 = vmul.f32 %v4050_v2, %v3921_v62 }
  0xdc   :  { %3013 = vmatmul.msk.f32.gmra.mxu2 %vm185_vm1, %v131_v49  ;;  %v2031_v61 = vrot.slane %v3772_v60, 1  ;;  %v1844_v27 = vadd.f32 %v4277_v16, %v3570_v58  ;;  %v4375_v49 = vsel %vm1916_vm2, %v2347_v55, %v2348_v14  ;;  %v2360_v62 = vrot.slane %v3779_v1, 1 }
  0xdd   :  { %3053 = vmatmul.msk.f32.gmra.mxu3 %vm185_vm1, %v171_v45  ;;  %v4367_v17 = vsel %vm1916_vm2, %v2270_v18, %v2271_v29  ;;  %v1325_v47 = vmax.f32 %v1223_v52, 0.0  ;;  %v4385_v54 = vsel %vm1916_vm2, %v2350_v39, %v2351_v19  ;;  %v4388_v60 = vsel %vm1916_vm2, %v2353_v40, %v2354_v21  ;;  %v4403_v40 = vld [vmem:[%s6135_s0 + $0x420] sm:$0xff] }
  0xde   :  { %6292 = vst [vmem:[#allocation66_spill] sm:$0xff] %v4367_v17  ;;  %v4391_v58 = vsel %vm1916_vm2, %v2027_v43, %v2028_v8  ;;  %v2033_v1 = vrot.slane %v3834_v10, 1  ;;  %v2034_v45 = vrot.slane %v3875_v63, 1  ;;  %v1170_v55 = vadd.f32 %v4066_v57, %v1064_v59  ;;  %v6299_v59 = vld [vmem:[#allocation12_spill] sm:$0xff] }
  0xdf   :  { %v4380_v29 = vmul.f32 %v4135_v4, %v1325_v47  ;;  %v4382_v52 = vpop.f32.mrf.mxu2  ;;  %v1171_v14 = vadd.f32 %v4066_v57, %v1065_v22  ;;  %v4406_v21 = vsel %vm1916_vm2, %v2356_v51, %v2357_v50  ;;  %v4409_v39 = vsel %vm1916_vm2, %v2030_v15, %v2031_v61  ;;  %v6300_v47 = vld [vmem:[#allocation18_spill] sm:$0xff] }
  0xe0   :  { %6294 = vst [vmem:[#allocation68_spill] sm:$0xff] %v4382_v52  ;;  %v954_v11 = vpop.f32.mrf.mxu3  ;;  %v4394_v42 = vpop.f32.mrf.mxu0  ;;  %v2070_v10 = vadd.f32 %v4281_v20, %v1844_v27  ;;  %v4416_v43 = vsel %vm1916_vm2, %v2359_v44, %v2360_v62  ;;  %v1033_v8 = vmul.f32 %v4050_v2, %v3827_v7  ;;  %v2362_v22 = vrot.slane %v6299_v59, 1  ;;  %v3097_v50 = vld [vmem:[%s6135_s0 + $0xe0] sm:$0xff] }
  0xe1   :  { %6293 = vst [vmem:[#allocation67_spill] sm:$0xff] %v4380_v29  ;;  %v1118_v18 = vmul.f32 %v4050_v2, %v954_v11  ;;  %v2363_v51 = vrot.slane %v6300_v47, 1  ;;  %v4427_v20 = vperm.slane %v4125_v36, 0  ;;  %v4430_v15 = vperm.slane %v4125_v36, 2  ;;  %v4438_v27 = vpop.permute.xlu0 %1456  ;;  %v4440_v44 = vpop.permute.xlu2 %1511  ;;  %v6303_v11 = vld [vmem:[#allocation23_spill] sm:$0xff] }
  0xe2   :  { %6295 = vst [vmem:[#allocation69_spill] sm:$0xff] %v4394_v42  ;;  %v4413_v63 = vpop.f32.mrf.mxu1  ;;  %v2198_v61 = vmul.f32 %v4132_v0, %v4380_v29  ;;  %v4443_v62 = vsel %vm1916_vm2, %v2033_v1, %v2034_v45  ;;  %v1272_v59 = vmax.f32 %v1170_v55, 0.0  ;;  %v1273_v47 = vmax.f32 %v1171_v14, 0.0  ;;  %v6317_v42 = vld [vmem:[#allocation39_spill] sm:$0xff] }
  0xe3   :  { %6296 = vst [vmem:[#allocation70_spill] sm:$0xff] %v4406_v21  ;;  %v1224_v19 = vadd.f32 %v4066_v57, %v1118_v18  ;;  %2950 = vmatmul.msk.f32.gmra.mxu0 %vm185_vm1, %v3097_v50  ;;  %v2036_v18 = vrot.slane %v6303_v11, 1  ;;  %v6304_v50 = vld [vmem:[#allocation32_spill] sm:$0xff]  ;;  %v4456_v1 = vadd.f32 %v4066_v57, %v1033_v8  ;;  %v4459_v45 = vsel %vm1916_vm2, %v2362_v22, %v2363_v51  ;;  %v69_v22 = vld [vmem:[%s6135_s0 + $0xe8] sm:$0xff] }
  0xe4   :  { %6297 = vst [vmem:[#allocation71_spill] sm:$0xff] %v4413_v63  ;;  %3014 = vmatmul.msk.f32.gmra.mxu2 %vm185_vm1, %v4277_v16  ;;  %v2037_v29 = vrot.slane %v6304_v50, 1  ;;  %v3098_v63 = vld [vmem:[%s6135_s0 + $0x370] sm:$0xff]  ;;  %v4462_v55 = vperm.slane %v4125_v36, 6  ;;  %v6314_v51 = vld [vmem:[#allocation15_spill] sm:$0xff]  ;;  %v1681_v14 = vmul.f32 %v4017_v35, %v1273_v47  ;;  %v1067_v52 = vmul.f32 %v4050_v2, %v6317_v42 }
  0xe5   :  { %6298 = vst [vmem:[#allocation72_spill] sm:$0xff] %v4416_v43  ;;  %v1326_v7 = vmax.f32 %v1224_v19, 0.0  ;;  %3054 = vmatmul.msk.f32.gmra.mxu3 %vm185_vm1, %v4403_v40  ;;  %v6305_v19 = vld [vmem:[#allocation37_spill] sm:$0xff]  ;;  %v2119_v24 = vadd.f32 %v3098_v63, %v2070_v10  ;;  %v6312_v10 = vld [vmem:[#allocation42_spill] sm:$0xff]  ;;  %v1109_v11 = vmul.f32 %v4050_v2, %v6314_v51  ;;  %v6315_v47 = vld [vmem:[#allocation16_spill] sm:$0xff] }
  0xe6   :  { %6301 = vst [vmem:[#allocation12_spill] sm:$0xff] %v4438_v27  ;;  %v1037_v17 = vmul.f32 %v4050_v2, %v6305_v19  ;;  %v6311_v19 = vld [vmem:[#allocation14_spill] sm:$0xff]  ;;  %v1038_v63 = vmul.f32 %v4050_v2, %v6312_v10  ;;  %v4489_v10 = vsel %vm1916_vm2, %v2036_v18, %v2037_v29 }
  0xe7   :  { %6302 = vst [vmem:[#allocation18_spill] sm:$0xff] %v4440_v44  ;;  %v1734_v16 = vmul.f32 %v4151_v9, %v1326_v7  ;;  %v4453_v44 = vpop.permute.xlu1 %1461  ;;  %v4465_v50 = vpop.f32.mrf.mxu2  ;;  %v1081_v27 = vmul.f32 %v4050_v2, %v6311_v19  ;;  %v6318_v29 = vld [vmem:[#allocation38_spill] sm:$0xff]  ;;  %v4513_v42 = vadd.f32 %v4066_v57, %v1109_v11 }
  0xe8   :  { %6306 = vst [vmem:[#allocation23_spill] sm:$0xff] %v4453_v44  ;;  %v957_v7 = vpop.f32.mrf.mxu3  ;;  %v2273_v44 = vrot.slane %v2198_v61, 1  ;;  %v4472_v43 = vpop.f32.mrf.mxu0  ;;  %v133_v61 = vld [vmem:[%s6135_s0 + $0x2e8] sm:$0xff]  ;;  %v2039_v18 = vrot.slane %v6318_v29, 1  ;;  %v4529_v29 = vperm.slane %v4125_v36, 3  ;;  %v1039_v36 = vmul.f32 %v4050_v2, %v4118_v56 }
  0xe9   :  { %6307 = vst [vmem:[#allocation32_spill] sm:$0xff] %v4456_v1  ;;  %v2199_v8 = vmul.f32 %v4132_v0, %v1734_v16  ;;  %v1119_v19 = vmul.f32 %v4050_v2, %v957_v7  ;;  %v173_v16 = vld [vmem:[%s6135_s0 + $0x428] sm:$0xff]  ;;  %v1034_v7 = vmul.f32 %v4050_v2, %v6315_v47  ;;  %v4518_v47 = vpop.permute.xlu0 %1591  ;;  %v1173_v1 = vadd.f32 %v4066_v57, %v1067_v52  ;;  %v4552_v52 = vld [vmem:[%s6135_s0 + $0x430] sm:$0xff] }
  0xea   :  { %6308 = vst [vmem:[#allocation37_spill] sm:$0xff] %v4459_v45  ;;  %v1680_v45 = vmul.f32 %v4004_v46, %v1272_v59  ;;  %v2168_v46 = vadd.f32 %v2119_v24, %v4211_v41  ;;  %v786_v59 = vpop.f32.mrf.mxu1 }
  0xeb   :  { %6310 = vst [vmem:[#allocation73_spill] sm:$0xff] %v4465_v50  ;;  %v2274_v51 = vrot.slane %v2199_v8, 1  ;;  %v6316_v50 = vld [vmem:[#allocation34_spill] sm:$0xff]  ;;  %2951 = vmatmul.msk.f32.gmra.mxu0 %vm185_vm1, %v69_v22  ;;  %v1225_v24 = vadd.f32 %v4066_v57, %v1119_v19  ;;  %v2181_v22 = vmul.f32 %v4132_v0, %v1681_v14  ;;  %v6320_v59 = vld [vmem:[#allocation44_spill] sm:$0xff]  ;;  %v4520_v19 = vpop.permute.xlu2 %1636 }
  0xec   :  { %6313 = vst [vmem:[#allocation14_spill] sm:$0xff] %v4472_v43  ;;  %v1143_v43 = vadd.f32 %v4066_v57, %v1037_v17  ;;  %v1066_v21 = vmul.f32 %v4050_v2, %v6316_v50  ;;  %v1144_v17 = vadd.f32 %v4066_v57, %v1038_v63  ;;  %3015 = vmatmul.msk.f32.gmra.mxu2 %vm185_vm1, %v133_v61 }
  0xed   :  { %v4504_v41 = vsel %vm1916_vm2, %v2273_v44, %v2274_v51  ;;  %3055 = vmatmul.msk.f32.gmra.mxu3 %vm185_vm1, %v173_v16  ;;  %v4510_v50 = vadd.f32 %v4066_v57, %v1081_v27  ;;  %v2180_v8 = vmul.f32 %v4132_v0, %v1680_v45  ;;  %v2040_v44 = vrot.slane %v6320_v59, 1  ;;  %6321 = vst [vmem:[#allocation15_spill] sm:$0xff] %v4520_v19  ;;  %v6323_v16 = vld [vmem:[#allocation28_spill] sm:$0xff] }
  0xee   :  { %6319 = vst [vmem:[#allocation42_spill] sm:$0xff] %v4504_v41  ;;  %v1245_v63 = vmax.f32 %v1143_v43, 0.0  ;;  %v1327_v51 = vmax.f32 %v1225_v24, 0.0  ;;  %v2393_v61 = vadd.f32 %v4375_v49, %v2168_v46  ;;  %v4524_v27 = vadd.f32 %v4066_v57, %v1034_v7 }
  0xef   :  { %v1082_v11 = vmul.f32 %v4050_v2, %v6323_v16  ;;  %v1172_v43 = vadd.f32 %v4066_v57, %v1066_v21  ;;  %v4532_v14 = vpop.f32.mrf.mxu2  ;;  %v1246_v41 = vmax.f32 %v1144_v17, 0.0  ;;  %v4541_v7 = vpop.permute.xlu1 %1596  ;;  %v2246_v16 = vrot.slane %v2180_v8, 1  ;;  %v134_v17 = vld [vmem:[%s6135_s0 + $0x2f0] sm:$0xff]  ;;  %v6329_v8 = vld [vmem:[#allocation31_spill] sm:$0xff] }
  0xf0   :  { %6322 = vst [vmem:[#allocation16_spill] sm:$0xff] %v4524_v27  ;;  %v960_v24 = vpop.f32.mrf.mxu3  ;;  %v4537_v49 = vmul.f32 %v4233_v28, %v1327_v51  ;;  %v4539_v46 = vpop.f32.mrf.mxu0  ;;  %v2247_v21 = vrot.slane %v2181_v22, 1  ;;  %v6328_v51 = vld [vmem:[#allocation29_spill] sm:$0xff]  ;;  %v4559_v19 = vmul.f32 %v6329_v8, %v1245_v63  ;;  %v4562_v56 = vsel %vm1916_vm2, %v2039_v18, %v2040_v44  ;;  %v3099_v63 = vld [vmem:[%s6135_s0 + $0xf0] sm:$0xff] }
  0xf1   :  { %6324 = vst [vmem:[#allocation34_spill] sm:$0xff] %v4532_v14  ;;  %v1120_v27 = vmul.f32 %v4050_v2, %v960_v24  ;;  %v4556_v35 = vmul.f32 %v4050_v2, %v6328_v51  ;;  %v1040_v22 = vmul.f32 %v4050_v2, %v4160_v48  ;;  %v4570_v59 = vmul.f32 %v4529_v29, %v1680_v45  ;;  %v6333_v18 = vld [vmem:[#allocation41_spill] sm:$0xff]  ;;  %v3100_v45 = vld [vmem:[%s6135_s0 + $0x260] sm:$0xff]  ;;  %v4619_v8 = vpop.permute.xlu0 %1466 }
  0xf2   :  { %6326 = vst [vmem:[#allocation39_spill] sm:$0xff] %v4537_v49  ;;  %v788_v24 = vpop.f32.mrf.mxu1  ;;  %v1274_v14 = vmax.f32 %v1172_v43, 0.0  ;;  %v1083_v44 = vmul.f32 %v4050_v2, %v6333_v18  ;;  %v6334_v48 = vld [vmem:[#allocation33_spill] sm:$0xff]  ;;  %v1145_v43 = vadd.f32 %v4066_v57, %v1039_v36  ;;  %v2739_v36 = vld [vmem:[%s6141_s8] sm:$0xf] }
  0xf3   :  { %6327 = vst [vmem:[#allocation38_spill] sm:$0xff] %v4539_v46  ;;  %v4567_v46 = vadd.f32 %v4066_v57, %v1082_v11  ;;  %v1226_v51 = vadd.f32 %v4066_v57, %v1120_v27  ;;  %2952 = vmatmul.msk.f32.gmra.mxu0 %vm185_vm1, %v3099_v63  ;;  %v4580_v24 = vmul.f32 %v6334_v48, %v1246_v41  ;;  %v1275_v11 = vmax.f32 %v1173_v1, 0.0 }
  0xf4   :  { %6330 = vst [vmem:[#allocation44_spill] sm:$0xff] %v4559_v19  ;;  %3016 = vmatmul.msk.f32.gmra.mxu2 %vm185_vm1, %v134_v17  ;;  %v2442_v27 = vadd.f32 %v3100_v45, %v2393_v61  ;;  %v4590_v63 = vsel %vm1916_vm2, %v2246_v16, %v2247_v21  ;;  %v2200_v41 = vmul.f32 %v4132_v0, %v4537_v49 }
  0xf5   :  { %6331 = vst [vmem:[#allocation28_spill] sm:$0xff] %v4567_v46  ;;  %3056 = vmatmul.msk.f32.gmra.mxu3 %vm185_vm1, %v4552_v52  ;;  %v1328_v18 = vmax.f32 %v1226_v51, 0.0  ;;  %v4596_v1 = vmul.f32 %v4427_v20, %v4559_v19  ;;  %v1146_v46 = vadd.f32 %v4066_v57, %v1040_v22  ;;  %v4606_v16 = vmul.f32 %v4430_v15, %v4559_v19 }
  0xf6   :  { %6332 = vst [vmem:[#allocation29_spill] sm:$0xff] %v4570_v59  ;;  %v6338_v59 = vld [vmem:[#allocation45_spill] sm:$0xff]  ;;  %v2491_v48 = vadd.f32 %v2442_v27, %v134_v17  ;;  %v1069_v21 = vmul.f32 %v4050_v2, %v4129_v5  ;;  %v1845_v49 = vadd.f32 %v3100_v45, %v134_v17  ;;  %3066 = vmatpush.msk.msrb.mxu1 %vm618_vm0, %v2739_v36  ;;  %v1247_v45 = vmax.f32 %v1145_v43, 0.0 }
  0xf7   :  { %6335 = vst [vmem:[#allocation41_spill] sm:$0xff] %v4580_v24  ;;  %v1068_v61 = vmul.f32 %v4050_v2, %v6338_v59  ;;  %v1736_v51 = vmul.f32 %v4249_v37, %v1328_v18  ;;  %v1857_v59 = vmul.f32 %v4430_v15, %v4580_v24  ;;  %v1682_v27 = vmul.f32 %v4135_v4, %v1274_v14  ;;  %v71_v17 = vld [vmem:[%s6135_s0 + $0xf8] sm:$0xff] }
  0xf8   :  { %6336 = vst [vmem:[#allocation74_spill] sm:$0xff] %v4590_v63  ;;  %v4611_v63 = vpop.f32.mrf.mxu2  ;;  %v963_v22 = vpop.f32.mrf.mxu3  ;;  %v2660_v19 = vadd.f32 %v2491_v48, %v4391_v58  ;;  %v2276_v18 = vrot.slane %v2200_v41, 1  ;;  %v135_v4 = vld [vmem:[%s6135_s0 + $0x2f8] sm:$0xff]  ;;  %v1248_v14 = vmax.f32 %v1146_v46, 0.0 }
  0xf9   :  { %6337 = vst [vmem:[#allocation75_spill] sm:$0xff] %v4596_v1  ;;  %v1683_v1 = vmul.f32 %v4151_v9, %v1275_v11  ;;  %v4621_v5 = vpop.f32.mrf.mxu0  ;;  %v2201_v36 = vmul.f32 %v4132_v0, %v1736_v51  ;;  %v1121_v24 = vmul.f32 %v4050_v2, %v963_v22  ;;  %v4634_v9 = vadd.f32 %v4066_v57, %v1083_v44  ;;  %v175_v43 = vld [vmem:[%s6135_s0 + $0x438] sm:$0xff]  ;;  %v4640_v41 = vpop.permute.xlu1 %1471 }
  0xfa   :  { %6339 = vst [vmem:[#allocation45_spill] sm:$0xff] %v4611_v63  ;;  %v4628_v63 = vpop.permute.xlu2 %1516  ;;  %v1174_v48 = vadd.f32 %v4066_v57, %v1068_v61  ;;  %v2676_v11 = vmul.f32 0.11111111, %v2660_v19  ;;  %v1041_v51 = vmul.f32 %v4050_v2, %v4196_v26  ;;  %v1175_v22 = vadd.f32 %v4066_v57, %v1069_v21  ;;  %v4656_v26 = vpop.f32.mrf.mxu1 }
  0xfb   :  { %6340 = vst [vmem:[#allocation76_spill] sm:$0xff] %v4621_v5  ;;  %v2071_v5 = vadd.f32 %v4391_v58, %v1845_v49  ;;  %2953 = vmatmul.msk.f32.gmra.mxu0 %vm185_vm1, %v71_v17  ;;  %v2182_v46 = vmul.f32 %v4132_v0, %v1682_v27  ;;  %v2646_v19 = vrot.slane %v4206_v23, 1  ;;  %v2183_v44 = vmul.f32 %v4132_v0, %v1683_v1  ;;  %v6344_v49 = vld [vmem:[#allocation43_spill] sm:$0xff]  ;;  %v6347_v1 = vld [vmem:[#allocation49_spill] sm:$0xff] }
  0xfc   :  { %6341 = vst [vmem:[#allocation77_spill] sm:$0xff] %v4628_v63  ;;  %v2277_v63 = vrot.slane %v2201_v36, 1  ;;  %v2647_v61 = vrot.slane %v4257_v33, 1  ;;  %3017 = vmatmul.msk.f32.gmra.mxu2 %vm185_vm1, %v135_v4  ;;  %v1924_v58 = vrot.slane %v1857_v59, 1  ;;  %v4659_v21 = vmul.f32 %v6344_v49, %v1247_v45  ;;  %v6349_v4 = vld [vmem:[#allocation47_spill] sm:$0xff] }
  0xfd   :  { %6342 = vst [vmem:[#allocation78_spill] sm:$0xff] %v4634_v9  ;;  %v1227_v23 = vadd.f32 %v4066_v57, %v1121_v24  ;;  %3057 = vmatmul.msk.f32.gmra.mxu3 %vm185_vm1, %v175_v43  ;;  %v1923_v33 = vrot.slane %v4606_v16, 1  ;;  %v4669_v36 = vmul.f32 %v4529_v29, %v6347_v1  ;;  %v1276_v59 = vmax.f32 %v1174_v48, 0.0  ;;  %v6361_v49 = vld [vmem:[#allocation55_spill] sm:$0xff] }
  0xfe   :  { %2692 = vst.msk [vmem:[%s6140_s11 + $0x48] sm:$0xff] %vm185_vm1, %v2676_v11  ;;  %v4662_v17 = vsel %vm1916_vm2, %v2276_v18, %v2277_v63  ;;  %v4672_v11 = vmul.f32 %v6349_v4, %v1248_v14  ;;  %v1147_v45 = vadd.f32 %v4066_v57, %v1041_v51  ;;  %v3101_v63 = vld [vmem:[%s6135_s0 + $0x380] sm:$0xff]  ;;  %v2249_v1 = vrot.slane %v2182_v46, 1 }
  0xff   :  { %6343 = vst [vmem:[#allocation79_spill] sm:$0xff] %v4656_v26  ;;  %v1277_v26 = vmax.f32 %v1175_v22, 0.0  ;;  %v2120_v24 = vadd.f32 %v3101_v63, %v2071_v5  ;;  %v1329_v18 = vmax.f32 %v1227_v23, 0.0  ;;  %v2250_v9 = vrot.slane %v2183_v44, 1  ;;  %v6358_v4 = vld [vmem:[#allocation58_spill] sm:$0xff] }
 0x100   :  { %6345 = vst [vmem:[#allocation80_spill] sm:$0xff] %v4659_v21  ;;  %v4678_v43 = vpop.f32.mrf.mxu2  ;;  %v966_v16 = vpop.f32.mrf.mxu3  ;;  %v4685_v51 = vsel %vm1916_vm2, %v1923_v33, %v1924_v58  ;;  %v1858_v22 = vmul.f32 %v4430_v15, %v4659_v21  ;;  %v4690_v5 = vsel %vm1916_vm2, %v2646_v19, %v2647_v61  ;;  %v1859_v46 = vmul.f32 %v4430_v15, %v4672_v11  ;;  %v4709_v61 = vld [vmem:[%s6135_s0 + $0x440] sm:$0xff] }
 0x101   :  { %6346 = vst [vmem:[#allocation81_spill] sm:$0xff] %v4662_v17  ;;  %v4681_v17 = vmul.f32 %v4529_v29, %v1682_v27  ;;  %v1122_v14 = vmul.f32 %v4050_v2, %v966_v16  ;;  %v687_v48 = vpop.f32.mrf.mxu0  ;;  %v4693_v23 = vmul.f32 %v4346_v34, %v1329_v18  ;;  %v136_v27 = vld [vmem:[%s6135_s0 + $0x300] sm:$0xff]  ;;  %v1684_v44 = vmul.f32 %v4233_v28, %v1276_v59  ;;  %v4703_v33 = vpop.permute.xlu0 %1601 }
 0x102   :  { %6348 = vst [vmem:[#allocation49_spill] sm:$0xff] %v4669_v36  ;;  %v1070_v58 = vmul.f32 %v4050_v2, %v4168_v53  ;;  %v4713_v63 = vmul.f32 %v4427_v20, %v4659_v21  ;;  %v1249_v18 = vmax.f32 %v1147_v45, 0.0  ;;  %v1685_v16 = vmul.f32 %v4249_v37, %v1277_v26  ;;  %v4717_v59 = vpop.permute.xlu2 %1641  ;;  %v3102_v53 = vld [vmem:[%s6135_s0 + $0x100] sm:$0xff]  ;;  %v793_v45 = vpop.f32.mrf.mxu1 }
 0x103   :  { %6350 = vst [vmem:[#allocation82_spill] sm:$0xff] %v4672_v11  ;;  %v1228_v19 = vadd.f32 %v4066_v57, %v1122_v14  ;;  %v2169_v28 = vadd.f32 %v2120_v24, %v4300_v13  ;;  %2954 = vmatmul.msk.f32.gmra.mxu0 %vm185_vm1, %v3102_v53  ;;  %v4725_v14 = vmul.f32 %v4462_v55, %v4659_v21  ;;  %v4733_v13 = vpop.permute.xlu1 %1606  ;;  %v1926_v24 = vrot.slane %v1858_v22, 1  ;;  %v6359_v45 = vld [vmem:[#allocation53_spill] sm:$0xff] }
 0x104   :  { %6351 = vst [vmem:[#allocation83_spill] sm:$0xff] %v4678_v43  ;;  %v4728_v11 = vsel %vm1916_vm2, %v2249_v1, %v2250_v9  ;;  %v2202_v37 = vmul.f32 %v4132_v0, %v4693_v23  ;;  %3018 = vmatmul.msk.f32.gmra.mxu2 %vm185_vm1, %v136_v27  ;;  %v1084_v53 = vmul.f32 %v4050_v2, %v4235_v32  ;;  %v1927_v9 = vrot.slane %v1859_v46, 1 }
 0x105   :  { %6352 = vst [vmem:[#allocation84_spill] sm:$0xff] %v4681_v17  ;;  %v1330_v26 = vmax.f32 %v1228_v19, 0.0  ;;  %v1042_v21 = vmul.f32 %v4050_v2, %v6358_v4  ;;  %3058 = vmatmul.msk.f32.gmra.mxu3 %vm185_vm1, %v4709_v61  ;;  %v4743_v1 = vmul.f32 %v4132_v0, %v1684_v44  ;;  %v4746_v19 = vadd.f32 %v4066_v57, %v1070_v58 }
 0x106   :  { %6353 = vst [vmem:[#allocation85_spill] sm:$0xff] %v4693_v23  ;;  %v4750_v23 = vmul.f32 %v6359_v45, %v1249_v18  ;;  %v4753_v32 = vmul.f32 %v4132_v0, %v1685_v16  ;;  %v4761_v36 = vmul.f32 %v4529_v29, %v6361_v49  ;;  %v2279_v58 = vrot.slane %v2202_v37, 1  ;;  %v3103_v18 = vld [vmem:[%s6135_s0 + $0x270] sm:$0xff] }
 0x107   :  { %6354 = vst [vmem:[#allocation86_spill] sm:$0xff] %v4713_v63  ;;  %v1738_v22 = vmul.f32 %v4360_v25, %v1330_v26  ;;  %v1846_v16 = vadd.f32 %v3103_v18, %v136_v27  ;;  %v4773_v49 = vmul.f32 %v4529_v29, %v1684_v44  ;;  %v2252_v17 = vrot.slane %v4743_v1, 1 }
 0x108   :  { %6355 = vst [vmem:[#allocation87_spill] sm:$0xff] %v4717_v59  ;;  %v1049_v59 = vmul.f32 %v4050_v2, %v687_v48  ;;  %v2394_v48 = vadd.f32 %v4385_v54, %v2169_v28  ;;  %v4757_v43 = vpop.f32.mrf.mxu2  ;;  %v969_v46 = vpop.f32.mrf.mxu3  ;;  %v73_v54 = vld [vmem:[%s6135_s0 + $0x108] sm:$0xff]  ;;  %v1190_v28 = vadd.f32 %v4066_v57, %v1084_v53  ;;  %v4788_v44 = vmul.f32 %v4430_v15, %v4750_v23 }
 0x109   :  { %6356 = vst [vmem:[#allocation88_spill] sm:$0xff] %v4728_v11  ;;  %v2203_v26 = vmul.f32 %v4132_v0, %v1738_v22  ;;  %v690_v11 = vpop.f32.mrf.mxu0  ;;  %v137_v22 = vld [vmem:[%s6135_s0 + $0x308] sm:$0xff]  ;;  %v2253_v53 = vrot.slane %v4753_v32, 1  ;;  %v4796_v1 = vpop.permute.xlu0 %1476 }
 0x10a   :  { %6357 = vst [vmem:[#allocation89_spill] sm:$0xff] %v4733_v13  ;;  %v1155_v4 = vadd.f32 %v4066_v57, %v1049_v59  ;;  %v1148_v59 = vadd.f32 %v4066_v57, %v1042_v21  ;;  %v2443_v37 = vadd.f32 %v3103_v18, %v2394_v48  ;;  %v177_v21 = vld [vmem:[%s6135_s0 + $0x448] sm:$0xff]  ;;  %v1050_v45 = vmul.f32 %v4050_v2, %v690_v11 }
 0x10b   :  { %6360 = vst [vmem:[#allocation58_spill] sm:$0xff] %v4750_v23  ;;  %v2280_v63 = vrot.slane %v2203_v26, 1  ;;  %2955 = vmatmul.msk.f32.gmra.mxu0 %vm185_vm1, %v73_v54  ;;  %v1123_v26 = vmul.f32 %v4050_v2, %v969_v46  ;;  %v1292_v32 = vmax.f32 %v1190_v28, 0.0  ;;  %v1085_v11 = vmul.f32 %v4050_v2, %v4288_v3  ;;  %v4817_v54 = vpop.permute.xlu2 %1521 }
 0x10c   :  { %6362 = vst [vmem:[#allocation55_spill] sm:$0xff] %v4761_v36  ;;  %v4779_v36 = vsel %vm1916_vm2, %v1926_v24, %v1927_v9  ;;  %v2492_v48 = vadd.f32 %v2443_v37, %v136_v27  ;;  %v1257_v18 = vmax.f32 %v1155_v4, 0.0  ;;  %v2072_v9 = vadd.f32 %v4409_v39, %v1846_v16  ;;  %3019 = vmatmul.msk.f32.gmra.mxu2 %vm185_vm1, %v137_v22  ;;  %v4819_v37 = vpop.permute.xlu1 %1481 }
 0x10d   :  { %6363 = vst [vmem:[#allocation90_spill] sm:$0xff] %v4773_v49  ;;  %v4793_v24 = vsel %vm1916_vm2, %v2279_v58, %v2280_v63  ;;  %v4801_v49 = vpop.f32.mrf.mxu1  ;;  %v4805_v27 = vmul.f32 %v4427_v20, %v4750_v23  ;;  %v1250_v4 = vmax.f32 %v1148_v59, 0.0  ;;  %3059 = vmatmul.msk.f32.gmra.mxu3 %vm185_vm1, %v177_v21  ;;  %v4811_v58 = vmul.f32 %v4462_v55, %v4750_v23 }
 0x10e   :  { %6364 = vst [vmem:[#allocation91_spill] sm:$0xff] %v4793_v24  ;;  %v2661_v63 = vadd.f32 %v2492_v48, %v4409_v39  ;;  %v1229_v46 = vadd.f32 %v4066_v57, %v1123_v26  ;;  %v1156_v16 = vadd.f32 %v4066_v57, %v1050_v45  ;;  %v1043_v39 = vmul.f32 %v4050_v2, %v4292_v30  ;;  %v3104_v45 = vld [vmem:[%s6135_s0 + $0x390] sm:$0xff] }
 0x10f   :  { %6365 = vst [vmem:[#allocation92_spill] sm:$0xff] %v4801_v49  ;;  %v4825_v22 = vmul.f32 %v4796_v1, %v1257_v18  ;;  %v2121_v48 = vadd.f32 %v3104_v45, %v2072_v9  ;;  %v1317_v23 = vmax.f32 %v4513_v42, 0.0  ;;  %v74_v30 = vld [vmem:[%s6135_s0 + $0x110] sm:$0xff]  ;;  %v4841_v18 = vld [vmem:[%s6139_s5 + $0x8] ss:$0 sm:$0xff] }
 0x110   :  { %6366 = vst [vmem:[#allocation93_spill] sm:$0xff] %v4805_v27  ;;  %v2677_v59 = vmul.f32 0.11111111, %v2661_v63  ;;  %v4827_v21 = vpop.f32.mrf.mxu2  ;;  %v972_v3 = vpop.f32.mrf.mxu3  ;;  %v1331_v26 = vmax.f32 %v1229_v46, 0.0  ;;  %v1258_v24 = vmax.f32 %v1156_v16, 0.0  ;;  %v6372_v63 = vld [vmem:[#allocation4_spill] sm:$0xff] }
 0x111   :  { %6367 = vst [vmem:[#allocation94_spill] sm:$0xff] %v4811_v58  ;;  %v4833_v28 = vpop.f32.mrf.mxu0  ;;  %v1700_v49 = vmul.f32 %v6372_v63, %v1292_v32  ;;  %v6373_v27 = vld [vmem:[#allocation54_spill] sm:$0xff]  ;;  %v6375_v9 = vld [vmem:[#allocation56_spill] sm:$0xff]  ;;  %v1124_v46 = vmul.f32 %v4050_v2, %v972_v3  ;;  %v1191_v32 = vadd.f32 %v4066_v57, %v1085_v11  ;;  %v4864_v45 = vmul.f32 %v4817_v54, %v1317_v23 }
 0x112   :  { %6368 = vst [vmem:[#allocation95_spill] sm:$0xff] %v4817_v54  ;;  %v4845_v58 = vmul.f32 %v6373_v27, %v1250_v4  ;;  %v1071_v42 = vmul.f32 %v4050_v2, %v6375_v9  ;;  %v4857_v16 = vld [vmem:[%s6135_s0 + $0x310] sm:$0xff]  ;;  %v4861_v4 = vmul.f32 %v4518_v47, %v1331_v26  ;;  %v1666_v9 = vmul.f32 %v4819_v37, %v1258_v24 }
 0x113   :  { %6369 = vst [vmem:[#allocation96_spill] sm:$0xff] %v4819_v37  ;;  %v1149_v3 = vadd.f32 %v4066_v57, %v1043_v39  ;;  %v4874_v63 = vsel %vm1916_vm2, %v2252_v17, %v2253_v53  ;;  %v2513_v11 = vmul.f32 %v4841_v18, %v4825_v22  ;;  %v1230_v26 = vadd.f32 %v4066_v57, %v1124_v46 }
 0x114   :  { %6370 = vst [vmem:[#allocation97_spill] sm:$0xff] %v4825_v22  ;;  %2956 = vmatmul.msk.f32.gmra.mxu0 %vm185_vm1, %v74_v30  ;;  %v1086_v23 = vmul.f32 %v4050_v2, %v4322_v12  ;;  %v1044_v24 = vmul.f32 %v4050_v2, %v4325_v31  ;;  %v2170_v17 = vadd.f32 %v2121_v48, %v4403_v40  ;;  %v6380_v46 = vmax.f32 %v4746_v19, 0.0 }
 0x115   :  { %6371 = vst [vmem:[#allocation98_spill] sm:$0xff] %v4833_v28  ;;  %v4886_v28 = vmul.f32 %v4050_v2, %v4262_v38  ;;  %3020 = vmatmul.msk.f32.gmra.mxu2 %vm185_vm1, %v4857_v16  ;;  %v798_v53 = vpop.f32.mrf.mxu1  ;;  %v4892_v39 = vmul.f32 %v4427_v20, %v1700_v49  ;;  %v4898_v22 = vadd.f32 %v4066_v57, %v1071_v42  ;;  %v1293_v38 = vmax.f32 %v1191_v32, 0.0 }
 0x116   :  { %6374 = vst [vmem:[#allocation54_spill] sm:$0xff] %v4845_v58  ;;  %v1686_v12 = vmul.f32 %v4346_v34, %v6380_v46  ;;  %v2514_v31 = vmul.f32 %v4841_v18, %v1666_v9  ;;  %v1861_v2 = vmul.f32 %v4430_v15, %v4845_v58  ;;  %v2204_v40 = vmul.f32 %v4132_v0, %v4861_v4  ;;  %v6381_v34 = vld [vmem:[#allocation2_spill] sm:$0xff] }
 0x117   :  { %2693 = vst.msk [vmem:[%s6140_s11 + $0x50] sm:$0xff] %vm185_vm1, %v2677_v59  ;;  %v4870_v59 = vld [vmem:[%s6135_s0 + $0x450] sm:$0xff]  ;;  %v1332_v48 = vmax.f32 %v1230_v26, 0.0  ;;  %v1251_v53 = vmax.f32 %v1149_v3, 0.0  ;;  %v2584_v19 = vrot.slane %v2513_v11, 1  ;;  %v2489_v46 = vadd.f32 %v6381_v34, %v74_v30  ;;  %v4918_v26 = vpop.permute.xlu2 %1646  ;;  %v75_v30 = vld [vmem:[%s6135_s0 + $0x118] sm:$0xff] }
 0x118   :  { %6376 = vst [vmem:[#allocation56_spill] sm:$0xff] %v4861_v4  ;;  %3060 = vmatmul.msk.f32.gmra.mxu3 %vm185_vm1, %v4870_v59  ;;  %v2585_v54 = vrot.slane %v2514_v31, 1  ;;  %v4908_v57 = vpop.f32.mrf.mxu2  ;;  %v975_v42 = vpop.f32.mrf.mxu3  ;;  %v4913_v9 = vld [vmem:[%s6138_s4] ss:$0 sm:$0xff]  ;;  %v2395_v3 = vadd.f32 %v4388_v60, %v2170_v17  ;;  %v4925_v31 = vmul.f32 %v4430_v15, %v1700_v49  ;;  %v139_v60 = vld [vmem:[%s6135_s0 + $0x318] sm:$0xff]  ;;  %v4940_v17 = vmul.f32 %v4529_v29, %v4284_v6 }
 0x119   :  { %6377 = vst [vmem:[#allocation99_spill] sm:$0xff] %v4864_v45  ;;  %v1192_v58 = vadd.f32 %v4913_v9, %v1086_v23  ;;  %v1150_v32 = vadd.f32 %v4913_v9, %v1044_v24  ;;  %v1740_v4 = vmul.f32 %v4541_v7, %v1332_v48  ;;  %v696_v11 = vpop.f32.mrf.mxu0  ;;  %v6385_v23 = vld [vmem:[#allocation3_spill] sm:$0xff]  ;;  %v3106_v24 = vld [vmem:[%s6135_s0 + $0x280] sm:$0xff]  ;;  %v1930_v49 = vrot.slane %v1861_v2, 1 }
 0x11a   :  { %6378 = vst [vmem:[#allocation100_spill] sm:$0xff] %v4874_v63  ;;  %v4928_v34 = vsel %vm1916_vm2, %v2584_v19, %v2585_v54  ;;  %v1847_v48 = vadd.f32 %v3106_v24, %v4857_v16  ;;  %v2282_v11 = vrot.slane %v2204_v40, 1  ;;  %v179_v19 = vld [vmem:[%s6135_s0 + $0x458] sm:$0xff]  ;;  %v2444_v63 = vadd.f32 %v3106_v24, %v2395_v3 }
 0x11b   :  { %6379 = vst [vmem:[#allocation101_spill] sm:$0xff] %v4892_v39  ;;  %v2205_v54 = vmul.f32 %v4132_v0, %v1740_v4  ;;  %v6389_v39 = vld [vmem:[#allocation61_spill] sm:$0xff]  ;;  %v1294_v2 = vmax.f32 %v1192_v58, 0.0  ;;  %v1252_v40 = vmax.f32 %v1150_v32, 0.0  ;;  %v4967_v58 = vld [vmem:[%s6137_s3] ss:$0 sm:$0xff] }
 0x11c   :  { %6382 = vst [vmem:[#allocation2_spill] sm:$0xff] %v4908_v57  ;;  %v2658_v57 = vadd.f32 %v6385_v23, %v2489_v46  ;;  %v6387_v46 = vld [vmem:[#allocation9_spill] sm:$0xff]  ;;  %2957 = vmatmul.msk.f32.gmra.mxu0 %vm185_vm1, %v75_v30  ;;  %v4952_v6 = vmul.f32 %v6389_v39, %v1251_v53  ;;  %v1125_v53 = vmul.f32 %v4967_v58, %v975_v42  ;;  %v6391_v32 = vrot.slane %v4788_v44, 1 }
 0x11d   :  { %6383 = vst [vmem:[#allocation102_spill] sm:$0xff] %v4918_v26  ;;  %v1701_v23 = vmul.f32 %v6387_v46, %v1293_v38  ;;  %3021 = vmatmul.msk.f32.gmra.mxu2 %vm185_vm1, %v139_v60  ;;  %v4955_v4 = vpop.f32.mrf.mxu1  ;;  %v2073_v38 = vadd.f32 %v4443_v62, %v1847_v48  ;;  %v1279_v30 = vmax.f32 %v4898_v22, 0.0  ;;  %v1216_v60 = vadd.f32 %v4913_v9, %v4556_v35  ;;  %v6394_v22 = vld [vmem:[#allocation17_spill] sm:$0xff]  ;;  %v3108_v35 = vld [vmem:[%s6135_s0 + $0x3a0] sm:$0xff] }
 0x11e   :  { %6384 = vst [vmem:[#allocation103_spill] sm:$0xff] %v4928_v34  ;;  %v4948_v34 = vmul.f32 %v4529_v29, %v1686_v12  ;;  %v2674_v26 = vmul.f32 0.11111111, %v2658_v57  ;;  %v2493_v57 = vadd.f32 %v2444_v63, %v4857_v16  ;;  %v4974_v3 = vsel %vm1916_vm2, %v6391_v32, %v1930_v49  ;;  %v6396_v49 = vld [vmem:[#allocation63_spill] sm:$0xff]  ;;  %v6410_v46 = vld [vmem:[#allocation73_spill] sm:$0xff] }
 0x11f   :  { %6386 = vst [vmem:[#allocation3_spill] sm:$0xff] %v4940_v17  ;;  %v2283_v17 = vrot.slane %v2205_v54, 1  ;;  %v4984_v16 = vmul.f32 %v4430_v15, %v1701_v23  ;;  %v1231_v24 = vadd.f32 %v4913_v9, %v1125_v53  ;;  %v5003_v54 = vpop.permute.xlu2 %1526  ;;  %v2122_v23 = vadd.f32 %v3108_v35, %v2073_v38  ;;  %v180_v38 = vld [vmem:[%s6135_s0 + $0x460] sm:$0xff] }
 0x120   :  { %6388 = vst [vmem:[#allocation104_spill] sm:$0xff] %v4948_v34  ;;  %3061 = vmatmul.msk.f32.gmra.mxu3 %vm185_vm1, %v179_v19  ;;  %v2662_v42 = vadd.f32 %v2493_v57, %v4443_v62  ;;  %v4988_v48 = vpop.f32.mrf.mxu2  ;;  %v978_v44 = vpop.f32.mrf.mxu3  ;;  %v1318_v32 = vmax.f32 %v1216_v60, 0.0  ;;  %v6408_v34 = vld [vmem:[#allocation70_spill] sm:$0xff] }
 0x121   :  { %6390 = vst [vmem:[#allocation105_spill] sm:$0xff] %v4952_v6  ;;  %v4981_v63 = vsel %vm1916_vm2, %v2282_v11, %v2283_v17  ;;  %v4997_v17 = vmul.f32 %v6394_v22, %v1294_v2  ;;  %v5000_v11 = vmul.f32 %v6396_v49, %v1252_v40  ;;  %v1126_v62 = vmul.f32 %v4967_v58, %v978_v44  ;;  %v5005_v19 = vpop.f32.mrf.mxu0  ;;  %v5013_v2 = vld [vmem:[%s6135_s0 + $0x320] sm:$0xff]  ;;  %v6401_v44 = vld [vmem:[#allocation68_spill] sm:$0xff] }
 0x122   :  { %2690 = vst.msk [vmem:[%s6140_s11 + $0x38] sm:$0xff] %vm185_vm1, %v2674_v26  ;;  %v4977_v26 = vmul.f32 %v4132_v0, %v1686_v12  ;;  %v4994_v12 = vmul.f32 %v4430_v15, %v4952_v6  ;;  %v2678_v57 = vmul.f32 0.11111111, %v2662_v42  ;;  %v1333_v53 = vmax.f32 %v1231_v24, 0.0 }
 0x123   :  { %6392 = vst [vmem:[#allocation106_spill] sm:$0xff] %v4981_v63  ;;  %v5017_v40 = vmul.f32 %v4427_v20, %v4952_v6  ;;  %v1087_v37 = vmul.f32 %v4967_v58, %v6401_v44  ;;  %v1687_v63 = vmul.f32 %v4360_v25, %v1279_v30  ;;  %v1178_v24 = vadd.f32 %v4913_v9, %v4886_v28  ;;  %v3109_v30 = vld [vmem:[%s6135_s0 + $0x120] sm:$0xff] }
 0x124   :  { %6393 = vst [vmem:[#allocation107_spill] sm:$0xff] %v4988_v48  ;;  %v5034_v60 = vmul.f32 %v4703_v33, %v1333_v53  ;;  %v5037_v25 = vmul.f32 %v5003_v54, %v1318_v32  ;;  %2958 = vmatmul.msk.f32.gmra.mxu0 %vm185_vm1, %v3109_v30  ;;  %v5045_v28 = vmul.f32 %v4462_v55, %v4952_v6  ;;  %v1932_v44 = vrot.slane %v4994_v12, 1  ;;  %v6406_v12 = vld [vmem:[#allocation62_spill] sm:$0xff]  ;;  %v6409_v48 = vld [vmem:[#allocation48_spill] sm:$0xff] }
 0x125   :  { %6395 = vst [vmem:[#allocation108_spill] sm:$0xff] %v4997_v17  ;;  %v1863_v35 = vmul.f32 %v4430_v15, %v5000_v11  ;;  %3022 = vmatmul.msk.f32.gmra.mxu2 %vm185_vm1, %v5013_v2  ;;  %v803_v53 = vpop.f32.mrf.mxu1  ;;  %v5059_v30 = vmul.f32 %v4841_v18, %v4997_v17  ;;  %v2171_v42 = vadd.f32 %v2122_v23, %v4552_v52  ;;  %v1280_v32 = vmax.f32 %v1178_v24, 0.0  ;;  %v5075_v52 = vld [vmem:[%s6139_s5] sm:$0xff] }
 0x126   :  { %6397 = vst [vmem:[#allocation109_spill] sm:$0xff] %v5000_v11  ;;  %v1193_v6 = vadd.f32 %v4913_v9, %v1087_v37  ;;  %v6404_v11 = vld [vmem:[#allocation69_spill] sm:$0xff]  ;;  %v1073_v22 = vmul.f32 %v4967_v58, %v6406_v12  ;;  %v5078_v23 = vperm.slane %v5075_v52, 4  ;;  %v3111_v37 = vld [vmem:[%s6135_s0 + $0x290] sm:$0xff] }
 0x127   :  { %6398 = vst [vmem:[#allocation110_spill] sm:$0xff] %v5003_v54  ;;  %v1933_v54 = vrot.slane %v1863_v35, 1  ;;  %v1688_v49 = vmul.f32 %v4518_v47, %v1280_v32  ;;  %v6413_v47 = vld [vmem:[#allocation7_spill] sm:$0xff] }
 0x128   :  { %6399 = vst [vmem:[#allocation111_spill] sm:$0xff] %v5005_v19  ;;  %v1232_v19 = vadd.f32 %v4913_v9, %v1126_v62  ;;  %v5049_v62 = vmul.f32 %v4430_v15, %v4997_v17  ;;  %3062 = vmatmul.msk.f32.gmra.mxu3 %vm185_vm1, %v180_v38  ;;  %v981_v24 = vpop.f32.mrf.mxu3  ;;  %v1295_v17 = vmax.f32 %v1193_v6, 0.0  ;;  %v6414_v32 = vrot.slane %v6413_v47, 1 }
 0x129   :  { %6400 = vst [vmem:[#allocation112_spill] sm:$0xff] %v5017_v40  ;;  %v2396_v40 = vadd.f32 %v6408_v34, %v2171_v42  ;;  %v141_v24 = vld [vmem:[%s6135_s0 + $0x328] sm:$0xff]  ;;  %v3112_v34 = vld [vmem:[%s6135_s0 + $0x3b0] sm:$0xff]  ;;  %v5110_v6 = vsel %vm1916_vm2, %v1932_v44, %v1933_v54  ;;  %v6415_v44 = vld [vmem:[#allocation10_spill] sm:$0xff] }
 0x12a   :  { %2694 = vst.msk [vmem:[%s6140_s11 + $0x58] sm:$0xff] %vm185_vm1, %v2678_v57  ;;  %v1334_v57 = vmax.f32 %v1232_v19, 0.0  ;;  %v1045_v19 = vmul.f32 %v4967_v58, %v6404_v11  ;;  %v5084_v11 = vpop.f32.mrf.mxu2 }
 0x12b   :  { %6402 = vst [vmem:[#allocation68_spill] sm:$0xff] %v5037_v25  ;;  %v2187_v25 = vmul.f32 %v4132_v0, %v1687_v63  ;;  %v1848_v63 = vadd.f32 %v3111_v37, %v5013_v2 }
 0x12c   :  { %6403 = vst [vmem:[#allocation113_spill] sm:$0xff] %v5045_v28  ;;  %v5068_v53 = vmul.f32 %v4733_v13, %v1334_v57  ;;  %v77_v57 = vld [vmem:[%s6135_s0 + $0x128] sm:$0xff]  ;;  %v701_v13 = vpop.f32.mrf.mxu0  ;;  %v5099_v12 = vadd.f32 %v4913_v9, %v1045_v19  ;;  %v6412_v19 = vld [vmem:[#allocation34_spill] sm:$0xff] }
 0x12d   :  { %6407 = vst [vmem:[#allocation62_spill] sm:$0xff] %v5084_v11  ;;  %v2074_v39 = vadd.f32 %v4489_v10, %v1848_v63  ;;  %v2174_v11 = vadd.f32 %v6409_v48, %v180_v38  ;;  %v2256_v35 = vrot.slane %v2187_v25, 1  ;;  %v1088_v13 = vmul.f32 %v4967_v58, %v6410_v46  ;;  %v6411_v38 = vld [vmem:[#allocation8_spill] sm:$0xff]  ;;  %2959 = vmatmul.msk.f32.gmra.mxu0 %vm185_vm1, %v77_v57 }
 0x12e   :  { %6405 = vst [vmem:[#allocation69_spill] sm:$0xff] %v5068_v53  ;;  %v2321_v53 = vrot.slane %v77_v57, 1  ;;  %v2445_v48 = vadd.f32 %v3111_v37, %v2396_v40  ;;  %v5113_v25 = vadd.f32 %v4913_v9, %v1073_v22  ;;  %v1089_v46 = vmul.f32 %v4967_v58, %v6412_v19  ;;  %3023 = vmatmul.msk.f32.gmra.mxu2 %vm185_vm1, %v141_v24  ;;  %v3113_v22 = vld [vmem:[%s6135_s0 + $0x2c0] sm:$0xff]  ;;  %v142_v57 = vld [vmem:[%s6135_s0 + $0x330] sm:$0xff] }
 0x12f   :  { %v2123_v42 = vadd.f32 %v3112_v34, %v2074_v39  ;;  %v2399_v63 = vadd.f32 %v6411_v38, %v2174_v11  ;;  %v5121_v39 = vpop.f32.mrf.mxu1  ;;  %v6417_v24 = vrot.slane %v4977_v26, 1  ;;  %v3116_v26 = vld [vmem:[%s6135_s0 + $0x10] sm:$0xff] }
 0x130   :  { %v2322_v28 = vsel %vm1916_vm2, %v6414_v32, %v2321_v53  ;;  %v2494_v37 = vadd.f32 %v2445_v48, %v5013_v2  ;;  %v6416_v53 = vld [vmem:[#allocation19_spill] sm:$0xff]  ;;  %v3114_v2 = vld [vmem:[%s6135_s0 + $0x2a0] sm:$0xff]  ;;  %v3115_v48 = vld [vmem:[%s6135_s0 + $0x350] sm:$0xff]  ;;  %v1253_v32 = vmax.f32 %v5099_v12, 0.0 }
 0x131   :  { %v2172_v40 = vadd.f32 %v2123_v42, %v4709_v61  ;;  %v2448_v54 = vadd.f32 %v3113_v22, %v2399_v63  ;;  %v2384_v11 = vadd.f32 %v2322_v28, %v6415_v44  ;;  %v1703_v34 = vmul.f32 %v6416_v53, %v1295_v17  ;;  %v6419_v19 = vld [vmem:[#allocation72_spill] sm:$0xff]  ;;  %v6420_v12 = vld [vmem:[#allocation14_spill] sm:$0xff] }
 0x132   :  { %v5136_v38 = vsel %vm1916_vm2, %v6417_v24, %v2256_v35  ;;  %v1194_v61 = vadd.f32 %v4913_v9, %v1088_v13  ;;  %v1849_v42 = vadd.f32 %v3114_v2, %v142_v57  ;;  %v2663_v28 = vadd.f32 %v2494_v37, %v4489_v10  ;;  %v5149_v35 = vpop.f32.mrf.mxu2  ;;  %v983_v13 = vpop.f32.mrf.mxu3  ;;  %v6430_v53 = vld [vmem:[#allocation26_spill] sm:$0xff] }
 0x133   :  { %6418 = vst [vmem:[#allocation70_spill] sm:$0xff] %v5136_v38  ;;  %v2497_v63 = vadd.f32 %v3115_v48, %v2448_v54  ;;  %v2433_v17 = vadd.f32 %v3116_v26, %v2384_v11  ;;  %v2397_v47 = vadd.f32 %v6419_v19, %v2172_v40  ;;  %v1195_v22 = vadd.f32 %v4913_v9, %v1089_v46  ;;  %v3117_v11 = vld [vmem:[%s6135_s0 + $0xa0] sm:$0xff] }
 0x134   :  { %v703_v10 = vpop.f32.mrf.mxu0  ;;  %v2075_v37 = vadd.f32 %v4562_v56, %v1849_v42  ;;  %v1078_v54 = vmul.f32 %v4967_v58, %v4955_v4  ;;  %v2679_v44 = vmul.f32 0.11111111, %v2663_v28  ;;  %v1296_v26 = vmax.f32 %v1194_v61, 0.0  ;;  %v3118_v4 = vld [vmem:[%s6135_s0 + $0x3c0] sm:$0xff]  ;;  %v6422_v28 = vld [vmem:[#allocation20_spill] sm:$0xff] }
 0x135   :  { %v2666_v24 = vadd.f32 %v4690_v5, %v2497_v63  ;;  %v2482_v48 = vadd.f32 %v3117_v11, %v2433_v17  ;;  %v1053_v40 = vmul.f32 %v4967_v58, %v703_v10  ;;  %v1046_v46 = vmul.f32 %v4967_v58, %v6420_v12  ;;  %v3119_v17 = vld [vmem:[%s6135_s0 + $0x130] sm:$0xff]  ;;  %v79_v10 = vld [vmem:[%s6135_s0 + $0x138] sm:$0xff] }
 0x136   :  { %v5165_v13 = vmul.f32 %v4529_v29, %v1688_v49  ;;  %v2124_v42 = vadd.f32 %v3118_v4, %v2075_v37  ;;  %2695 = vst.msk [vmem:[%s6140_s11 + $0x60] sm:$0xff] %vm185_vm1, %v2679_v44  ;;  %2960 = vmatmul.msk.f32.gmra.mxu0 %vm185_vm1, %v3119_v17  ;;  %v2446_v19 = vadd.f32 %v3114_v2, %v2397_v47  ;;  %v1297_v44 = vmax.f32 %v1195_v22, 0.0  ;;  %v6423_v22 = vld [vmem:[#allocation31_spill] sm:$0xff] }
 0x137   :  { %v2682_v5 = vmul.f32 0.11111111, %v2666_v24  ;;  %v2651_v63 = vadd.f32 %v2482_v48, %v6422_v28  ;;  %v1159_v61 = vadd.f32 %v4913_v9, %v1053_v40  ;;  %v5184_v37 = vmul.f32 %v4132_v0, %v1688_v49  ;;  %3024 = vmatmul.msk.f32.gmra.mxu2 %vm185_vm1, %v142_v57  ;;  %v808_v48 = vpop.f32.mrf.mxu1 }
 0x138   :  { %6421 = vst [vmem:[#allocation48_spill] sm:$0xff] %v5165_v13  ;;  %v2173_v24 = vadd.f32 %v2124_v42, %v4870_v59  ;;  %v2324_v11 = vrot.slane %v79_v10, 1  ;;  %v2495_v40 = vadd.f32 %v2446_v19, %v142_v57  ;;  %v1184_v12 = vadd.f32 %v4913_v9, %v1078_v54  ;;  %v6425_v42 = vld [vmem:[#allocation37_spill] sm:$0xff]  ;;  %v6426_v57 = vld [vmem:[#allocation40_spill] sm:$0xff] }
 0x139   :  { %2698 = vst.msk [vmem:[%s6140_s11 + $0x78] sm:$0xff] %vm185_vm1, %v2682_v5  ;;  %v2667_v2 = vmul.f32 0.11111111, %v2651_v63  ;;  %v1261_v47 = vmax.f32 %v1159_v61, 0.0  ;;  %v5194_v49 = vmul.f32 %v4430_v15, %v1703_v34  ;;  %v5197_v4 = vmul.f32 %v6423_v22, %v1296_v26  ;;  %v6428_v19 = vld [vmem:[#allocation33_spill] sm:$0xff]  ;;  %v3120_v48 = vld [vmem:[%s6135_s0 + $0x2b0] sm:$0xff] }
 0x13a   :  { %v1152_v59 = vadd.f32 %v4913_v9, %v1046_v46  ;;  %v2398_v28 = vadd.f32 %v6425_v42, %v2173_v24  ;;  %v5202_v17 = vperm.slane %v5075_v52, 1  ;;  %v2664_v5 = vadd.f32 %v2495_v40, %v4562_v56  ;;  %v876_v26 = vpop.f32.mrf.mxu2  ;;  %v5212_v61 = vpop.f32.mrf.mxu3 }
 0x13b   :  { %6424 = vst [vmem:[#allocation73_spill] sm:$0xff] %v5197_v4  ;;  %v5209_v54 = vmul.f32 %v6426_v57, %v1261_v47  ;;  %v1286_v63 = vmax.f32 %v1184_v12, 0.0  ;;  %v5215_v46 = vmul.f32 %v4841_v18, %v1703_v34  ;;  %v1705_v24 = vmul.f32 %v6428_v19, %v1297_v44  ;;  %v6429_v12 = vld [vmem:[#allocation50_spill] sm:$0xff]  ;;  %v6432_v57 = vld [vmem:[#allocation12_spill] sm:$0xff] }
 0x13c   :  { %2683 = vst.msk [vmem:[%s6140_s11] sm:$0xff] %vm185_vm1, %v2667_v2  ;;  %v2447_v22 = vadd.f32 %v3120_v48, %v2398_v28  ;;  %v1098_v2 = vmul.f32 %v4967_v58, %v876_v26  ;;  %v706_v47 = vpop.f32.mrf.mxu0  ;;  %v2680_v40 = vmul.f32 0.11111111, %v2664_v5  ;;  %v6431_v13 = vrot.slane %v6430_v53, 1  ;;  %v3121_v28 = vld [vmem:[%s6135_s0 + $0x340] sm:$0xff] }
 0x13d   :  { %6427 = vst [vmem:[#allocation8_spill] sm:$0xff] %v5209_v54  ;;  %v1805_v56 = vmul.f32 %v5202_v17, %v5209_v54  ;;  %v1694_v42 = vmul.f32 %v6429_v12, %v1286_v63  ;;  %v5229_v44 = vmul.f32 %v6432_v57, %v1253_v32  ;;  %v5238_v5 = vmul.f32 %v4430_v15, %v5197_v4  ;;  %v6433_v32 = vld [vmem:[#allocation75_spill] sm:$0xff] }
 0x13e   :  { %v2325_v34 = vsel %vm1916_vm2, %v6431_v13, %v2324_v11  ;;  %v2496_v26 = vadd.f32 %v3121_v28, %v2447_v22  ;;  %v1204_v48 = vadd.f32 %v4913_v9, %v1098_v2  ;;  %v5242_v53 = vmul.f32 %v4841_v18, %v5197_v4  ;;  %2696 = vst.msk [vmem:[%s6140_s11 + $0x68] sm:$0xff] %vm185_vm1, %v2680_v40  ;;  %v6434_v22 = vld [vmem:[#allocation46_spill] sm:$0xff]  ;;  %v6435_v28 = vld [vmem:[#allocation27_spill] sm:$0xff] }
 0x13f   :  { %v1254_v13 = vmax.f32 %v1152_v59, 0.0  ;;  %v1821_v11 = vadd.f32 %v1805_v56, %v6433_v32  ;;  %2961 = vmatmul.msk.f32.gmra.mxu0 %vm185_vm1, %v79_v10  ;;  %v1873_v63 = vmul.f32 %v4430_v15, %v1705_v24  ;;  %v2385_v19 = vadd.f32 %v2325_v34, %v6435_v28 }
 0x140   :  { %v2665_v2 = vadd.f32 %v2496_v26, %v6434_v22  ;;  %v1306_v47 = vmax.f32 %v1204_v48, 0.0  ;;  %v2129_v59 = vmul.f32 %v5078_v23, %v1694_v42  ;;  %v1079_v56 = vmul.f32 %v4967_v58, %v5121_v39 }
 0x141   :  { %v1983_v54 = vadd.f32 %v4685_v51, %v1821_v11  ;;  %v6436_v32 = vrot.slane %v4984_v16, 1  ;;  %v6437_v40 = vrot.slane %v4925_v31, 1  ;;  %v1092_v26 = vmul.f32 %v4967_v58, %v4757_v43  ;;  %v3122_v51 = vld [vmem:[%s6135_s0 + $0x20] sm:$0xff]  ;;  %v6439_v11 = vld [vmem:[#allocation29_spill] sm:$0xff] }
 0x142   :  { %v2681_v48 = vmul.f32 0.11111111, %v2665_v2  ;;  %v5267_v34 = vmul.f32 %v4619_v8, %v1306_v47  ;;  %v2434_v42 = vadd.f32 %v3122_v51, %v2385_v19  ;;  %v1945_v39 = vrot.slane %v5194_v49, 1  ;;  %v879_v28 = vpop.f32.mrf.mxu2  ;;  %v6440_v47 = vld [vmem:[#allocation23_spill] sm:$0xff] }
 0x143   :  { %v5262_v10 = vsel %vm1916_vm2, %v6437_v40, %v6436_v32  ;;  %v2588_v16 = vrot.slane %v5215_v46, 1  ;;  %v2518_v31 = vmul.f32 %v4841_v18, %v1705_v24  ;;  %v2096_v22 = vadd.f32 %v6439_v11, %v1983_v54  ;;  %v988_v32 = vpop.f32.mrf.mxu3  ;;  %v3123_v24 = vld [vmem:[%s6135_s0 + $0xb0] sm:$0xff] }
 0x144   :  { %6438 = vst [vmem:[#allocation34_spill] sm:$0xff] %v5267_v34  ;;  %v5278_v43 = vmul.f32 %v4430_v15, %v5229_v44  ;;  %v5282_v2 = vmul.f32 %v4841_v18, %v5229_v44  ;;  %v1947_v19 = vrot.slane %v5238_v5, 1  ;;  %v5286_v49 = vmul.f32 %v6440_v47, %v1254_v13  ;;  %v708_v54 = vpop.f32.mrf.mxu0 }
 0x145   :  { %2697 = vst.msk [vmem:[%s6140_s11 + $0x70] sm:$0xff] %vm185_vm1, %v2681_v48  ;;  %v2145_v46 = vadd.f32 %v2129_v59, %v2096_v22  ;;  %v2483_v40 = vadd.f32 %v3123_v24, %v2434_v42  ;;  %v1099_v51 = vmul.f32 %v4967_v58, %v879_v28  ;;  %v1185_v11 = vadd.f32 %v4913_v9, %v1079_v56  ;;  %v6441_v48 = vld [vmem:[#allocation36_spill] sm:$0xff] }
 0x146   :  { %v2590_v5 = vrot.slane %v5242_v53, 1  ;;  %v1948_v13 = vrot.slane %v1873_v63, 1  ;;  %v1198_v32 = vadd.f32 %v4913_v9, %v1092_v26  ;;  %v1054_v12 = vmul.f32 %v4967_v58, %v708_v54 }
 0x147   :  { %v2591_v47 = vrot.slane %v2518_v31, 1  ;;  %v1093_v59 = vmul.f32 %v4967_v58, %v4827_v21  ;;  %v2652_v22 = vadd.f32 %v2483_v40, %v6441_v48  ;;  %v1205_v4 = vadd.f32 %v4913_v9, %v1099_v51  ;;  %v6443_v40 = vld [vmem:[#allocation74_spill] sm:$0xff] }
 0x148   :  { %v1882_v42 = vmul.f32 %v4430_v15, %v5267_v34  ;;  %v2527_v56 = vmul.f32 %v4841_v18, %v5267_v34  ;;  %v1160_v53 = vadd.f32 %v4913_v9, %v1054_v12  ;;  %v6442_v63 = vrot.slane %v5049_v62, 1 }
 0x149   :  { %v5315_v31 = vperm.slane %v5075_v52, 7  ;;  %v2668_v21 = vmul.f32 0.11111111, %v2652_v22  ;;  %v1307_v28 = vmax.f32 %v1205_v4, 0.0  ;;  %v1287_v54 = vmax.f32 %v1185_v11, 0.0 }
 0x14a   :  { %v5312_v26 = vsel %vm1916_vm2, %v6442_v63, %v1945_v39  ;;  %v1300_v24 = vmax.f32 %v1198_v32, 0.0  ;;  %v2306_v51 = vadd.f32 %v6443_v40, %v2145_v46  ;;  %v1262_v48 = vmax.f32 %v1160_v53, 0.0  ;;  %v882_v4 = vpop.f32.mrf.mxu2  ;;  %v6446_v46 = vld [vmem:[#allocation51_spill] sm:$0xff]  ;;  %v6447_v63 = vld [vmem:[#allocation57_spill] sm:$0xff] }
 0x14b   :  { %v6444_v57 = vrot.slane %v5059_v30, 1  ;;  %v1199_v62 = vadd.f32 %v4913_v9, %v1093_v59  ;;  %v1769_v12 = vmul.f32 %v4427_v20, %v5267_v34  ;;  %2684 = vst.msk [vmem:[%s6140_s11 + $0x8] sm:$0xff] %vm185_vm1, %v2668_v21  ;;  %v1715_v52 = vmul.f32 %v4640_v41, %v1307_v28  ;;  %v5331_v39 = vpop.f32.mrf.mxu3  ;;  %v810_v28 = vpop.f32.mrf.mxu1  ;;  %v6450_v34 = vld [vmem:[#allocation86_spill] sm:$0xff] }
 0x14c   :  { %v5334_v30 = vsel %vm1916_vm2, %v1947_v19, %v1948_v13  ;;  %v1670_v11 = vmul.f32 %v6446_v46, %v1262_v48  ;;  %v1100_v32 = vmul.f32 %v4967_v58, %v882_v4  ;;  %v711_v59 = vpop.f32.mrf.mxu0  ;;  %v1695_v21 = vmul.f32 %v6447_v63, %v1287_v54  ;;  %v6449_v48 = vld [vmem:[#allocation38_spill] sm:$0xff] }
 0x14d   :  { %v5321_v38 = vsel %vm1916_vm2, %v6444_v57, %v2588_v16  ;;  %6445 = vst [vmem:[#allocation7_spill] sm:$0xff] %v5334_v30  ;;  %v1962_v57 = vrot.slane %v1882_v42, 1  ;;  %v2605_v16 = vrot.slane %v2527_v56, 1  ;;  %v1883_v22 = vmul.f32 %v4430_v15, %v1715_v52 }
 0x14e   :  { %v2528_v53 = vmul.f32 %v4841_v18, %v1715_v52  ;;  %v5342_v40 = vsel %vm1916_vm2, %v2590_v5, %v2591_v47  ;;  %v1806_v19 = vmul.f32 %v5202_v17, %v1670_v11  ;;  %v2419_v13 = vadd.f32 %v4725_v14, %v2306_v51  ;;  %v6452_v14 = vld [vmem:[#allocation53_spill] sm:$0xff] }
 0x14f   :  { %6448 = vst [vmem:[#allocation10_spill] sm:$0xff] %v5342_v40  ;;  %v2452_v42 = vmul.f32 %v5315_v31, %v1670_v11  ;;  %v1206_v56 = vadd.f32 %v4913_v9, %v1100_v32  ;;  %v1047_v4 = vmul.f32 %v4967_v58, %v6449_v48  ;;  %v1818_v52 = vmul.f32 %v5202_v17, %v4864_v45 }
 0x150   :  { %v1963_v59 = vrot.slane %v1883_v22, 1  ;;  %v2606_v54 = vrot.slane %v2528_v53, 1  ;;  %v1822_v63 = vadd.f32 %v1806_v19, %v6450_v34  ;;  %v1080_v46 = vmul.f32 %v4967_v58, %v810_v28 }
 0x151   :  { %v5353_v47 = vadd.f32 %v2452_v42, %v2419_v13  ;;  %v1308_v5 = vmax.f32 %v1206_v56, 0.0  ;;  %v5357_v51 = vmul.f32 %v6452_v14, %v1300_v24  ;;  %v1834_v48 = vadd.f32 %v1818_v52, %v1769_v12  ;;  %v6459_v56 = vld [vmem:[#allocation15_spill] sm:$0xff] }
 0x152   :  { %v1964_v11 = vsel %vm1916_vm2, %v1962_v57, %v1963_v59  ;;  %v5361_v32 = vsel %vm1916_vm2, %v2605_v16, %v2606_v54  ;;  %v1301_v40 = vmax.f32 %v1199_v62, 0.0  ;;  %v1984_v22 = vadd.f32 %v4779_v36, %v1822_v63  ;;  %v885_v62 = vpop.f32.mrf.mxu2  ;;  %v6460_v59 = vld [vmem:[#allocation64_spill] sm:$0xff] }
 0x153   :  { %6451 = vst [vmem:[#allocation72_spill] sm:$0xff] %v5353_v47  ;;  %v2130_v53 = vmul.f32 %v5078_v23, %v1695_v21  ;;  %v5366_v34 = vmul.f32 %v4796_v1, %v1308_v5  ;;  %v5370_v28 = vmul.f32 %v4427_v20, %v5229_v44  ;;  %v5375_v57 = vmul.f32 %v4462_v55, %v5229_v44  ;;  %v993_v16 = vpop.f32.mrf.mxu3  ;;  %v6457_v1 = vld [vmem:[#allocation84_spill] sm:$0xff] }
 0x154   :  { %6453 = vst [vmem:[#allocation14_spill] sm:$0xff] %v5357_v51  ;;  %v1153_v36 = vadd.f32 %v4913_v9, %v1047_v4  ;;  %v1281_v63 = vmax.f32 %v5113_v25, 0.0  ;;  %v2097_v21 = vadd.f32 %v6457_v1, %v1984_v22  ;;  %v713_v19 = vpop.f32.mrf.mxu0  ;;  %v1186_v13 = vadd.f32 %v4913_v9, %v1080_v46 }
 0x155   :  { %6454 = vst [vmem:[#allocation20_spill] sm:$0xff] %v5361_v32  ;;  %v6458_v42 = vmax.f32 %v4510_v50, 0.0  ;;  %v1074_v44 = vmul.f32 %v4967_v58, %v6460_v59  ;;  %v1101_v54 = vmul.f32 %v4967_v58, %v885_v62  ;;  %v1055_v5 = vmul.f32 %v4967_v58, %v713_v19 }
 0x156   :  { %6455 = vst [vmem:[#allocation31_spill] sm:$0xff] %v5366_v34  ;;  %v5391_v4 = vmul.f32 %v4430_v15, %v5286_v49  ;;  %v1876_v25 = vmul.f32 %v4430_v15, %v5357_v51  ;;  %v1709_v46 = vmul.f32 %v6373_v27, %v1301_v40  ;;  %v2146_v14 = vadd.f32 %v2130_v53, %v2097_v21  ;;  %v6461_v27 = vld [vmem:[#allocation45_spill] sm:$0xff]  ;;  %v6462_v53 = vld [vmem:[#allocation88_spill] sm:$0xff] }
 0x157   :  { %6456 = vst [vmem:[#allocation37_spill] sm:$0xff] %v5370_v28  ;;  %v1697_v52 = vmul.f32 %v6459_v56, %v6458_v42  ;;  %v5398_v50 = vmul.f32 %v4841_v18, %v5286_v49  ;;  %v1127_v22 = vmul.f32 %v4967_v58, %v5212_v61  ;;  %v1207_v62 = vadd.f32 %v4913_v9, %v1101_v54  ;;  %v6467_v28 = vld [vmem:[#allocation93_spill] sm:$0xff] }
 0x158   :  { %v1161_v16 = vadd.f32 %v4913_v9, %v1055_v5  ;;  %v1689_v1 = vmul.f32 %v4541_v7, %v1281_v63  ;;  %v1255_v19 = vmax.f32 %v1153_v36, 0.0  ;;  %v2529_v42 = vmul.f32 %v4841_v18, %v5366_v34 }
 0x159   :  { %v1288_v59 = vmax.f32 %v1186_v13, 0.0  ;;  %v1090_v40 = vmul.f32 %v4967_v58, %v6461_v27  ;;  %v2307_v49 = vadd.f32 %v6462_v53, %v2146_v14  ;;  %v1309_v21 = vmax.f32 %v1207_v62, 0.0  ;;  %v6463_v13 = vld [vmem:[#allocation96_spill] sm:$0xff] }
 0x15a   :  { %v1263_v12 = vmax.f32 %v1161_v16, 0.0  ;;  %v1953_v24 = vrot.slane %v1876_v25, 1  ;;  %v2521_v61 = vmul.f32 %v4841_v18, %v5357_v51  ;;  %v1877_v54 = vmul.f32 %v4430_v15, %v1709_v46  ;;  %v6464_v27 = vld [vmem:[#allocation60_spill] sm:$0xff]  ;;  %v888_v14 = vpop.f32.mrf.mxu2  ;;  %v6465_v16 = vld [vmem:[#allocation65_spill] sm:$0xff]  ;;  %v6466_v51 = vld [vmem:[#allocation94_spill] sm:$0xff] }
 0x15b   :  { %v2522_v7 = vmul.f32 %v4841_v18, %v1709_v46  ;;  %v2093_v36 = vmul.f32 %v4529_v29, %v5034_v60  ;;  %v1233_v63 = vadd.f32 %v4913_v9, %v1127_v22  ;;  %v1717_v5 = vmul.f32 %v6463_v13, %v1309_v21  ;;  %v5419_v62 = vpop.f32.mrf.mxu3 }
 0x15c   :  { %v1671_v32 = vmul.f32 %v6464_v27, %v1263_v12  ;;  %v2608_v25 = vrot.slane %v2529_v42, 1  ;;  %v1696_v53 = vmul.f32 %v6465_v16, %v1288_v59  ;;  %v1102_v45 = vmul.f32 %v4967_v58, %v888_v14  ;;  %v716_v47 = vpop.f32.mrf.mxu0  ;;  %v6476_v14 = vld [vmem:[#allocation13_spill] sm:$0xff] }
 0x15d   :  { %v1996_v34 = vadd.f32 %v1964_v11, %v1834_v48  ;;  %v2530_v46 = vmul.f32 %v4841_v18, %v1717_v5  ;;  %v2420_v22 = vadd.f32 %v6466_v51, %v2307_v49  ;;  %v2596_v13 = vrot.slane %v2521_v61, 1 }
 0x15e   :  { %v1807_v56 = vmul.f32 %v5202_v17, %v1671_v32  ;;  %v2453_v21 = vmul.f32 %v5315_v31, %v1671_v32  ;;  %v1954_v12 = vrot.slane %v1877_v54, 1  ;;  %v2597_v27 = vrot.slane %v2522_v7, 1 }
 0x15f   :  { %v1208_v30 = vadd.f32 %v4913_v9, %v1102_v45  ;;  %v2609_v42 = vrot.slane %v2530_v46, 1  ;;  %v5431_v47 = vadd.f32 %v2093_v36, %v1996_v34  ;;  %v1936_v11 = vrot.slane %v5391_v4, 1 }
 0x160   :  { %v1823_v59 = vadd.f32 %v1807_v56, %v6467_v28  ;;  %v5429_v16 = vadd.f32 %v2453_v21, %v2420_v22  ;;  %v2189_v48 = vmul.f32 %v4132_v0, %v1689_v1  ;;  %v1335_v5 = vmax.f32 %v1233_v63, 0.0  ;;  %v6471_v56 = vld [vmem:[#allocation5_spill] sm:$0xff] }
 0x161   :  { %6469 = vst [vmem:[#allocation26_spill] sm:$0xff] %v5431_v47  ;;  %v1310_v51 = vmax.f32 %v1208_v30, 0.0  ;;  %v1663_v32 = vmul.f32 %v4619_v8, %v1255_v19  ;;  %v5437_v49 = vsel %vm1916_vm2, %v2608_v25, %v2609_v42  ;;  %v2131_v61 = vmul.f32 %v5078_v23, %v1696_v53  ;;  %v6479_v42 = vld [vmem:[#allocation101_spill] sm:$0xff] }
 0x162   :  { %6468 = vst [vmem:[#allocation33_spill] sm:$0xff] %v5429_v16  ;;  %v1985_v45 = vadd.f32 %v4974_v3, %v1823_v59  ;;  %v2579_v28 = vrot.slane %v5398_v50, 1  ;;  %v5444_v54 = vsel %vm1916_vm2, %v1953_v24, %v1954_v12  ;;  %v5447_v4 = vsel %vm1916_vm2, %v2596_v13, %v2597_v27  ;;  %v6474_v3 = vld [vmem:[#allocation90_spill] sm:$0xff]  ;;  %v891_v7 = vpop.f32.mrf.mxu2 }
 0x163   :  { %6470 = vst [vmem:[#allocation75_spill] sm:$0xff] %v5437_v49  ;;  %v1718_v34 = vmul.f32 %v6471_v56, %v1310_v51  ;;  %v5450_v30 = vmul.f32 %v5078_v23, %v1697_v52  ;;  %v1180_v8 = vadd.f32 %v4913_v9, %v1074_v44  ;;  %v1196_v1 = vadd.f32 %v4913_v9, %v1090_v40  ;;  %v998_v36 = vpop.f32.mrf.mxu3  ;;  %v6477_v44 = vld [vmem:[#allocation76_spill] sm:$0xff] }
 0x164   :  { %6472 = vst [vmem:[#allocation46_spill] sm:$0xff] %v5444_v54  ;;  %v2098_v19 = vadd.f32 %v6474_v3, %v1985_v45  ;;  %v6475_v50 = vrot.slane %v5278_v43, 1  ;;  %v2259_v24 = vrot.slane %v2189_v48, 1  ;;  %v1743_v27 = vmul.f32 %v6476_v14, %v1335_v5  ;;  %v718_v52 = vpop.f32.mrf.mxu0  ;;  %v6491_v7 = vld [vmem:[#allocation108_spill] sm:$0xff]  ;;  %v6521_v54 = vld [vmem:[#allocation10_spill] sm:$0xff] }
 0x165   :  { %6473 = vst [vmem:[#allocation27_spill] sm:$0xff] %v5447_v4  ;;  %v1811_v25 = vmul.f32 %v5202_v17, %v1718_v34  ;;  %v5463_v53 = vmul.f32 %v4430_v15, %v1663_v32  ;;  %v1048_v40 = vmul.f32 %v4967_v58, %v6477_v44  ;;  %v1056_v22 = vmul.f32 %v4967_v58, %v718_v52  ;;  %v6485_v52 = vld [vmem:[#allocation43_spill] sm:$0xff]  ;;  %v6486_v44 = vld [vmem:[#allocation2_spill] sm:$0xff] }
 0x166   :  { %v5458_v63 = vsel %vm1916_vm2, %v6475_v50, %v1936_v11  ;;  %v2147_v46 = vadd.f32 %v2131_v61, %v2098_v19  ;;  %v6478_v43 = vrot.slane %v5282_v2, 1  ;;  %v5474_v13 = vmul.f32 %v4427_v20, %v1663_v32  ;;  %v6483_v50 = vld [vmem:[#allocation28_spill] sm:$0xff]  ;;  %v6520_v4 = vld [vmem:[#allocation7_spill] sm:$0xff] }
 0x167   :  { %v5477_v12 = vmul.f32 %v4841_v18, %v1663_v32  ;;  %v1827_v59 = vadd.f32 %v1811_v25, %v6479_v42  ;;  %v5481_v11 = vmul.f32 %v4462_v55, %v1663_v32  ;;  %v1298_v48 = vmax.f32 %v1196_v1, 0.0  ;;  %v6481_v1 = vld [vmem:[#allocation100_spill] sm:$0xff] }
 0x168   :  { %v5471_v21 = vsel %vm1916_vm2, %v6478_v43, %v2579_v28  ;;  %v1282_v5 = vmax.f32 %v1180_v8, 0.0  ;;  %v1162_v51 = vadd.f32 %v4913_v9, %v1056_v22  ;;  %v6480_v2 = vrot.slane %v5184_v37, 1  ;;  %v6482_v37 = vld [vmem:[#allocation71_spill] sm:$0xff]  ;;  %v6487_v22 = vld [vmem:[#allocation18_spill] sm:$0xff] }
 0x169   :  { %v2135_v61 = vmul.f32 %v5078_v23, %v1743_v27  ;;  %v1128_v28 = vmul.f32 %v4967_v58, %v5331_v39  ;;  %v1989_v34 = vadd.f32 %v5262_v10, %v1827_v59  ;;  %v1154_v32 = vadd.f32 %v4913_v9, %v1048_v40  ;;  %v6484_v27 = vld [vmem:[#allocation49_spill] sm:$0xff]  ;;  %v6488_v59 = vld [vmem:[#allocation83_spill] sm:$0xff] }
 0x16a   :  { %v5487_v45 = vsel %vm1916_vm2, %v6480_v2, %v2259_v24  ;;  %v2308_v8 = vadd.f32 %v6481_v1, %v2147_v46  ;;  %v1264_v19 = vmax.f32 %v1162_v51, 0.0  ;;  %v1075_v36 = vmul.f32 %v4967_v58, %v6482_v37  ;;  %v893_v43 = vpop.f32.mrf.mxu2 }
 0x16b   :  { %v1290_v24 = vmax.f32 %v6483_v50, 0.0  ;;  %v2102_v25 = vadd.f32 %v6484_v27, %v1989_v34  ;;  %v5502_v39 = vmul.f32 %v6485_v52, %v1298_v48  ;;  %v1690_v10 = vmul.f32 %v4703_v33, %v1282_v5  ;;  %v5508_v42 = vpop.f32.mrf.mxu3  ;;  %v6489_v5 = vld [vmem:[#allocation113_spill] sm:$0xff] }
 0x16c   :  { %v1094_v40 = vmul.f32 %v4967_v58, %v6486_v44  ;;  %v1672_v46 = vmul.f32 %v6487_v22, %v1264_v19  ;;  %v1091_v51 = vmul.f32 %v4967_v58, %v6488_v59  ;;  %v1234_v2 = vadd.f32 %v4913_v9, %v1128_v28  ;;  %v721_v48 = vpop.f32.mrf.mxu0  ;;  %v6490_v44 = vld [vmem:[#allocation52_spill] sm:$0xff]  ;;  %v6502_v22 = vld [vmem:[#allocation70_spill] sm:$0xff] }
 0x16d   :  { %v1103_v34 = vmul.f32 %v4967_v58, %v893_v43  ;;  %v2151_v1 = vadd.f32 %v2135_v61, %v2102_v25  ;;  %v1256_v37 = vmax.f32 %v1154_v32, 0.0  ;;  %v2421_v50 = vadd.f32 %v6489_v5, %v2308_v8  ;;  %v6492_v25 = vld [vmem:[#allocation107_spill] sm:$0xff]  ;;  %v6493_v43 = vld [vmem:[#allocation112_spill] sm:$0xff] }
 0x16e   :  { %v1808_v33 = vmul.f32 %v5202_v17, %v1672_v46  ;;  %v2454_v27 = vmul.f32 %v5315_v31, %v1672_v46  ;;  %v5518_v19 = vadd.f32 %v4913_v9, %v1075_v36  ;;  %v2409_v28 = vmul.f32 %v4462_v55, %v6491_v7 }
 0x16f   :  { %v1209_v52 = vadd.f32 %v4913_v9, %v1103_v34  ;;  %v2312_v59 = vadd.f32 %v6490_v44, %v2151_v1  ;;  %v1200_v61 = vadd.f32 %v4913_v9, %v1094_v40  ;;  %v1095_v32 = vmul.f32 %v4967_v58, %v6492_v25 }
 0x170   :  { %v1824_v48 = vadd.f32 %v1808_v33, %v6493_v43  ;;  %v5528_v8 = vadd.f32 %v2454_v27, %v2421_v50  ;;  %v5531_v46 = vmul.f32 %v4529_v29, %v1690_v10  ;;  %v1336_v36 = vmax.f32 %v1234_v2, 0.0  ;;  %v6495_v2 = vld [vmem:[#allocation62_spill] sm:$0xff]  ;;  %v6498_v43 = vld [vmem:[#allocation35_spill] sm:$0xff] }
 0x171   :  { %v1311_v5 = vmax.f32 %v1209_v52, 0.0  ;;  %v2425_v34 = vadd.f32 %v2409_v28, %v2312_v59  ;;  %v1664_v1 = vmul.f32 %v4640_v41, %v1256_v37  ;;  %v5535_v44 = vmul.f32 %v4132_v0, %v1690_v10  ;;  %v6496_v52 = vld [vmem:[#allocation25_spill] sm:$0xff] }
 0x172   :  { %6494 = vst [vmem:[#allocation29_spill] sm:$0xff] %v5528_v8  ;;  %v1197_v40 = vadd.f32 %v4913_v9, %v1091_v51  ;;  %v1986_v3 = vadd.f32 %v5110_v6, %v1824_v48  ;;  %v5541_v33 = vmul.f32 %v4430_v15, %v5502_v39  ;;  %v5545_v50 = vmul.f32 %v4841_v18, %v5502_v39  ;;  %v6497_v6 = vld [vmem:[#allocation104_spill] sm:$0xff]  ;;  %v896_v28 = vpop.f32.mrf.mxu2 }
 0x173   :  { %v1096_v27 = vmul.f32 %v4967_v58, %v6495_v2  ;;  %v1719_v41 = vmul.f32 %v6496_v52, %v1311_v5  ;;  %v1302_v37 = vmax.f32 %v1200_v61, 0.0  ;;  %v1201_v10 = vadd.f32 %v4913_v9, %v1095_v32  ;;  %v1003_v25 = vpop.f32.mrf.mxu3 }
 0x174   :  { %v1097_v51 = vmul.f32 %v4967_v58, %v5149_v35  ;;  %v2099_v59 = vadd.f32 %v6497_v6, %v1986_v3  ;;  %v1744_v48 = vmul.f32 %v6498_v43, %v1336_v36  ;;  %v1763_v8 = vmul.f32 %v4427_v20, %v6491_v7  ;;  %v723_v5 = vpop.f32.mrf.mxu0  ;;  %v6499_v6 = vld [vmem:[#allocation87_spill] sm:$0xff]  ;;  %v6500_v7 = vld [vmem:[#allocation61_spill] sm:$0xff] }
 0x175   :  { %v1812_v16 = vmul.f32 %v5202_v17, %v1719_v41  ;;  %v2458_v2 = vmul.f32 %v5315_v31, %v1719_v41  ;;  %v5560_v61 = vmul.f32 %v4430_v15, %v1664_v1  ;;  %v1299_v32 = vmax.f32 %v1197_v40, 0.0 }
 0x176   :  { %v1057_v35 = vmul.f32 %v4967_v58, %v723_v5  ;;  %v2148_v3 = vadd.f32 %v5450_v30, %v2099_v59  ;;  %v1698_v28 = vmul.f32 %v6499_v6, %v1290_v24  ;;  %v1202_v36 = vadd.f32 %v4913_v9, %v1096_v27  ;;  %v6505_v59 = vld [vmem:[#allocation55_spill] sm:$0xff] }
 0x177   :  { %v1828_v25 = vadd.f32 %v1812_v16, %v1763_v8  ;;  %v2474_v49 = vadd.f32 %v2458_v2, %v2425_v34  ;;  %v5567_v43 = vmul.f32 %v6500_v7, %v1302_v37  ;;  %v1203_v41 = vadd.f32 %v4913_v9, %v1097_v51  ;;  %v6504_v37 = vld [vmem:[#allocation47_spill] sm:$0xff] }
 0x178   :  { %v1163_v47 = vadd.f32 %v4913_v9, %v1057_v35  ;;  %v2309_v14 = vadd.f32 %v6502_v22, %v2148_v3  ;;  %v1303_v40 = vmax.f32 %v1201_v10, 0.0  ;;  %v2136_v5 = vmul.f32 %v5078_v23, %v1744_v48  ;;  %v6506_v48 = vld [vmem:[#allocation77_spill] sm:$0xff] }
 0x179   :  { %6501 = vst [vmem:[#allocation36_spill] sm:$0xff] %v5567_v43  ;;  %v1990_v30 = vadd.f32 %v5312_v26, %v1828_v25  ;;  %v5575_v24 = vadd.f32 %v5321_v38, %v2474_v49  ;;  %v5578_v16 = vmul.f32 %v4841_v18, %v1664_v1  ;;  %v1129_v8 = vmul.f32 %v4967_v58, %v5419_v62 }
 0x17a   :  { %v1265_v34 = vmax.f32 %v1163_v47, 0.0  ;;  %v2422_v27 = vadd.f32 %v5375_v57, %v2309_v14  ;;  %v5584_v51 = vmul.f32 %v6504_v37, %v1299_v32  ;;  %v2133_v22 = vmul.f32 %v5078_v23, %v1698_v28  ;;  %v898_v47 = vpop.f32.mrf.mxu2  ;;  %v6507_v14 = vld [vmem:[#allocation63_spill] sm:$0xff]  ;;  %v6511_v37 = vld [vmem:[#allocation73_spill] sm:$0xff] }
 0x17b   :  { %6503 = vst [vmem:[#allocation74_spill] sm:$0xff] %v5575_v24  ;;  %v1304_v10 = vmax.f32 %v1202_v36, 0.0  ;;  %v2103_v26 = vadd.f32 %v6505_v59, %v1990_v30  ;;  %v1283_v38 = vmax.f32 %v5518_v19, 0.0  ;;  %v5591_v49 = vmul.f32 %v4430_v15, %v5567_v43  ;;  %v5594_v2 = vpop.f32.mrf.mxu3  ;;  %v6518_v24 = vld [vmem:[#allocation50_spill] sm:$0xff] }
 0x17c   :  { %v1305_v1 = vmax.f32 %v1203_v41, 0.0  ;;  %v1673_v62 = vmul.f32 %v6506_v48, %v1265_v34  ;;  %v5598_v57 = vmul.f32 %v4841_v18, %v5567_v43  ;;  %v1711_v32 = vmul.f32 %v6507_v14, %v1303_v40  ;;  %v726_v19 = vpop.f32.mrf.mxu0  ;;  %v6508_v41 = vld [vmem:[#allocation12_spill] sm:$0xff]  ;;  %v6510_v34 = vld [vmem:[#allocation59_spill] sm:$0xff] }
 0x17d   :  { %v1104_v35 = vmul.f32 %v4967_v58, %v898_v47  ;;  %v2152_v3 = vadd.f32 %v2136_v5, %v2103_v26  ;;  %v2206_v28 = vmul.f32 %v4132_v0, %v5034_v60  ;;  %v1235_v36 = vadd.f32 %v4913_v9, %v1129_v8  ;;  %v6512_v26 = vld [vmem:[#allocation23_spill] sm:$0xff]  ;;  %v6513_v47 = vld [vmem:[#allocation37_spill] sm:$0xff] }
 0x17e   :  { %v1809_v25 = vmul.f32 %v5202_v17, %v1673_v62  ;;  %v2455_v7 = vmul.f32 %v5315_v31, %v1673_v62  ;;  %v5608_v30 = vmul.f32 %v6508_v41, %v1304_v10  ;;  %v2410_v5 = vmul.f32 %v4462_v55, %v6511_v37 }
 0x17f   :  { %v1210_v18 = vadd.f32 %v4913_v9, %v1104_v35  ;;  %v2313_v40 = vadd.f32 %v6510_v34, %v2152_v3  ;;  %v1956_v59 = vrot.slane %v5591_v49, 1  ;;  %v1713_v60 = vmul.f32 %v6512_v26, %v1305_v1  ;;  %v5622_v35 = vld [vmem:[%s6139_s5 + $0x8] ss:$0 sm:$0xff] }
 0x180   :  { %6509 = vst [vmem:[#allocation38_spill] sm:$0xff] %v5608_v30  ;;  %v1825_v8 = vadd.f32 %v1809_v25, %v6513_v47  ;;  %v2471_v14 = vadd.f32 %v2455_v7, %v2422_v27  ;;  %v2599_v19 = vrot.slane %v5598_v57, 1  ;;  %v1879_v62 = vmul.f32 %v4430_v15, %v1711_v32  ;;  %v6515_v25 = vld [vmem:[#allocation69_spill] sm:$0xff] }
 0x181   :  { %v1312_v10 = vmax.f32 %v1210_v18, 0.0  ;;  %v2426_v41 = vadd.f32 %v2410_v5, %v2313_v40  ;;  %v2524_v3 = vmul.f32 %v5622_v35, %v1711_v32  ;;  %v1337_v34 = vmax.f32 %v1235_v36, 0.0  ;;  %v6516_v18 = vld [vmem:[#allocation40_spill] sm:$0xff] }
 0x182   :  { %v1987_v49 = vadd.f32 %v5458_v63, %v1825_v8  ;;  %v5627_v1 = vadd.f32 %v5471_v21, %v2471_v14  ;;  %v2285_v27 = vrot.slane %v2206_v28, 1  ;;  %v2207_v57 = vmul.f32 %v4132_v0, %v6515_v25  ;;  %v6517_v63 = vld [vmem:[#allocation48_spill] sm:$0xff]  ;;  %v901_v21 = vpop.f32.mrf.mxu2 }
 0x183   :  { %v1880_v7 = vmul.f32 %v4430_v15, %v5608_v30  ;;  %v1720_v40 = vmul.f32 %v6516_v18, %v1312_v10  ;;  %v2525_v5 = vmul.f32 %v5622_v35, %v5608_v30  ;;  %v1881_v32 = vmul.f32 %v4430_v15, %v1713_v60  ;;  %v1008_v25 = vpop.f32.mrf.mxu3 }
 0x184   :  { %6514 = vst [vmem:[#allocation86_spill] sm:$0xff] %v5627_v1  ;;  %v2526_v36 = vmul.f32 %v5622_v35, %v1713_v60  ;;  %v2100_v26 = vadd.f32 %v6517_v63, %v1987_v49  ;;  %v1957_v47 = vrot.slane %v1879_v62, 1  ;;  %v1764_v28 = vmul.f32 %v4427_v20, %v6511_v37  ;;  %v728_v10 = vpop.f32.mrf.mxu0 }
 0x185   :  { %v1813_v8 = vmul.f32 %v5202_v17, %v1720_v40  ;;  %v2459_v14 = vmul.f32 %v5315_v31, %v1720_v40  ;;  %v2600_v18 = vrot.slane %v2524_v3, 1  ;;  %v1745_v1 = vmul.f32 %v6518_v24, %v1337_v34  ;;  %v6519_v40 = vld [vmem:[#allocation89_spill] sm:$0xff] }
 0x186   :  { %v1058_v6 = vmul.f32 %v4967_v58, %v728_v10  ;;  %v2149_v48 = vadd.f32 %v2133_v22, %v2100_v26  ;;  %v2286_v60 = vrot.slane %v2207_v57, 1  ;;  %v1959_v30 = vrot.slane %v1880_v7, 1  ;;  %v6522_v7 = vld [vmem:[#allocation3_spill] sm:$0xff] }
 0x187   :  { %v1829_v49 = vadd.f32 %v1813_v8, %v1764_v28  ;;  %v2475_v63 = vadd.f32 %v2459_v14, %v2426_v41  ;;  %v2602_v62 = vrot.slane %v2525_v5, 1  ;;  %v1960_v21 = vrot.slane %v1881_v32, 1  ;;  %v6525_v14 = vld [vmem:[#allocation66_spill] sm:$0xff] }
 0x188   :  { %v2603_v52 = vrot.slane %v2526_v36, 1  ;;  %v1164_v37 = vadd.f32 %v4913_v9, %v1058_v6  ;;  %v1939_v43 = vrot.slane %v5560_v61, 1  ;;  %v1691_v25 = vmul.f32 %v6519_v40, %v1283_v38  ;;  %v6524_v38 = vld [vmem:[#allocation95_spill] sm:$0xff] }
 0x189   :  { %v1991_v3 = vadd.f32 %v6520_v4, %v1829_v49  ;;  %v5650_v24 = vadd.f32 %v6521_v54, %v2475_v63  ;;  %v2137_v22 = vmul.f32 %v5078_v23, %v1745_v1  ;;  %v1130_v34 = vmul.f32 %v4967_v58, %v5508_v42  ;;  %v6523_v54 = vld [vmem:[#allocation78_spill] sm:$0xff] }
 0x18a   :  { %v1266_v41 = vmax.f32 %v1164_v37, 0.0  ;;  %v2310_v57 = vadd.f32 %v5487_v45, %v2149_v48  ;;  %v5658_v9 = vsel %vm1916_vm2, %v1956_v59, %v1957_v47  ;;  %v5661_v61 = vsel %vm1916_vm2, %v2599_v19, %v2600_v18  ;;  %v903_v32 = vpop.f32.mrf.mxu2 }
 0x18b   :  { %v2104_v5 = vadd.f32 %v6522_v7, %v1991_v3  ;;  %v5664_v4 = vsel %vm1916_vm2, %v2285_v27, %v2286_v60  ;;  %v1291_v6 = vmax.f32 %v6523_v54, 0.0  ;;  %v5669_v42 = vsel %vm1916_vm2, %v1959_v30, %v1960_v21  ;;  %v5678_v36 = vpop.f32.mrf.mxu3 }
 0x18c   :  { %v1674_v1 = vmul.f32 %v6524_v38, %v1266_v41  ;;  %v5672_v45 = vsel %vm1916_vm2, %v2602_v62, %v2603_v52  ;;  %v2582_v48 = vrot.slane %v5578_v16, 1  ;;  %v1875_v59 = vmul.f32 %v4430_v15, %v5584_v51  ;;  %v731_v26 = vpop.f32.mrf.mxu0  ;;  %v5687_v16 = vld [vmem:[%s6138_s4] ss:$0 sm:$0xff] }
 0x18d   :  { %v1105_v19 = vmul.f32 %v4967_v58, %v903_v32  ;;  %v2153_v27 = vadd.f32 %v2137_v22, %v2104_v5  ;;  %v2191_v47 = vmul.f32 %v4132_v0, %v1691_v25  ;;  %v2423_v30 = vadd.f32 %v5481_v11, %v2310_v57  ;;  %v6526_v11 = vld [vmem:[#allocation102_spill] sm:$0xff]  ;;  %v6530_v32 = vld [vmem:[#allocation16_spill] sm:$0xff]  ;;  %v6531_v26 = vld [vmem:[#allocation21_spill] sm:$0xff] }
 0x18e   :  { %v1810_v28 = vmul.f32 %v5202_v17, %v1674_v1  ;;  %v2456_v52 = vmul.f32 %v5315_v31, %v1674_v1  ;;  %v1236_v8 = vadd.f32 %v5687_v16, %v1130_v34  ;;  %v2411_v18 = vmul.f32 %v4462_v55, %v5502_v39 }
 0x18f   :  { %v1211_v58 = vadd.f32 %v5687_v16, %v1105_v19  ;;  %v2314_v10 = vadd.f32 %v6525_v14, %v2153_v27  ;;  %v2520_v60 = vmul.f32 %v5622_v35, %v5584_v51  ;;  %v1699_v49 = vmul.f32 %v6526_v11, %v1291_v6 }
 0x190   :  { %v1826_v63 = vadd.f32 %v1810_v28, %v5474_v13  ;;  %v2472_v62 = vadd.f32 %v2456_v52, %v2423_v30  ;;  %v6527_v21 = vrot.slane %v5463_v53, 1  ;;  %v6528_v40 = vrot.slane %v5477_v12, 1  ;;  %v6529_v53 = vld [vmem:[#allocation51_spill] sm:$0xff] }
 0x191   :  { %v1313_v3 = vmax.f32 %v1211_v58, 0.0  ;;  %v2427_v22 = vadd.f32 %v2411_v18, %v2314_v10  ;;  %v1950_v34 = vrot.slane %v5541_v33, 1  ;;  %v2261_v41 = vrot.slane %v5535_v44, 1 }
 0x192   :  { %v1940_v37 = vsel %vm1916_vm2, %v6527_v21, %v1939_v43  ;;  %v2583_v25 = vsel %vm1916_vm2, %v6528_v40, %v2582_v48  ;;  %v2593_v13 = vrot.slane %v5545_v50, 1  ;;  %v2262_v7 = vrot.slane %v2191_v47, 1  ;;  %v906_v1 = vpop.f32.mrf.mxu2  ;;  %v6532_v47 = vld [vmem:[#allocation97_spill] sm:$0xff] }
 0x193   :  { %v1988_v51 = vadd.f32 %v1940_v37, %v1826_v63  ;;  %v5706_v57 = vadd.f32 %v2583_v25, %v2472_v62  ;;  %v1338_v5 = vmax.f32 %v1236_v8, 0.0  ;;  %v1721_v54 = vmul.f32 %v6529_v53, %v1313_v3  ;;  %v1013_v19 = vpop.f32.mrf.mxu3  ;;  %v6533_v8 = vld [vmem:[#allocation57_spill] sm:$0xff]  ;;  %v6534_v62 = vld [vmem:[#allocation67_spill] sm:$0xff]  ;;  %v6535_v37 = vld [vmem:[#allocation98_spill] sm:$0xff] }
 0x194   :  { %v1951_v43 = vrot.slane %v1875_v59, 1  ;;  %v2594_v6 = vrot.slane %v2520_v60, 1  ;;  %v2134_v12 = vmul.f32 %v5078_v23, %v1699_v49  ;;  %v1242_v33 = vmax.f32 %v6530_v32, 0.0  ;;  %v733_v27 = vpop.f32.mrf.mxu0  ;;  %v5720_v59 = vld [vmem:[%s6137_s3] ss:$0 sm:$0xff] }
 0x195   :  { %v2101_v38 = vadd.f32 %v5531_v46, %v1988_v51  ;;  %v1765_v44 = vmul.f32 %v4427_v20, %v5502_v39  ;;  %v1814_v48 = vmul.f32 %v5202_v17, %v1721_v54  ;;  %v2460_v50 = vmul.f32 %v5315_v31, %v1721_v54  ;;  %v6537_v54 = vld [vmem:[#allocation32_spill] sm:$0xff]  ;;  %v6541_v32 = vld [vmem:[#allocation110_spill] sm:$0xff] }
 0x196   :  { %v1035_v46 = vmul.f32 %v5720_v59, %v6531_v26  ;;  %v2408_v28 = vmul.f32 %v4462_v55, %v6532_v47  ;;  %v1059_v30 = vmul.f32 %v5720_v59, %v733_v27  ;;  %v2263_v52 = vsel %vm1916_vm2, %v2261_v41, %v2262_v7  ;;  %v6536_v41 = vld [vmem:[#allocation9_spill] sm:$0xff] }
 0x197   :  { %v2150_v39 = vadd.f32 %v2134_v12, %v2101_v38  ;;  %v1746_v58 = vmul.f32 %v6533_v8, %v1338_v5  ;;  %v1830_v14 = vadd.f32 %v1814_v48, %v1765_v44  ;;  %v2476_v10 = vadd.f32 %v2460_v50, %v2427_v22  ;;  %v6540_v38 = vld [vmem:[#allocation30_spill] sm:$0xff] }
 0x198   :  { %v1952_v18 = vsel %vm1916_vm2, %v1950_v34, %v1951_v43  ;;  %v2595_v60 = vsel %vm1916_vm2, %v2593_v13, %v2594_v6  ;;  %v1165_v49 = vadd.f32 %v5687_v16, %v1059_v30  ;;  %v2089_v21 = vmul.f32 %v4529_v29, %v6534_v62  ;;  %v6539_v6 = vld [vmem:[#allocation4_spill] sm:$0xff]  ;;  %v6543_v8 = vld [vmem:[#allocation14_spill] sm:$0xff] }
 0x199   :  { %v2311_v63 = vadd.f32 %v2263_v52, %v2150_v39  ;;  %v1051_v40 = vmul.f32 %v5720_v59, %v6535_v37  ;;  %v1992_v25 = vadd.f32 %v1952_v18, %v1830_v14  ;;  %v5736_v3 = vadd.f32 %v2595_v60, %v2476_v10  ;;  %v6542_v39 = vld [vmem:[#allocation42_spill] sm:$0xff] }
 0x19a   :  { %v1650_v51 = vmul.f32 %v6536_v41, %v1242_v33  ;;  %v1141_v22 = vadd.f32 %v5687_v16, %v1035_v46  ;;  %v1267_v7 = vmax.f32 %v1165_v49, 0.0  ;;  %v2138_v13 = vmul.f32 %v5078_v23, %v1746_v58  ;;  %v908_v33 = vpop.f32.mrf.mxu2 }
 0x19b   :  { %v2424_v34 = vadd.f32 %v2408_v28, %v2311_v63  ;;  %v1131_v5 = vmul.f32 %v5720_v59, %v5594_v2  ;;  %v2105_v53 = vadd.f32 %v2089_v21, %v1992_v25  ;;  %v6538_v43 = vmax.f32 %v6537_v54, 0.0  ;;  %v5751_v27 = vpop.f32.mrf.mxu3  ;;  %v6544_v21 = vld [vmem:[#allocation103_spill] sm:$0xff] }
 0x19c   :  { %v1036_v1 = vmul.f32 %v5720_v59, %v6540_v38  ;;  %v1675_v44 = vmul.f32 %v6541_v32, %v1267_v7  ;;  %v1157_v48 = vadd.f32 %v5687_v16, %v1051_v40  ;;  %v1106_v50 = vmul.f32 %v5720_v59, %v908_v33  ;;  %v736_v26 = vpop.f32.mrf.mxu0  ;;  %v6545_v40 = vld [vmem:[#allocation17_spill] sm:$0xff] }
 0x19d   :  { %v1649_v12 = vmul.f32 %v6539_v6, %v6538_v43  ;;  %v2154_v19 = vadd.f32 %v2138_v13, %v2105_v53  ;;  %v1853_v2 = vmul.f32 %v4430_v15, %v1650_v51  ;;  %v1243_v46 = vmax.f32 %v1141_v22, 0.0  ;;  %v6546_v51 = vld [vmem:[#allocation60_spill] sm:$0xff]  ;;  %v6549_v26 = vld [vmem:[#allocation65_spill] sm:$0xff] }
 0x19e   :  { %v2457_v47 = vmul.f32 %v5315_v31, %v1675_v44  ;;  %v1237_v28 = vadd.f32 %v5687_v16, %v1131_v5  ;;  %v1212_v30 = vadd.f32 %v5687_v16, %v1106_v50  ;;  %v2412_v58 = vmul.f32 %v4462_v55, %v6543_v8  ;;  %v6547_v5 = vld [vmem:[#allocation111_spill] sm:$0xff] }
 0x19f   :  { %v2315_v52 = vadd.f32 %v6542_v39, %v2154_v19  ;;  %v1852_v14 = vmul.f32 %v4430_v15, %v1649_v12  ;;  %v1142_v10 = vadd.f32 %v5687_v16, %v1036_v1  ;;  %v1259_v60 = vmax.f32 %v1157_v48, 0.0  ;;  %v6548_v48 = vld [vmem:[#allocation79_spill] sm:$0xff] }
 0x1a0   :  { %v2473_v18 = vadd.f32 %v2457_v47, %v2424_v34  ;;  %v1314_v49 = vmax.f32 %v1212_v30, 0.0  ;;  %v1918_v62 = vrot.slane %v1853_v2, 1  ;;  %v1651_v25 = vmul.f32 %v6545_v40, %v1243_v46  ;;  %v6550_v30 = vld [vmem:[#allocation19_spill] sm:$0xff] }
 0x1a1   :  { %v2428_v63 = vadd.f32 %v2412_v58, %v2315_v52  ;;  %v1339_v41 = vmax.f32 %v1237_v28, 0.0  ;;  %v1917_v7 = vrot.slane %v1852_v14, 1  ;;  %v1244_v13 = vmax.f32 %v1142_v10, 0.0  ;;  %v6552_v10 = vld [vmem:[#allocation46_spill] sm:$0xff] }
 0x1a2   :  { %v5763_v37 = vadd.f32 %v6544_v21, %v2473_v18  ;;  %v1722_v22 = vmul.f32 %v6546_v51, %v1314_v49  ;;  %v1052_v53 = vmul.f32 %v5720_v59, %v6547_v5  ;;  %v911_v54 = vpop.f32.mrf.mxu2  ;;  %v1667_v34 = vmul.f32 %v6471_v56, %v1259_v60  ;;  %v6553_v60 = vld [vmem:[#allocation27_spill] sm:$0xff] }
 0x1a3   :  { %v1766_v43 = vmul.f32 %v4427_v20, %v6543_v8  ;;  %v1018_v1 = vpop.f32.mrf.mxu3  ;;  %v1754_v44 = vmul.f32 %v4427_v20, %v1649_v12  ;;  %v1919_v33 = vsel %vm1916_vm2, %v1917_v7, %v1918_v62  ;;  %v1076_v50 = vmul.f32 %v5720_v59, %v6548_v48  ;;  %v6551_v8 = vld [vmem:[#allocation39_spill] sm:$0xff] }
 0x1a4   :  { %v1815_v6 = vmul.f32 %v5202_v17, %v1722_v22  ;;  %v2461_v38 = vmul.f32 %v5315_v31, %v1722_v22  ;;  %v738_v32 = vpop.f32.mrf.mxu0  ;;  %v5780_v56 = vmul.f32 %v4430_v15, %v1651_v25  ;;  %v1747_v2 = vmul.f32 %v6549_v26, %v1339_v41 }
 0x1a5   :  { %v1060_v19 = vmul.f32 %v5720_v59, %v738_v32  ;;  %v5784_v28 = vmul.f32 %v5622_v35, %v1651_v25  ;;  %v1652_v39 = vmul.f32 %v6550_v30, %v1244_v13  ;;  %v1158_v12 = vadd.f32 %v5687_v16, %v1052_v53  ;;  %v6557_v30 = vld [vmem:[#allocation36_spill] sm:$0xff] }
 0x1a6   :  { %v1831_v46 = vadd.f32 %v1815_v6, %v1766_v43  ;;  %v2477_v47 = vadd.f32 %v2461_v38, %v2428_v63  ;;  %v2090_v58 = vmul.f32 %v4529_v29, %v6551_v8  ;;  %v1803_v14 = vmul.f32 %v5202_v17, %v1667_v34  ;;  %v6554_v43 = vld [vmem:[#allocation11_spill] sm:$0xff]  ;;  %v6558_v8 = vld [vmem:[#allocation25_spill] sm:$0xff] }
 0x1a7   :  { %v1166_v52 = vadd.f32 %v5687_v16, %v1060_v19  ;;  %v5797_v63 = vmul.f32 %v4427_v20, %v1651_v25  ;;  %v5800_v62 = vmul.f32 %v4462_v55, %v1651_v25  ;;  %v1182_v21 = vadd.f32 %v5687_v16, %v1076_v50  ;;  %v6555_v50 = vld [vmem:[#allocation92_spill] sm:$0xff] }
 0x1a8   :  { %v1993_v18 = vadd.f32 %v6552_v10, %v1831_v46  ;;  %v5794_v49 = vadd.f32 %v6553_v60, %v2477_v47  ;;  %v1920_v41 = vrot.slane %v5780_v56, 1  ;;  %v2139_v51 = vmul.f32 %v5078_v23, %v1747_v2  ;;  %v6568_v56 = vld [vmem:[#allocation38_spill] sm:$0xff] }
 0x1a9   :  { %v1268_v40 = vmax.f32 %v1166_v52, 0.0  ;;  %v1132_v22 = vmul.f32 %v5720_v59, %v5678_v36  ;;  %v2563_v13 = vrot.slane %v5784_v28, 1  ;;  %v5809_v5 = vmul.f32 %v4430_v15, %v1652_v39 }
 0x1aa   :  { %v2106_v7 = vadd.f32 %v2090_v58, %v1993_v18  ;;  %v5812_v53 = vmul.f32 %v5622_v35, %v1652_v39  ;;  %v1260_v25 = vmax.f32 %v1158_v12, 0.0  ;;  %v913_v54 = vpop.f32.mrf.mxu2  ;;  %v1819_v34 = vadd.f32 %v1803_v14, %v1754_v44  ;;  %v6556_v44 = vld [vmem:[#allocation81_spill] sm:$0xff] }
 0x1ab   :  { %v1676_v6 = vmul.f32 %v6554_v43, %v1268_v40  ;;  %v1107_v38 = vmul.f32 %v5720_v59, %v913_v54  ;;  %v1020_v32 = vpop.f32.mrf.mxu3  ;;  %v1284_v36 = vmax.f32 %v1182_v21, 0.0  ;;  %v1077_v19 = vmul.f32 %v5720_v59, %v6555_v50  ;;  %v103_v12 = vld [vmem:[%s6135_s0 + $0x1f8] sm:$0xff] }
 0x1ac   :  { %v2155_v1 = vadd.f32 %v2139_v51, %v2106_v7  ;;  %v741_v48 = vpop.f32.mrf.mxu0  ;;  %v1134_v15 = vmul.f32 %v5720_v59, %v1020_v32  ;;  %v1238_v2 = vadd.f32 %v5687_v16, %v1132_v22  ;;  %v2413_v39 = vmul.f32 %v4462_v55, %v6557_v30  ;;  %2985 = vmatmul.msk.f32.gmra.mxu1 %vm185_vm1, %v103_v12  ;;  %v6559_v51 = vld [vmem:[#allocation85_spill] sm:$0xff]  ;;  %v6561_v32 = vld [vmem:[#allocation18_spill] sm:$0xff] }
 0x1ad   :  { %v1061_v26 = vmul.f32 %v5720_v59, %v741_v48  ;;  %v1213_v46 = vadd.f32 %v5687_v16, %v1107_v38  ;;  %v1921_v52 = vrot.slane %v5809_v5, 1  ;;  %v1668_v58 = vmul.f32 %v6558_v8, %v1260_v25  ;;  %v6560_v7 = vld [vmem:[#allocation13_spill] sm:$0xff] }
 0x1ae   :  { %v2316_v47 = vadd.f32 %v6556_v44, %v2155_v1  ;;  %v1240_v14 = vadd.f32 %v5687_v16, %v1134_v15  ;;  %v2564_v18 = vrot.slane %v5812_v53, 1  ;;  %v2078_v60 = vmul.f32 %v4529_v29, %v1676_v6 }
 0x1af   :  { %v1167_v10 = vadd.f32 %v5687_v16, %v1061_v26  ;;  %v1315_v21 = vmax.f32 %v1213_v46, 0.0  ;;  %v2091_v22 = vmul.f32 %v4529_v29, %v6559_v51  ;;  %v1692_v54 = vmul.f32 %v6560_v7, %v1284_v36  ;;  %v6562_v46 = vld [vmem:[#allocation6_spill] sm:$0xff] }
 0x1b0   :  { %v2429_v40 = vadd.f32 %v2413_v39, %v2316_v47  ;;  %v1342_v5 = vmax.f32 %v1240_v14, 0.0  ;;  %v1183_v25 = vadd.f32 %v5687_v16, %v1077_v19  ;;  %v1340_v38 = vmax.f32 %v1238_v2, 0.0  ;;  %v6563_v14 = vld [vmem:[#allocation15_spill] sm:$0xff] }
 0x1b1   :  { %v1269_v43 = vmax.f32 %v1167_v10, 0.0  ;;  %v1981_v1 = vadd.f32 %v1919_v33, %v1819_v34  ;;  %v1723_v48 = vmul.f32 %v6561_v32, %v1315_v21  ;;  %v1804_v50 = vmul.f32 %v5202_v17, %v1668_v58 }
 0x1b2   :  { %v2176_v15 = vmul.f32 %v4132_v0, %v1676_v6  ;;  %v1750_v26 = vmul.f32 %v6526_v11, %v1342_v5  ;;  %v916_v47 = vpop.f32.mrf.mxu2  ;;  %v1767_v36 = vmul.f32 %v4427_v20, %v6557_v30  ;;  %v2127_v34 = vmul.f32 %v5078_v23, %v1692_v54  ;;  %v6564_v30 = vld [vmem:[#allocation26_spill] sm:$0xff] }
 0x1b3   :  { %v1677_v44 = vmul.f32 %v6562_v46, %v1269_v43  ;;  %v2094_v39 = vadd.f32 %v2078_v60, %v1981_v1  ;;  %v1816_v12 = vmul.f32 %v5202_v17, %v1723_v48  ;;  %v2462_v19 = vmul.f32 %v5315_v31, %v1723_v48 }
 0x1b4   :  { %v744_v33 = vpop.f32.mrf.mxu0  ;;  %v2142_v2 = vmul.f32 %v5078_v23, %v1750_v26  ;;  %v1285_v8 = vmax.f32 %v1183_v25, 0.0  ;;  %v1748_v10 = vmul.f32 %v6563_v14, %v1340_v38  ;;  %v2240_v51 = vrot.slane %v2176_v15, 1  ;;  %v6565_v26 = vld [vmem:[#allocation31_spill] sm:$0xff] }
 0x1b5   :  { %v2177_v6 = vmul.f32 %v4132_v0, %v1677_v44  ;;  %v1062_v11 = vmul.f32 %v5720_v59, %v744_v33  ;;  %v1832_v60 = vadd.f32 %v1816_v12, %v1767_v36  ;;  %v2478_v21 = vadd.f32 %v2462_v19, %v2429_v40  ;;  %v6567_v36 = vld [vmem:[#allocation22_spill] sm:$0xff] }
 0x1b6   :  { %v2158_v7 = vadd.f32 %v2142_v2, %v6564_v30  ;;  %v1820_v1 = vadd.f32 %v1804_v50, %v5797_v63  ;;  %v2143_v54 = vadd.f32 %v2127_v34, %v2094_v39  ;;  %v2416_v25 = vmul.f32 %v4462_v55, %v6565_v26 }
 0x1b7   :  { %v2241_v5 = vrot.slane %v2177_v6, 1  ;;  %v1168_v43 = vadd.f32 %v5687_v16, %v1062_v11  ;;  %v1994_v32 = vadd.f32 %v5658_v9, %v1832_v60  ;;  %v5858_v48 = vadd.f32 %v5661_v61, %v2478_v21  ;;  %v6566_v61 = vld [vmem:[#allocation35_spill] sm:$0xff] }
 0x1b8   :  { %v2319_v38 = vadd.f32 %v5664_v4, %v2158_v7  ;;  %v2140_v46 = vmul.f32 %v5078_v23, %v1748_v10  ;;  %v1133_v44 = vmul.f32 %v5720_v59, %v5751_v27  ;;  %v1922_v9 = vsel %vm1916_vm2, %v1920_v41, %v1921_v52 }
 0x1b9   :  { %v2242_v40 = vsel %vm1916_vm2, %v2240_v51, %v2241_v5  ;;  %v1270_v15 = vmax.f32 %v1168_v43, 0.0  ;;  %v2107_v63 = vadd.f32 %v2091_v22, %v1994_v32  ;;  %v1693_v47 = vmul.f32 %v6566_v61, %v1285_v8  ;;  %v5892_v5 = vld [vmem:[%s6142_s6] ss:$0 sm:$0xff]  ;;  %v6571_v32 = vld [vmem:[#allocation24_spill] sm:$0xff] }
 0x1ba   :  { %v2304_v50 = vadd.f32 %v2242_v40, %v2143_v54  ;;  %v2432_v39 = vadd.f32 %v2416_v25, %v2319_v38  ;;  %v918_v4 = vpop.f32.mrf.mxu2  ;;  %v2450_v19 = vmul.f32 %v5315_v31, %v1668_v58  ;;  %v1982_v22 = vadd.f32 %v1922_v9, %v1820_v1  ;;  %v6569_v58 = vld [vmem:[#allocation91_spill] sm:$0xff]  ;;  %v6570_v54 = vld [vmem:[#allocation77_spill] sm:$0xff] }
 0x1bb   :  { %v1678_v12 = vmul.f32 %v6567_v36, %v1270_v15  ;;  %v1108_v34 = vmul.f32 %v5720_v59, %v918_v4  ;;  %v2156_v2 = vadd.f32 %v2140_v46, %v2107_v63  ;;  %v2414_v41 = vmul.f32 %v4462_v55, %v6568_v56  ;;  %v6572_v46 = vld [vmem:[#allocation68_spill] sm:$0xff]  ;;  %v6574_v36 = vld [vmem:[#allocation41_spill] sm:$0xff] }
 0x1bc   :  { %v2417_v33 = vadd.f32 %v5800_v62, %v2304_v50  ;;  %v747_v27 = vpop.f32.mrf.mxu0  ;;  %v1239_v11 = vadd.f32 %v5687_v16, %v1133_v44  ;;  %v2565_v62 = vsel %vm1916_vm2, %v2563_v13, %v2564_v18  ;;  %v2128_v60 = vmul.f32 %v5078_v23, %v1693_v47  ;;  %v5899_v18 = vld [vmem:[%s6143_s7] ss:$0 sm:$0xff]  ;;  %v6573_v50 = vld [vmem:[#allocation87_spill] sm:$0xff] }
 0x1bd   :  { %v2079_v6 = vmul.f32 %v4529_v29, %v1678_v12  ;;  %v1063_v52 = vmul.f32 %v5720_v59, %v747_v27  ;;  %v1214_v14 = vadd.f32 %v5687_v16, %v1108_v34  ;;  %v2317_v10 = vadd.f32 %v6569_v58, %v2156_v2 }
 0x1be   :  { %v2466_v8 = vadd.f32 %v2450_v19, %v2417_v33  ;;  %v1341_v53 = vmax.f32 %v1239_v11, 0.0  ;;  %v1768_v25 = vmul.f32 %v4427_v20, %v6568_v56  ;;  %v2465_v44 = vmul.f32 %v5315_v31, %v6572_v46  ;;  %v6575_v19 = vld [vmem:[#allocation56_spill] sm:$0xff] }
 0x1bf   :  { %v2095_v21 = vadd.f32 %v2079_v6, %v1982_v22  ;;  %v1169_v51 = vadd.f32 %v5687_v16, %v1063_v52  ;;  %v1316_v30 = vmax.f32 %v1214_v14, 0.0  ;;  %v2430_v59 = vadd.f32 %v2414_v41, %v2317_v10  ;;  %v6577_v6 = vld [vmem:[#allocation75_spill] sm:$0xff] }
 0x1c0   :  { %v2627_v7 = vadd.f32 %v2565_v62, %v2466_v8  ;;  %v2178_v16 = vmul.f32 %v4132_v0, %v1678_v12  ;;  %v1749_v9 = vmul.f32 %v6573_v50, %v1341_v53  ;;  %v2502_v20 = vmul.f32 %v5622_v35, %v6574_v36  ;;  %v6579_v8 = vld [vmem:[#allocation8_spill] sm:$0xff] }
 0x1c1   :  { %v2144_v43 = vadd.f32 %v2128_v60, %v2095_v21  ;;  %v1271_v1 = vmax.f32 %v1169_v51, 0.0  ;;  %v1724_v28 = vmul.f32 %v6570_v54, %v1316_v30  ;;  %v2481_v4 = vadd.f32 %v2465_v44, %v2432_v39  ;;  %v6580_v60 = vld [vmem:[#allocation80_spill] sm:$0xff]  ;;  %v6581_v51 = vld [vmem:[#allocation106_spill] sm:$0xff] }
 0x1c2   :  { %v2703_v13 = vmul.f32 %v5892_v5, %v2627_v7  ;;  %v2243_v12 = vrot.slane %v2178_v16, 1  ;;  %v2092_v33 = vmul.f32 %v4529_v29, %v6575_v19  ;;  %v2141_v39 = vmul.f32 %v5078_v23, %v1749_v9  ;;  %v6583_v16 = vld [vmem:[#allocation72_spill] sm:$0xff]  ;;  %v6585_v44 = vld [vmem:[#allocation34_spill] sm:$0xff]  ;;  %v6586_v9 = vld [vmem:[#allocation109_spill] sm:$0xff] }
 0x1c3   :  { %v1679_v26 = vmul.f32 %v6571_v32, %v1271_v1  ;;  %v1817_v38 = vmul.f32 %v5202_v17, %v1724_v28  ;;  %v2463_v40 = vmul.f32 %v5315_v31, %v1724_v28  ;;  %v5925_v56 = vadd.f32 %v6577_v6, %v2481_v4  ;;  %v6582_v28 = vld [vmem:[#allocation54_spill] sm:$0xff]  ;;  %v6589_v19 = vld [vmem:[#allocation105_spill] sm:$0xff] }
 0x1c4   :  { %v2723_v15 = vadd.f32 %v5899_v18, %v2703_v13  ;;  %v2567_v11 = vrot.slane %v2502_v20, 1  ;;  %v2451_v14 = vmul.f32 %v5315_v31, %v6579_v8  ;;  %v2503_v21 = vmul.f32 %v5622_v35, %v6580_v60 }
 0x1c5   :  { %v2179_v63 = vmul.f32 %v4132_v0, %v1679_v26  ;;  %v1833_v61 = vadd.f32 %v1817_v38, %v1768_v25  ;;  %v2479_v47 = vadd.f32 %v2463_v40, %v2430_v59  ;;  %v6576_v0 = vld [vmem:[#allocation44_spill] sm:$0xff]  ;;  %v2506_v13 = vmul.f32 %v5622_v35, %v6582_v28  ;;  %v6584_v25 = vld [vmem:[#allocation58_spill] sm:$0xff] }
 0x1c6   :  { %3067 = vmatmul.msk.f32.vlgmr.msrb.gmra.mxu1 %vm185_vm1, %v2723_v15  ;;  %v2501_v27 = vmul.f32 %v5622_v35, %v6576_v0  ;;  %v2402_v41 = vmul.f32 %v4462_v55, %v6576_v0  ;;  %v2569_v1 = vrot.slane %v2503_v21, 1  ;;  %v2505_v38 = vmul.f32 %v5622_v35, %v6584_v25  ;;  %v6590_v0 = vld [vmem:[#allocation20_spill] sm:$0xff] }
 0x1c7   :  { %v2244_v17 = vrot.slane %v2179_v63, 1  ;;  %v1995_v34 = vadd.f32 %v5669_v42, %v1833_v61  ;;  %v5919_v2 = vadd.f32 %v5672_v45, %v2479_v47  ;;  %v6578_v42 = vld [vmem:[#allocation82_spill] sm:$0xff]  ;;  %v2573_v40 = vrot.slane %v2506_v13, 1  ;;  %v6587_v47 = vld [vmem:[#allocation99_spill] sm:$0xff] }
 0x1c8   :  { %v2504_v45 = vmul.f32 %v5622_v35, %v6578_v42  ;;  %v2566_v62 = vrot.slane %v2501_v27, 1  ;;  %v2572_v46 = vrot.slane %v2505_v38, 1  ;;  %v2415_v63 = vmul.f32 %v4462_v55, %v6585_v44 }
 0x1c9   :  { %v2245_v22 = vsel %vm1916_vm2, %v2243_v12, %v2244_v17  ;;  %v2108_v52 = vadd.f32 %v2092_v33, %v1995_v34  ;;  %v2508_v61 = vmul.f32 %v5622_v35, %v6586_v9  ;;  %v2464_v36 = vmul.f32 %v5315_v31, %v6587_v47  ;;  %v6588_v12 = vld [vmem:[#allocation33_spill] sm:$0xff] }
 0x1ca   :  { %v2305_v29 = vadd.f32 %v2245_v22, %v2144_v43  ;;  %v2568_v23 = vsel %vm1916_vm2, %v2566_v62, %v2567_v11  ;;  %v2570_v7 = vrot.slane %v2504_v45, 1  ;;  %v2574_v50 = vsel %vm1916_vm2, %v2572_v46, %v2573_v40  ;;  %v6591_v31 = vld [vmem:[#allocation29_spill] sm:$0xff]  ;;  %v6592_v11 = vld [vmem:[#allocation86_spill] sm:$0xff] }
 0x1cb   :  { %v2157_v58 = vadd.f32 %v2141_v39, %v2108_v52  ;;  %v2630_v17 = vadd.f32 %v2574_v50, %v6588_v12  ;;  %v2507_v33 = vmul.f32 %v5622_v35, %v6589_v19  ;;  %v2576_v55 = vrot.slane %v2508_v61, 1  ;;  %v6593_v62 = vld [vmem:[#allocation74_spill] sm:$0xff] }
 0x1cc   :  { %v2418_v10 = vadd.f32 %v2402_v41, %v2305_v29  ;;  %v2571_v54 = vsel %vm1916_vm2, %v2569_v1, %v2570_v7  ;;  %v2708_v42 = vmul.f32 %v5892_v5, %v6592_v11  ;;  %v2709_v8 = vmul.f32 %v5892_v5, %v5706_v57  ;;  %v181_v57 = vld [vmem:[%s6135_s0 + $0x468] sm:$0xff]  ;;  %v143_v1 = vld [vmem:[%s6135_s0 + $0x338] sm:$0xff] }
 0x1cd   :  { %v2318_v30 = vadd.f32 %v6581_v51, %v2157_v58  ;;  %v2629_v32 = vadd.f32 %v2571_v54, %v6583_v16  ;;  %v2706_v22 = vmul.f32 %v5892_v5, %v2630_v17  ;;  %v2575_v6 = vrot.slane %v2507_v33, 1  ;;  %3063 = vmatmul.msk.f32.gmra.mxu3 %vm185_vm1, %v181_v57  ;;  %3025 = vmatmul.msk.f32.gmra.mxu2 %vm185_vm1, %v143_v1  ;;  %v6027_v16 = vld [vmem:[%s6144_s9] ss:$0 sm:$0xff] }
 0x1ce   :  { %v2467_v59 = vadd.f32 %v2451_v14, %v2418_v10  ;;  %v2728_v45 = vadd.f32 %v5899_v18, %v2708_v42  ;;  %v2729_v14 = vadd.f32 %v5899_v18, %v2709_v8  ;;  %v2710_v58 = vmul.f32 %v5892_v5, %v5763_v37 }
 0x1cf   :  { %v2705_v15 = vmul.f32 %v5892_v5, %v2629_v32  ;;  %v2431_v20 = vadd.f32 %v2415_v63, %v2318_v30  ;;  %v2577_v41 = vsel %vm1916_vm2, %v2575_v6, %v2576_v55  ;;  %v2726_v52 = vadd.f32 %v5899_v18, %v2706_v22  ;;  %v182_v30 = vld [vmem:[%s6135_s0 + $0x470] sm:$0xff] }
 0x1d0   :  { %v2628_v43 = vadd.f32 %v2568_v23, %v2467_v59  ;;  %v2631_v39 = vadd.f32 %v2577_v41, %v6591_v31  ;;  %v2730_v10 = vadd.f32 %v5899_v18, %v2710_v58  ;;  %v2711_v60 = vmul.f32 %v5892_v5, %v6593_v62 }
 0x1d1   :  { %v2725_v4 = vadd.f32 %v5899_v18, %v2705_v15  ;;  %v2480_v34 = vadd.f32 %v2464_v36, %v2431_v20  ;;  %v2712_v37 = vmul.f32 %v5892_v5, %v5650_v24  ;;  %v2713_v59 = vmul.f32 %v5892_v5, %v5736_v3  ;;  %v183_v3 = vld [vmem:[%s6135_s0 + $0x478] sm:$0xff] }
 0x1d2   :  { %v2704_v53 = vmul.f32 %v5892_v5, %v2628_v43  ;;  %v2707_v29 = vmul.f32 %v5892_v5, %v2631_v39  ;;  %v2731_v21 = vadd.f32 %v5899_v18, %v2711_v60  ;;  %v2714_v24 = vmul.f32 %v5892_v5, %v5794_v49 }
 0x1d3   :  { %v2641_v27 = vadd.f32 %v6590_v0, %v2480_v34  ;;  %v2732_v51 = vadd.f32 %v5899_v18, %v2712_v37  ;;  %v2733_v23 = vadd.f32 %v5899_v18, %v2713_v59  ;;  %v2715_v43 = vmul.f32 %v5892_v5, %v5858_v48 }
 0x1d4   :  { %v2724_v26 = vadd.f32 %v5899_v18, %v2704_v53  ;;  %v2727_v35 = vadd.f32 %v5899_v18, %v2707_v29  ;;  %v2734_v7 = vadd.f32 %v5899_v18, %v2714_v24  ;;  %v2716_v48 = vmul.f32 %v5892_v5, %v5919_v2  ;;  %v6034_v2 = vld [vmem:[%s6145_s10] ss:$0 sm:$0xff] }
 0x1d5   :  { %3064 = vmatmul.msk.f32.gmra.mxu3 %vm185_vm1, %v182_v30  ;;  %v2735_v49 = vadd.f32 %v5899_v18, %v2715_v43  ;;  %v2717_v28 = vmul.f32 %v5892_v5, %v2641_v27  ;;  %v2718_v32 = vmul.f32 %v5892_v5, %v5925_v56 }
 0x1d6   :  { %3068 = vmatmul.msk.f32.gmra.mxu1 %vm185_vm1, %v2724_v26  ;;  %v2736_v54 = vadd.f32 %v5899_v18, %v2716_v48 }
 0x1d7   :  { %v2737_v13 = vadd.f32 %v5899_v18, %v2717_v28  ;;  %v2738_v38 = vadd.f32 %v5899_v18, %v2718_v32 }
 0x1dd   :  { %3065 = vmatmul.msk.f32.gmra.mxu3 %vm185_vm1, %v183_v3 }
 0x1de   :  { %3069 = vmatmul.msk.f32.gmra.mxu1 %vm185_vm1, %v2725_v4 }
 0x1e6   :  { %3070 = vmatmul.msk.f32.gmra.mxu1 %vm185_vm1, %v2726_v52 }
 0x1ee   :  { %3071 = vmatmul.msk.f32.gmra.mxu1 %vm185_vm1, %v2727_v35 }
 0x1f6   :  { %3072 = vmatmul.msk.f32.gmra.mxu1 %vm185_vm1, %v2728_v45 }
 0x1fe   :  { %3073 = vmatmul.msk.f32.gmra.mxu1 %vm185_vm1, %v2729_v14 }
 0x206   :  { %3074 = vmatmul.msk.f32.gmra.mxu1 %vm185_vm1, %v2730_v10 }
 0x20e   :  { %3075 = vmatmul.msk.f32.gmra.mxu1 %vm185_vm1, %v2731_v21 }
 0x216   :  { %3076 = vmatmul.msk.f32.gmra.mxu1 %vm185_vm1, %v2732_v51 }
 0x21e   :  { %3077 = vmatmul.msk.f32.gmra.mxu1 %vm185_vm1, %v2733_v23 }
 0x226   :  { %3078 = vmatmul.msk.f32.gmra.mxu1 %vm185_vm1, %v2734_v7 }
 0x229   :  { %v813_v53 = vpop.f32.mrf.mxu1 }
 0x22e   :  { %3079 = vmatmul.msk.f32.gmra.mxu1 %vm185_vm1, %v2735_v49 }
 0x236   :  { %3080 = vmatmul.msk.f32.gmra.mxu1 %vm185_vm1, %v2736_v54 }
 0x23e   :  { %3081 = vmatmul.msk.f32.gmra.mxu1 %vm185_vm1, %v2737_v13 }
 0x243   :  { %v2808_v26 = vpop.f32.mrf.mxu1 }
 0x244   :  { %v2860_v25 = vmul.f32 %v6027_v16, %v2808_v26 }
 0x246   :  { %v2880_v40 = vadd.f32 %v6034_v2, %v2860_v25  ;;  %3082 = vmatmul.msk.f32.gmra.mxu1 %vm185_vm1, %v2738_v38 }
 0x248   :  { %2897 = vst.msk [vmem:[%s6146_s12] sm:$0xff] %vm2896_vm3, %v2880_v40 }
 0x250   :  { %v1023_v41 = vpop.f32.mrf.mxu3  ;;  %v921_v62 = vpop.f32.mrf.mxu2 }
 0x253   :  { %v2811_v5 = vpop.f32.mrf.mxu1 }
 0x254   :  { %v2861_v56 = vmul.f32 %v6027_v16, %v2811_v5 }
 0x256   :  { %v2881_v15 = vadd.f32 %v6034_v2, %v2861_v56 }
 0x258   :  { %2898 = vst.msk [vmem:[%s6146_s12 + $0x8] sm:$0xff] %vm2896_vm3, %v2881_v15  ;;  %v1025_v29 = vpop.f32.mrf.mxu3 }
 0x25b   :  { %v2814_v18 = vpop.f32.mrf.mxu1 }
 0x25c   :  { %v2862_v46 = vmul.f32 %v6027_v16, %v2814_v18 }
 0x25e   :  { %v2882_v44 = vadd.f32 %v6034_v2, %v2862_v46 }
 0x260   :  { %2899 = vst.msk [vmem:[%s6146_s12 + $0x10] sm:$0xff] %vm2896_vm3, %v2882_v44  ;;  %v1027_v60 = vpop.f32.mrf.mxu3 }
 0x263   :  { %v2817_v63 = vpop.f32.mrf.mxu1 }
 0x264   :  { %v2863_v50 = vmul.f32 %v6027_v16, %v2817_v63 }
 0x266   :  { %v2883_v9 = vadd.f32 %v6034_v2, %v2863_v50 }
 0x268   :  { %2900 = vst.msk [vmem:[%s6146_s12 + $0x18] sm:$0xff] %vm2896_vm3, %v2883_v9 }
 0x26b   :  { %v2820_v61 = vpop.f32.mrf.mxu1 }
 0x26c   :  { %v2864_v47 = vmul.f32 %v6027_v16, %v2820_v61 }
 0x26e   :  { %v2884_v36 = vadd.f32 %v6034_v2, %v2864_v47 }
 0x270   :  { %2901 = vst.msk [vmem:[%s6146_s12 + $0x20] sm:$0xff] %vm2896_vm3, %v2884_v36 }
 0x273   :  { %v2823_v20 = vpop.f32.mrf.mxu1 }
 0x274   :  { %v2865_v12 = vmul.f32 %v6027_v16, %v2823_v20 }
 0x276   :  { %v2885_v17 = vadd.f32 %v6034_v2, %v2865_v12 }
 0x278   :  { %2902 = vst.msk [vmem:[%s6146_s12 + $0x28] sm:$0xff] %vm2896_vm3, %v2885_v17 }
 0x27b   :  { %v2826_v4 = vpop.f32.mrf.mxu1 }
 0x27c   :  { %v2866_v19 = vmul.f32 %v6027_v16, %v2826_v4 }
 0x27e   :  { %v2886_v33 = vadd.f32 %v6034_v2, %v2866_v19 }
 0x280   :  { %2903 = vst.msk [vmem:[%s6146_s12 + $0x30] sm:$0xff] %vm2896_vm3, %v2886_v33 }
 0x283   :  { %v2829_v34 = vpop.f32.mrf.mxu1 }
 0x284   :  { %v2867_v55 = vmul.f32 %v6027_v16, %v2829_v34 }
 0x286   :  { %v2887_v0 = vadd.f32 %v6034_v2, %v2867_v55 }
 0x288   :  { %2904 = vst.msk [vmem:[%s6146_s12 + $0x38] sm:$0xff] %vm2896_vm3, %v2887_v0 }
 0x28b   :  { %v2832_v27 = vpop.f32.mrf.mxu1 }
 0x28c   :  { %v2868_v22 = vmul.f32 %v6027_v16, %v2832_v27 }
 0x28e   :  { %v2888_v6 = vadd.f32 %v6034_v2, %v2868_v22 }
 0x290   :  { %2905 = vst.msk [vmem:[%s6146_s12 + $0x40] sm:$0xff] %vm2896_vm3, %v2888_v6 }
 0x293   :  { %v2835_v31 = vpop.f32.mrf.mxu1 }
 0x294   :  { %v2869_v39 = vmul.f32 %v6027_v16, %v2835_v31 }
 0x296   :  { %v2889_v52 = vadd.f32 %v6034_v2, %v2869_v39 }
 0x298   :  { %2906 = vst.msk [vmem:[%s6146_s12 + $0x48] sm:$0xff] %vm2896_vm3, %v2889_v52 }
 0x29b   :  { %v2838_v35 = vpop.f32.mrf.mxu1 }
 0x29c   :  { %v2870_v11 = vmul.f32 %v6027_v16, %v2838_v35 }
 0x29e   :  { %v2890_v42 = vadd.f32 %v6034_v2, %v2870_v11 }
 0x2a0   :  { %2907 = vst.msk [vmem:[%s6146_s12 + $0x50] sm:$0xff] %vm2896_vm3, %v2890_v42 }
 0x2a3   :  { %v2841_v45 = vpop.f32.mrf.mxu1 }
 0x2a4   :  { %v2871_v8 = vmul.f32 %v6027_v16, %v2841_v45 }
 0x2a6   :  { %v2891_v14 = vadd.f32 %v6034_v2, %v2871_v8 }
 0x2a8   :  { %2908 = vst.msk [vmem:[%s6146_s12 + $0x58] sm:$0xff] %vm2896_vm3, %v2891_v14 }
 0x2ab   :  { %v2844_v58 = vpop.f32.mrf.mxu1 }
 0x2ac   :  { %v2872_v10 = vmul.f32 %v6027_v16, %v2844_v58 }
 0x2ae   :  { %v2892_v21 = vadd.f32 %v6034_v2, %v2872_v10 }
 0x2b0   :  { %2909 = vst.msk [vmem:[%s6146_s12 + $0x60] sm:$0xff] %vm2896_vm3, %v2892_v21 }
 0x2b3   :  { %v2847_v57 = vpop.f32.mrf.mxu1 }
 0x2b4   :  { %v2873_v37 = vmul.f32 %v6027_v16, %v2847_v57 }
 0x2b6   :  { %v2893_v51 = vadd.f32 %v6034_v2, %v2873_v37 }
 0x2b8   :  { %2910 = vst.msk [vmem:[%s6146_s12 + $0x68] sm:$0xff] %vm2896_vm3, %v2893_v51 }
 0x2bb   :  { %v2850_v30 = vpop.f32.mrf.mxu1 }
 0x2bc   :  { %v2874_v59 = vmul.f32 %v6027_v16, %v2850_v30 }
 0x2be   :  { %v2894_v23 = vadd.f32 %v6034_v2, %v2874_v59 }
 0x2c0   :  { %2911 = vst.msk [vmem:[%s6146_s12 + $0x70] sm:$0xff] %vm2896_vm3, %v2894_v23 }
 0x2c3   :  { %v2853_v24 = vpop.f32.mrf.mxu1 }
 0x2c4   :  { %v2875_v7 = vmul.f32 %v6027_v16, %v2853_v24 }
 0x2c6   :  { %v2895_v43 = vadd.f32 %v6034_v2, %v2875_v7 }
 0x2c8   :  { %2912 = vst.msk [vmem:[%s6146_s12 + $0x78] sm:$0xff] %vm2896_vm3, %v2895_v43 }

</bundles_post_ra>
